<compile_context>
chip_gen: v7x
topology: tpu7x:2x2x1
jax: 0.10.0
libtpu: 0.0.40
codegen_flags: <defaults>
</compile_context>

<pallas_src>
import jax
import jax.numpy as jnp
from jax import lax
from jax.experimental import pallas as pl
from jax.experimental.pallas import tpu as pltpu


def dwconv3x3_bn_kernel(xw_ref, w_ref, g_ref, b_ref, o_ref):
    # xw_ref: (N, H, W+2, CB)  input block, zero-padded along W only
    # w_ref:  (9, CB)          depthwise taps, row index = kh*3 + kw
    # g_ref:  (1, CB)          BN gamma
    # b_ref:  (1, CB)          BN beta
    # o_ref:  (N, H, W, CB)    output block
    N, H, Wp, CB = xw_ref.shape
    W = Wp - 2

    # Width taps: one slice per kw (only 2 of 3 start sublane-misaligned, each
    # done once instead of once per (kh, kw)).  Then zero-pad H -- an untiled,
    # free axis -- so every height tap below is a cheap free-axis slice.
    zrow = jnp.zeros((N, 1, W, CB), jnp.float32)
    cols = [
        jnp.concatenate(
            [zrow, xw_ref[:, :, kw:kw + W, :].astype(jnp.float32), zrow],
            axis=1)
        for kw in range(3)
    ]  # each (N, H+2, W, CB)

    # Depthwise 3x3 conv = 9 shifted multiply-accumulates on the VPU
    # (channels stay on lanes; no MXU needed for a depthwise conv).
    acc = jnp.zeros((N, H, W, CB), jnp.float32)
    for kh in range(3):
        for kw in range(3):
            tap = cols[kw][:, kh:kh + H, :, :]
            acc = acc + tap * w_ref[kh * 3 + kw].astype(jnp.float32)

    # BatchNorm2d (training forward): one-pass per-channel batch stats
    # (biased variance), folded with gamma/beta into a single scale/shift pass.
    cnt = jnp.float32(N * H * W)
    s1 = jnp.sum(acc, axis=(0, 1, 2), keepdims=True)          # (1,1,1,CB)
    s2 = jnp.sum(acc * acc, axis=(0, 1, 2), keepdims=True)    # (1,1,1,CB)
    mean = s1 / cnt
    var = s2 / cnt - mean * mean
    scale = g_ref[...].astype(jnp.float32) * lax.rsqrt(var + jnp.float32(1e-3))
    shift = b_ref[...].astype(jnp.float32) - mean * scale
    o_ref[...] = (acc * scale + shift).astype(o_ref.dtype)


def dwconv_bn(x_nchw, weight_oihw, gamma, beta, *, block_c=128):
    """Fused depthwise-3x3 Conv2d(groups=C, pad=1, no bias) + BatchNorm2d.

    x_nchw: (N, C, H, W); weight_oihw: (C, 1, 3, 3); gamma/beta: (C,).
    Returns (N, C, H, W) float32.
    """
    N, C, H, W = x_nchw.shape

    # NCHW -> NHWC (channels on lanes).  The 1-column W zero-pad fuses with
    # this transpose under jit; H zero-padding is done inside the kernel.
    x_nhwc = jnp.transpose(x_nchw, (0, 2, 3, 1)).astype(jnp.float32)
    x_wpad = jnp.pad(x_nhwc, ((0, 0), (0, 0), (1, 1), (0, 0)))   # (N, H, W+2, C)

    w9 = jnp.transpose(weight_oihw.reshape(C, 9), (1, 0)).astype(jnp.float32)
    g = gamma.reshape(1, C).astype(jnp.float32)
    b = beta.reshape(1, C).astype(jnp.float32)

    cb = min(block_c, C)
    grid = (pl.cdiv(C, cb),)

    out_nhwc = pl.pallas_call(
        dwconv3x3_bn_kernel,
        out_shape=jax.ShapeDtypeStruct((N, H, W, C), jnp.float32),
        grid=grid,
        in_specs=[
            pl.BlockSpec((N, H, W + 2, cb), lambda c: (0, 0, 0, c)),
            pl.BlockSpec((9, cb), lambda c: (0, c)),
            pl.BlockSpec((1, cb), lambda c: (0, c)),
            pl.BlockSpec((1, cb), lambda c: (0, c)),
        ],
        out_specs=pl.BlockSpec((N, H, W, cb), lambda c: (0, 0, 0, c)),
        compiler_params=pltpu.CompilerParams(
            dimension_semantics=("parallel",),
            vmem_limit_bytes=32 * 1024 * 1024,
        ),
    )(x_wpad, w9, g, b)

    return jnp.transpose(out_nhwc, (0, 3, 1, 2))


def reference(x_nchw, weight_oihw, gamma, beta):
    """Pure-JAX reference of Conv2d(groups=C) + BatchNorm2d (training forward)."""
    C = x_nchw.shape[1]
    y = lax.conv_general_dilated(
        x_nchw, weight_oihw,
        window_strides=(1, 1), padding=((1, 1), (1, 1)),
        feature_group_count=C,
        dimension_numbers=("NCHW", "OIHW", "NCHW"),
    )
    mean = jnp.mean(y, axis=(0, 2, 3), keepdims=True)
    var = jnp.var(y, axis=(0, 2, 3), keepdims=True)  # biased, like BN training
    return ((y - mean) * lax.rsqrt(var + 1e-3)
            * gamma.reshape(1, C, 1, 1) + beta.reshape(1, C, 1, 1))


if __name__ == "__main__":
    # Small shapes consistent with the module (orig: N=1, C=960, H=W=14).
    N, C, H, W = 2, 256, 14, 14

    key = jax.random.PRNGKey(0)
    kx, kw_, kg, kb = jax.random.split(key, 4)
    x = jax.random.normal(kx, (N, C, H, W), dtype=jnp.float32)
    weight = 0.1 * jax.random.normal(kw_, (C, 1, 3, 3), dtype=jnp.float32)
    gamma = 1.0 + 0.05 * jax.random.normal(kg, (C,), dtype=jnp.float32)
    beta = 0.05 * jax.random.normal(kb, (C,), dtype=jnp.float32)

    fn = jax.jit(dwconv_bn)
    out = jax.block_until_ready(fn(x, weight, gamma, beta))

    ref = jax.block_until_ready(reference(x, weight, gamma, beta))
    assert out.shape == (N, C, H, W)
    assert jnp.allclose(out, ref, atol=1e-4, rtol=1e-4), "mismatch vs reference"

    print("KERNEL_OK")
</pallas_src>

<mosaic_0001>
module attributes {stable_mosaic.version = 11 : i64} {
  func.func @dwconv3x3_bn_kernel(%arg0: i32, %arg1: memref<2x14x16x128xf32, #tpu.memory_space<vmem>>, %arg2: memref<9x128xf32, #tpu.memory_space<vmem>>, %arg3: memref<1x128xf32, #tpu.memory_space<vmem>>, %arg4: memref<1x128xf32, #tpu.memory_space<vmem>>, %arg5: memref<2x14x14x128xf32, #tpu.memory_space<vmem>>) attributes {dimension_semantics = [#tpu.dimension_semantics<parallel>], iteration_bounds = array<i64: 2>, scalar_prefetch = 0 : i64, scratch_operands = 0 : i64, tpu.core_type = #tpu.core_type<tc>, window_params = [{transform_indices = @transform_0, window_bounds = array<i64: 2, 14, 16, 128>}, {transform_indices = @transform_1, window_bounds = array<i64: 9, 128>}, {transform_indices = @transform_2, window_bounds = array<i64: 1, 128>}, {transform_indices = @transform_3, window_bounds = array<i64: 1, 128>}, {transform_indices = @transform_4, window_bounds = array<i64: 2, 14, 14, 128>}]} {
    %cst = arith.constant 0.000000e+00 : f32
    %0 = vector.broadcast %cst : f32 to vector<2x1x14x128xf32>
    %c0 = arith.constant 0 : index
    %c0_0 = arith.constant 0 : index
    %c0_1 = arith.constant 0 : index
    %c0_2 = arith.constant 0 : index
    %1 = vector.load %arg1[%c0, %c0_0, %c0_1, %c0_2] : memref<2x14x16x128xf32, #tpu.memory_space<vmem>>, vector<2x14x14x128xf32>
    %2 = tpu.concatenate %0, %1, %0 in 1 : vector<2x1x14x128xf32>, vector<2x14x14x128xf32>, vector<2x1x14x128xf32> -> vector<2x16x14x128xf32>
    %c0_3 = arith.constant 0 : index
    %c0_4 = arith.constant 0 : index
    %c1 = arith.constant 1 : index
    %c0_5 = arith.constant 0 : index
    %3 = vector.load %arg1[%c0_3, %c0_4, %c1, %c0_5] : memref<2x14x16x128xf32, #tpu.memory_space<vmem>>, vector<2x14x14x128xf32>
    %4 = tpu.concatenate %0, %3, %0 in 1 : vector<2x1x14x128xf32>, vector<2x14x14x128xf32>, vector<2x1x14x128xf32> -> vector<2x16x14x128xf32>
    %c0_6 = arith.constant 0 : index
    %c0_7 = arith.constant 0 : index
    %c2 = arith.constant 2 : index
    %c0_8 = arith.constant 0 : index
    %5 = vector.load %arg1[%c0_6, %c0_7, %c2, %c0_8] : memref<2x14x16x128xf32, #tpu.memory_space<vmem>>, vector<2x14x14x128xf32>
    %6 = tpu.concatenate %0, %5, %0 in 1 : vector<2x1x14x128xf32>, vector<2x14x14x128xf32>, vector<2x1x14x128xf32> -> vector<2x16x14x128xf32>
    %cst_9 = arith.constant 0.000000e+00 : f32
    %7 = vector.broadcast %cst_9 : f32 to vector<2x14x14x128xf32>
    %8 = vector.extract_strided_slice %2 {offsets = [0, 0, 0, 0], sizes = [2, 14, 14, 128], strides = [1, 1, 1, 1]} : vector<2x16x14x128xf32> to vector<2x14x14x128xf32>
    %c0_10 = arith.constant 0 : index
    %c0_11 = arith.constant 0 : index
    %9 = vector.load %arg2[%c0_10, %c0_11] : memref<9x128xf32, #tpu.memory_space<vmem>>, vector<1x128xf32>
    %10 = vector.shape_cast %9 : vector<1x128xf32> to vector<128xf32>
    %11 = vector.shape_cast %10 : vector<128xf32> to vector<1x1x1x128xf32>
    %12 = vector.broadcast %11 : vector<1x1x1x128xf32> to vector<2x14x14x128xf32>
    %13 = arith.mulf %8, %12 : vector<2x14x14x128xf32>
    %14 = arith.addf %7, %13 : vector<2x14x14x128xf32>
    %15 = vector.extract_strided_slice %4 {offsets = [0, 0, 0, 0], sizes = [2, 14, 14, 128], strides = [1, 1, 1, 1]} : vector<2x16x14x128xf32> to vector<2x14x14x128xf32>
    %c1_12 = arith.constant 1 : index
    %c0_13 = arith.constant 0 : index
    %16 = vector.load %arg2[%c1_12, %c0_13] : memref<9x128xf32, #tpu.memory_space<vmem>>, vector<1x128xf32>
    %17 = vector.shape_cast %16 : vector<1x128xf32> to vector<128xf32>
    %18 = vector.shape_cast %17 : vector<128xf32> to vector<1x1x1x128xf32>
    %19 = vector.broadcast %18 : vector<1x1x1x128xf32> to vector<2x14x14x128xf32>
    %20 = arith.mulf %15, %19 : vector<2x14x14x128xf32>
    %21 = arith.addf %14, %20 : vector<2x14x14x128xf32>
    %22 = vector.extract_strided_slice %6 {offsets = [0, 0, 0, 0], sizes = [2, 14, 14, 128], strides = [1, 1, 1, 1]} : vector<2x16x14x128xf32> to vector<2x14x14x128xf32>
    %c2_14 = arith.constant 2 : index
    %c0_15 = arith.constant 0 : index
    %23 = vector.load %arg2[%c2_14, %c0_15] : memref<9x128xf32, #tpu.memory_space<vmem>>, vector<1x128xf32>
    %24 = vector.shape_cast %23 : vector<1x128xf32> to vector<128xf32>
    %25 = vector.shape_cast %24 : vector<128xf32> to vector<1x1x1x128xf32>
    %26 = vector.broadcast %25 : vector<1x1x1x128xf32> to vector<2x14x14x128xf32>
    %27 = arith.mulf %22, %26 : vector<2x14x14x128xf32>
    %28 = arith.addf %21, %27 : vector<2x14x14x128xf32>
    %29 = vector.extract_strided_slice %2 {offsets = [0, 1, 0, 0], sizes = [2, 14, 14, 128], strides = [1, 1, 1, 1]} : vector<2x16x14x128xf32> to vector<2x14x14x128xf32>
    %c3 = arith.constant 3 : index
    %c0_16 = arith.constant 0 : index
    %30 = vector.load %arg2[%c3, %c0_16] : memref<9x128xf32, #tpu.memory_space<vmem>>, vector<1x128xf32>
    %31 = vector.shape_cast %30 : vector<1x128xf32> to vector<128xf32>
    %32 = vector.shape_cast %31 : vector<128xf32> to vector<1x1x1x128xf32>
    %33 = vector.broadcast %32 : vector<1x1x1x128xf32> to vector<2x14x14x128xf32>
    %34 = arith.mulf %29, %33 : vector<2x14x14x128xf32>
    %35 = arith.addf %28, %34 : vector<2x14x14x128xf32>
    %36 = vector.extract_strided_slice %4 {offsets = [0, 1, 0, 0], sizes = [2, 14, 14, 128], strides = [1, 1, 1, 1]} : vector<2x16x14x128xf32> to vector<2x14x14x128xf32>
    %c4 = arith.constant 4 : index
    %c0_17 = arith.constant 0 : index
    %37 = vector.load %arg2[%c4, %c0_17] : memref<9x128xf32, #tpu.memory_space<vmem>>, vector<1x128xf32>
    %38 = vector.shape_cast %37 : vector<1x128xf32> to vector<128xf32>
    %39 = vector.shape_cast %38 : vector<128xf32> to vector<1x1x1x128xf32>
    %40 = vector.broadcast %39 : vector<1x1x1x128xf32> to vector<2x14x14x128xf32>
    %41 = arith.mulf %36, %40 : vector<2x14x14x128xf32>
    %42 = arith.addf %35, %41 : vector<2x14x14x128xf32>
    %43 = vector.extract_strided_slice %6 {offsets = [0, 1, 0, 0], sizes = [2, 14, 14, 128], strides = [1, 1, 1, 1]} : vector<2x16x14x128xf32> to vector<2x14x14x128xf32>
    %c5 = arith.constant 5 : index
    %c0_18 = arith.constant 0 : index
    %44 = vector.load %arg2[%c5, %c0_18] : memref<9x128xf32, #tpu.memory_space<vmem>>, vector<1x128xf32>
    %45 = vector.shape_cast %44 : vector<1x128xf32> to vector<128xf32>
    %46 = vector.shape_cast %45 : vector<128xf32> to vector<1x1x1x128xf32>
    %47 = vector.broadcast %46 : vector<1x1x1x128xf32> to vector<2x14x14x128xf32>
    %48 = arith.mulf %43, %47 : vector<2x14x14x128xf32>
    %49 = arith.addf %42, %48 : vector<2x14x14x128xf32>
    %50 = vector.extract_strided_slice %2 {offsets = [0, 2, 0, 0], sizes = [2, 14, 14, 128], strides = [1, 1, 1, 1]} : vector<2x16x14x128xf32> to vector<2x14x14x128xf32>
    %c6 = arith.constant 6 : index
    %c0_19 = arith.constant 0 : index
    %51 = vector.load %arg2[%c6, %c0_19] : memref<9x128xf32, #tpu.memory_space<vmem>>, vector<1x128xf32>
    %52 = vector.shape_cast %51 : vector<1x128xf32> to vector<128xf32>
    %53 = vector.shape_cast %52 : vector<128xf32> to vector<1x1x1x128xf32>
    %54 = vector.broadcast %53 : vector<1x1x1x128xf32> to vector<2x14x14x128xf32>
    %55 = arith.mulf %50, %54 : vector<2x14x14x128xf32>
    %56 = arith.addf %49, %55 : vector<2x14x14x128xf32>
    %57 = vector.extract_strided_slice %4 {offsets = [0, 2, 0, 0], sizes = [2, 14, 14, 128], strides = [1, 1, 1, 1]} : vector<2x16x14x128xf32> to vector<2x14x14x128xf32>
    %c7 = arith.constant 7 : index
    %c0_20 = arith.constant 0 : index
    %58 = vector.load %arg2[%c7, %c0_20] : memref<9x128xf32, #tpu.memory_space<vmem>>, vector<1x128xf32>
    %59 = vector.shape_cast %58 : vector<1x128xf32> to vector<128xf32>
    %60 = vector.shape_cast %59 : vector<128xf32> to vector<1x1x1x128xf32>
    %61 = vector.broadcast %60 : vector<1x1x1x128xf32> to vector<2x14x14x128xf32>
    %62 = arith.mulf %57, %61 : vector<2x14x14x128xf32>
    %63 = arith.addf %56, %62 : vector<2x14x14x128xf32>
    %64 = vector.extract_strided_slice %6 {offsets = [0, 2, 0, 0], sizes = [2, 14, 14, 128], strides = [1, 1, 1, 1]} : vector<2x16x14x128xf32> to vector<2x14x14x128xf32>
    %c8 = arith.constant 8 : index
    %c0_21 = arith.constant 0 : index
    %65 = vector.load %arg2[%c8, %c0_21] : memref<9x128xf32, #tpu.memory_space<vmem>>, vector<1x128xf32>
    %66 = vector.shape_cast %65 : vector<1x128xf32> to vector<128xf32>
    %67 = vector.shape_cast %66 : vector<128xf32> to vector<1x1x1x128xf32>
    %68 = vector.broadcast %67 : vector<1x1x1x128xf32> to vector<2x14x14x128xf32>
    %69 = arith.mulf %64, %68 : vector<2x14x14x128xf32>
    %70 = arith.addf %63, %69 : vector<2x14x14x128xf32>
    %cst_22 = arith.constant dense<0.000000e+00> : vector<128xf32>
    %71 = vector.multi_reduction <add>, %70, %cst_22 [0, 1, 2] : vector<2x14x14x128xf32> to vector<128xf32>
    %72 = vector.shape_cast %71 : vector<128xf32> to vector<1x1x1x128xf32>
    %73 = arith.mulf %70, %70 : vector<2x14x14x128xf32>
    %cst_23 = arith.constant dense<0.000000e+00> : vector<128xf32>
    %74 = vector.multi_reduction <add>, %73, %cst_23 [0, 1, 2] : vector<2x14x14x128xf32> to vector<128xf32>
    %75 = vector.shape_cast %74 : vector<128xf32> to vector<1x1x1x128xf32>
    %cst_24 = arith.constant 3.920000e+02 : f32
    %76 = vector.broadcast %cst_24 : f32 to vector<1x1x1x128xf32>
    %77 = arith.divf %72, %76 : vector<1x1x1x128xf32>
    %cst_25 = arith.constant 3.920000e+02 : f32
    %78 = vector.broadcast %cst_25 : f32 to vector<1x1x1x128xf32>
    %79 = arith.divf %75, %78 : vector<1x1x1x128xf32>
    %80 = arith.mulf %77, %77 : vector<1x1x1x128xf32>
    %81 = arith.subf %79, %80 : vector<1x1x1x128xf32>
    %c0_26 = arith.constant 0 : index
    %c0_27 = arith.constant 0 : index
    %82 = vector.load %arg3[%c0_26, %c0_27] : memref<1x128xf32, #tpu.memory_space<vmem>>, vector<1x128xf32>
    %cst_28 = arith.constant 1.000000e-03 : f32
    %83 = vector.broadcast %cst_28 : f32 to vector<1x1x1x128xf32>
    %84 = arith.addf %81, %83 : vector<1x1x1x128xf32>
    %85 = math.rsqrt %84 : vector<1x1x1x128xf32>
    %86 = vector.shape_cast %82 : vector<1x128xf32> to vector<1x1x1x128xf32>
    %87 = arith.mulf %86, %85 : vector<1x1x1x128xf32>
    %c0_29 = arith.constant 0 : index
    %c0_30 = arith.constant 0 : index
    %88 = vector.load %arg4[%c0_29, %c0_30] : memref<1x128xf32, #tpu.memory_space<vmem>>, vector<1x128xf32>
    %89 = arith.mulf %77, %87 : vector<1x1x1x128xf32>
    %90 = vector.shape_cast %88 : vector<1x128xf32> to vector<1x1x1x128xf32>
    %91 = arith.subf %90, %89 : vector<1x1x1x128xf32>
    %92 = vector.broadcast %87 : vector<1x1x1x128xf32> to vector<2x14x14x128xf32>
    %93 = arith.mulf %70, %92 : vector<2x14x14x128xf32>
    %94 = vector.broadcast %91 : vector<1x1x1x128xf32> to vector<2x14x14x128xf32>
    %95 = arith.addf %93, %94 : vector<2x14x14x128xf32>
    %c0_31 = arith.constant 0 : index
    %c0_32 = arith.constant 0 : index
    %c0_33 = arith.constant 0 : index
    %c0_34 = arith.constant 0 : index
    %96 = vector.load %arg5[%c0_31, %c0_32, %c0_33, %c0_34] : memref<2x14x14x128xf32, #tpu.memory_space<vmem>>, vector<2x14x14x128xf32>
    tpu.vector_store %arg5[%c0_31, %c0_32, %c0_33, %c0_34], %95 {strides = array<i32>} : memref<2x14x14x128xf32, #tpu.memory_space<vmem>>, vector<2x14x14x128xf32>,
    return
  }
  func.func @transform_0(%arg0: i32) -> (i32, i32, i32, i32) {
    %c0_i32 = arith.constant 0 : i32
    %c0_i32_0 = arith.constant 0 : i32
    %c0_i32_1 = arith.constant 0 : i32
    %c0_i32_2 = arith.constant 0 : i32
    return %c0_i32, %c0_i32_0, %c0_i32_1, %arg0 : i32, i32, i32, i32
  }
  func.func @transform_1(%arg0: i32) -> (i32, i32) {
    %c0_i32 = arith.constant 0 : i32
    %c0_i32_0 = arith.constant 0 : i32
    return %c0_i32, %arg0 : i32, i32
  }
  func.func @transform_2(%arg0: i32) -> (i32, i32) {
    %c0_i32 = arith.constant 0 : i32
    %c0_i32_0 = arith.constant 0 : i32
    return %c0_i32, %arg0 : i32, i32
  }
  func.func @transform_3(%arg0: i32) -> (i32, i32) {
    %c0_i32 = arith.constant 0 : i32
    %c0_i32_0 = arith.constant 0 : i32
    return %c0_i32, %arg0 : i32, i32
  }
  func.func @transform_4(%arg0: i32) -> (i32, i32, i32, i32) {
    %c0_i32 = arith.constant 0 : i32
    %c0_i32_0 = arith.constant 0 : i32
    %c0_i32_1 = arith.constant 0 : i32
    %c0_i32_2 = arith.constant 0 : i32
    return %c0_i32, %c0_i32_0, %c0_i32_1, %arg0 : i32, i32, i32, i32
  }
}

</mosaic_0001>

<bundles_post_ra>
// kernel: dwconv_bn.1
= control target key start
LH: loop header
LB: loop body
LE: loop exit
PB: predicated region body
PF: predicated region fallthrough
CT: control target
= control target key end

     0   :  { %s2748_s15 = smov 0   ;;  %s2750_s16 = smov 0   ;;  %s6909_s0 = inlined_call_operand.vmem [shape: f32[2,14,16,256], index: 0, kind: input, shape index: {}]   ;;  %s6910_s1 = inlined_call_operand.vmem [shape: f32[9,256], index: 1, kind: input, shape index: {}]   ;;  %s6911_s2 = inlined_call_operand.vmem [shape: f32[1,256], index: 2, kind: input, shape index: {}]   ;;  %s6912_s3 = inlined_call_operand.vmem [shape: f32[1,256], index: 3, kind: input, shape index: {}]   ;;  %s6913_s4 = inlined_call_operand.vmem [shape: f32[2,14,14,256], index: 4, kind: output, shape index: {}]  }
   0x1   :  { %s2752_s17 = smov 0  }
   0x2 LB: > { %s2764_s18 = sadd.s32 4294967295, %s2721_s17   ;;  %s2767_s19 = sadd.s32 1, %s2721_s17   ;;  %s2721_s17 = sphi %s2752_s17, %s8130_s17   ;;  %s2717_s16 = sphi %s2750_s16, %s8129_s16   ;;  %s2713_s15 = sphi %s2748_s15, %s8128_s15  }
   0x3   : > { %s18_s20 = ssub.s32 %s2721_s17, %s2767_s19  ;;  %s21_s21 = sadd.s32 1, %s2717_s16 }
   0x4   : > { %p19_p0 = scmp.eq.s32.totalorder %s18_s20, 0  ;;  %p28_p1 = scmp.ne.s32.totalorder %s2717_s16, %s2713_s15 }
   0x5   : > { %p29_p2 = scmp.eq.s32.totalorder %s2721_s17, 0  ;;  %p136_p3 = scmp.eq.s32.totalorder %s2764_s18, 1 }
   0x6   : > { %s2777_s22 = scalar_select %p19_p0, %s2717_s16, %s21_s21  }
   0x7   : > { %p2779_p4 = por %p29_p2, %p28_p1  ;;  %p2783_p5 = por %p136_p3, %p28_p1 }
   0x8   : > { %p2509_p6 = scmp.ge.s32.totalorder %s2721_s17, 2 }
   0xa   : > { %158 = sbr.rel (%p2509_p6) target bundleno = 56 (0x38), region = 16 }
  0x11   : > { %161 = sbr.rel (!%p2779_p4) target bundleno = 49 (0x31), region = 20  ;;  %s163_s25 = sand.u32 (%p2779_p4), 1, %s2717_s16  }
  0x12   : > { %s2510_s26 = sshll.u32 (%p2779_p4), %s2721_s17, 3  ;;  %s2527_s27 = smul.u32 (%p2779_p4), 448, %s163_s25 }
  0x13   : > { %s2795_s30 = scalar_lea.vmem (%p2779_p4), %s6909_s0, %s2510_s26 }
  0x14   : > { %v305_v0 = vld [vmem:[%s2795_s30] sm:$0xff] (%p2779_p4)  ;;  %v307_v1 = vld [vmem:[%s2795_s30 + $0x10] sm:$0xff] (%p2779_p4)  ;;  %s2803_s5 = scalar_lea.vmem (%p2779_p4), [#allocation2], %s2527_s27 }
  0x15   : > { %v309_v2 = vld [vmem:[%s2795_s30 + $0x20] sm:$0xff] (%p2779_p4)  ;;  %v311_v3 = vld [vmem:[%s2795_s30 + $0x30] sm:$0xff] (%p2779_p4)  ;;  %306 = vst [vmem:[%s2803_s5] sm:$0xff] (%p2779_p4), %v305_v0  ;;  %308 = vst [vmem:[%s2803_s5 + $0x8] sm:$0xff] (%p2779_p4), %v307_v1 }
  0x16   : > { %v313_v4 = vld [vmem:[%s2795_s30 + $0x40] sm:$0xff] (%p2779_p4)  ;;  %v315_v5 = vld [vmem:[%s2795_s30 + $0x50] sm:$0xff] (%p2779_p4)  ;;  %310 = vst [vmem:[%s2803_s5 + $0x10] sm:$0xff] (%p2779_p4), %v309_v2  ;;  %312 = vst [vmem:[%s2803_s5 + $0x18] sm:$0xff] (%p2779_p4), %v311_v3 }
  0x17   : > { %314 = vst [vmem:[%s2803_s5 + $0x20] sm:$0xff] (%p2779_p4), %v313_v4  ;;  %316 = vst [vmem:[%s2803_s5 + $0x28] sm:$0xff] (%p2779_p4), %v315_v5  ;;  %v317_v6 = vld [vmem:[%s2795_s30 + $0x60] sm:$0xff] (%p2779_p4)  ;;  %v319_v7 = vld [vmem:[%s2795_s30 + $0x70] sm:$0xff] (%p2779_p4) }
  0x18   : > { %v321_v8 = vld [vmem:[%s2795_s30 + $0x80] sm:$0xff]  ;;  %318 = vst [vmem:[%s2803_s5 + $0x30] sm:$0xff] %v317_v6  ;;  %320 = vst [vmem:[%s2803_s5 + $0x38] sm:$0xff] %v319_v7  ;;  %v323_v9 = vld [vmem:[%s2795_s30 + $0x90] sm:$0xff] }
  0x19   : > { %322 = vst [vmem:[%s2803_s5 + $0x40] sm:$0xff] %v321_v8  ;;  %v325_v10 = vld [vmem:[%s2795_s30 + $0xa0] sm:$0xff]  ;;  %v327_v11 = vld [vmem:[%s2795_s30 + $0xb0] sm:$0xff]  ;;  %324 = vst [vmem:[%s2803_s5 + $0x48] sm:$0xff] %v323_v9 }
  0x1a   : > { %326 = vst [vmem:[%s2803_s5 + $0x50] sm:$0xff] %v325_v10  ;;  %328 = vst [vmem:[%s2803_s5 + $0x58] sm:$0xff] %v327_v11  ;;  %v329_v12 = vld [vmem:[%s2795_s30 + $0xc0] sm:$0xff]  ;;  %v331_v13 = vld [vmem:[%s2795_s30 + $0xd0] sm:$0xff] }
  0x1b   : > { %v333_v14 = vld [vmem:[%s2795_s30 + $0xe0] sm:$0xff]  ;;  %330 = vst [vmem:[%s2803_s5 + $0x60] sm:$0xff] %v329_v12  ;;  %332 = vst [vmem:[%s2803_s5 + $0x68] sm:$0xff] %v331_v13  ;;  %v335_v15 = vld [vmem:[%s2795_s30 + $0xf0] sm:$0xff] }
  0x1c   : > { %334 = vst [vmem:[%s2803_s5 + $0x70] sm:$0xff] %v333_v14  ;;  %v337_v16 = vld [vmem:[%s2795_s30 + $0x100] sm:$0xff]  ;;  %v339_v17 = vld [vmem:[%s2795_s30 + $0x110] sm:$0xff]  ;;  %336 = vst [vmem:[%s2803_s5 + $0x78] sm:$0xff] %v335_v15 }
  0x1d   : > { %338 = vst [vmem:[%s2803_s5 + $0x80] sm:$0xff] %v337_v16  ;;  %340 = vst [vmem:[%s2803_s5 + $0x88] sm:$0xff] %v339_v17  ;;  %v341_v18 = vld [vmem:[%s2795_s30 + $0x120] sm:$0xff]  ;;  %v343_v19 = vld [vmem:[%s2795_s30 + $0x130] sm:$0xff] }
  0x1e   : > { %v345_v20 = vld [vmem:[%s2795_s30 + $0x140] sm:$0xff]  ;;  %342 = vst [vmem:[%s2803_s5 + $0x90] sm:$0xff] %v341_v18  ;;  %344 = vst [vmem:[%s2803_s5 + $0x98] sm:$0xff] %v343_v19  ;;  %v347_v21 = vld [vmem:[%s2795_s30 + $0x150] sm:$0xff] }
  0x1f   : > { %346 = vst [vmem:[%s2803_s5 + $0xa0] sm:$0xff] %v345_v20  ;;  %v349_v22 = vld [vmem:[%s2795_s30 + $0x160] sm:$0xff]  ;;  %v351_v23 = vld [vmem:[%s2795_s30 + $0x170] sm:$0xff]  ;;  %348 = vst [vmem:[%s2803_s5 + $0xa8] sm:$0xff] %v347_v21 }
  0x20   : > { %350 = vst [vmem:[%s2803_s5 + $0xb0] sm:$0xff] %v349_v22  ;;  %352 = vst [vmem:[%s2803_s5 + $0xb8] sm:$0xff] %v351_v23  ;;  %v353_v24 = vld [vmem:[%s2795_s30 + $0x180] sm:$0xff]  ;;  %v355_v25 = vld [vmem:[%s2795_s30 + $0x190] sm:$0xff] }
  0x21   : > { %v357_v26 = vld [vmem:[%s2795_s30 + $0x1a0] sm:$0xff]  ;;  %354 = vst [vmem:[%s2803_s5 + $0xc0] sm:$0xff] %v353_v24  ;;  %356 = vst [vmem:[%s2803_s5 + $0xc8] sm:$0xff] %v355_v25  ;;  %v359_v27 = vld [vmem:[%s2795_s30 + $0x1b0] sm:$0xff] }
  0x22   : > { %358 = vst [vmem:[%s2803_s5 + $0xd0] sm:$0xff] %v357_v26  ;;  %v361_v28 = vld [vmem:[%s2795_s30 + $0x1c0] sm:$0xff]  ;;  %v363_v29 = vld [vmem:[%s2795_s30 + $0x1d0] sm:$0xff]  ;;  %360 = vst [vmem:[%s2803_s5 + $0xd8] sm:$0xff] %v359_v27 }
  0x23   : > { %362 = vst [vmem:[%s2803_s5 + $0xe0] sm:$0xff] %v361_v28  ;;  %364 = vst [vmem:[%s2803_s5 + $0xe8] sm:$0xff] %v363_v29  ;;  %v365_v30 = vld [vmem:[%s2795_s30 + $0x1e0] sm:$0xff]  ;;  %v367_v31 = vld [vmem:[%s2795_s30 + $0x1f0] sm:$0xff] }
  0x24   : > { %v369_v32 = vld [vmem:[%s2795_s30 + $0x200] sm:$0xff]  ;;  %366 = vst [vmem:[%s2803_s5 + $0xf0] sm:$0xff] %v365_v30  ;;  %368 = vst [vmem:[%s2803_s5 + $0xf8] sm:$0xff] %v367_v31  ;;  %v371_v33 = vld [vmem:[%s2795_s30 + $0x210] sm:$0xff] }
  0x25   : > { %370 = vst [vmem:[%s2803_s5 + $0x100] sm:$0xff] %v369_v32  ;;  %v373_v34 = vld [vmem:[%s2795_s30 + $0x220] sm:$0xff]  ;;  %v375_v35 = vld [vmem:[%s2795_s30 + $0x230] sm:$0xff]  ;;  %372 = vst [vmem:[%s2803_s5 + $0x108] sm:$0xff] %v371_v33 }
  0x26   : > { %374 = vst [vmem:[%s2803_s5 + $0x110] sm:$0xff] %v373_v34  ;;  %376 = vst [vmem:[%s2803_s5 + $0x118] sm:$0xff] %v375_v35  ;;  %v377_v36 = vld [vmem:[%s2795_s30 + $0x240] sm:$0xff]  ;;  %v379_v37 = vld [vmem:[%s2795_s30 + $0x250] sm:$0xff] }
  0x27   : > { %v381_v38 = vld [vmem:[%s2795_s30 + $0x260] sm:$0xff]  ;;  %378 = vst [vmem:[%s2803_s5 + $0x120] sm:$0xff] %v377_v36  ;;  %380 = vst [vmem:[%s2803_s5 + $0x128] sm:$0xff] %v379_v37  ;;  %v383_v39 = vld [vmem:[%s2795_s30 + $0x270] sm:$0xff] }
  0x28   : > { %382 = vst [vmem:[%s2803_s5 + $0x130] sm:$0xff] %v381_v38  ;;  %v385_v40 = vld [vmem:[%s2795_s30 + $0x280] sm:$0xff]  ;;  %v387_v41 = vld [vmem:[%s2795_s30 + $0x290] sm:$0xff]  ;;  %384 = vst [vmem:[%s2803_s5 + $0x138] sm:$0xff] %v383_v39 }
  0x29   : > { %386 = vst [vmem:[%s2803_s5 + $0x140] sm:$0xff] %v385_v40  ;;  %388 = vst [vmem:[%s2803_s5 + $0x148] sm:$0xff] %v387_v41  ;;  %v389_v42 = vld [vmem:[%s2795_s30 + $0x2a0] sm:$0xff]  ;;  %v391_v43 = vld [vmem:[%s2795_s30 + $0x2b0] sm:$0xff] }
  0x2a   : > { %v393_v44 = vld [vmem:[%s2795_s30 + $0x2c0] sm:$0xff]  ;;  %390 = vst [vmem:[%s2803_s5 + $0x150] sm:$0xff] %v389_v42  ;;  %392 = vst [vmem:[%s2803_s5 + $0x158] sm:$0xff] %v391_v43  ;;  %v395_v45 = vld [vmem:[%s2795_s30 + $0x2d0] sm:$0xff] }
  0x2b   : > { %394 = vst [vmem:[%s2803_s5 + $0x160] sm:$0xff] %v393_v44  ;;  %v397_v46 = vld [vmem:[%s2795_s30 + $0x2e0] sm:$0xff]  ;;  %v399_v47 = vld [vmem:[%s2795_s30 + $0x2f0] sm:$0xff]  ;;  %396 = vst [vmem:[%s2803_s5 + $0x168] sm:$0xff] %v395_v45 }
  0x2c   : > { %398 = vst [vmem:[%s2803_s5 + $0x170] sm:$0xff] %v397_v46  ;;  %400 = vst [vmem:[%s2803_s5 + $0x178] sm:$0xff] %v399_v47  ;;  %v401_v48 = vld [vmem:[%s2795_s30 + $0x300] sm:$0xff]  ;;  %v403_v49 = vld [vmem:[%s2795_s30 + $0x310] sm:$0xff] }
  0x2d   : > { %v405_v50 = vld [vmem:[%s2795_s30 + $0x320] sm:$0xff]  ;;  %402 = vst [vmem:[%s2803_s5 + $0x180] sm:$0xff] %v401_v48  ;;  %404 = vst [vmem:[%s2803_s5 + $0x188] sm:$0xff] %v403_v49  ;;  %v407_v51 = vld [vmem:[%s2795_s30 + $0x330] sm:$0xff] }
  0x2e   : > { %406 = vst [vmem:[%s2803_s5 + $0x190] sm:$0xff] %v405_v50  ;;  %v409_v52 = vld [vmem:[%s2795_s30 + $0x340] sm:$0xff]  ;;  %v411_v53 = vld [vmem:[%s2795_s30 + $0x350] sm:$0xff]  ;;  %408 = vst [vmem:[%s2803_s5 + $0x198] sm:$0xff] %v407_v51 }
  0x2f   : > { %410 = vst [vmem:[%s2803_s5 + $0x1a0] sm:$0xff] %v409_v52  ;;  %412 = vst [vmem:[%s2803_s5 + $0x1a8] sm:$0xff] %v411_v53  ;;  %v413_v54 = vld [vmem:[%s2795_s30 + $0x360] sm:$0xff]  ;;  %v415_v55 = vld [vmem:[%s2795_s30 + $0x370] sm:$0xff] }
  0x30   : > { %414 = vst [vmem:[%s2803_s5 + $0x1b0] sm:$0xff] %v413_v54  ;;  %416 = vst [vmem:[%s2803_s5 + $0x1b8] sm:$0xff] %v415_v55 }
  0x31 PF: > { %422 = sbr.rel (!%p2779_p4) target bundleno = 56 (0x38), region = 58  ;;  %s424_s6 = sand.u32 (%p2779_p4), 1, %s2717_s16  }
  0x32   : > { %s2512_s7 = sshll.u32 (%p2779_p4), %s2721_s17, 3  ;;  %s2511_s8 = sshll.u32 (%p2779_p4), %s424_s6, 4 }
  0x33   : > { %s428_s11 = scalar_lea.vmem (%p2779_p4), %s6910_s1, %s2512_s7  ;;  %s426_s12 = scalar_lea.vmem (%p2779_p4), [#allocation3], %s2511_s8 }
  0x34   : > { %v458_v56 = vld [vmem:[%s428_s11] sm:$0xff] (%p2779_p4)  ;;  %v460_v57 = vld [vmem:[%s428_s11 + $0x10] sm:$0xff] (%p2779_p4) }
  0x35   : > { %459 = vst [vmem:[%s426_s12] sm:$0xff] (%p2779_p4), %v458_v56  ;;  %461 = vst [vmem:[%s426_s12 + $0x8] sm:$0xff] (%p2779_p4), %v460_v57 }
  0x38 PF: > { %p2513_p7 = scmp.ge.s32.totalorder %s2721_s17, 1  ;;  %p478_p8 = scmp.lt.s32.totalorder %s2721_s17, 3 }
  0x3a   : > { %p479_p9 = pnand %p2513_p7, %p478_p8 }
  0x3c   : > { %482 = sbr.rel (%p479_p9) target bundleno = 629 (0x275), region = 104 }
  0x43   : > { %s485_s13 = sand.u32 1, %s2713_s15   ;;  %vm1726_vm0 = vcmask 1045504   ;;  %p526_p10 = scmp.lt.s32.totalorder %s2764_s18, 1 }
  0x44   : > { %s2514_s14 = sshll.u32 %s485_s13, 4  ;;  %s2921_s20 = smul.u32 448, %s485_s13 }
  0x45   : > { %s2927_s17 = scalar_lea.vmem [#allocation3], %s2514_s14  ;;  %s2524_s5 = sshll.u32 (%p2783_p5), %s2764_s18, 3 }
  0x46   : > { %s2924_s21 = scalar_lea.vmem [#allocation2], %s2921_s20  ;;  %v2930_v59 = vld [vmem:[%s2927_s17] ss:$0 sm:$0xff]  ;;  %v3087_v41 = vld [vmem:[%s2927_s17 + $0x1] ss:$0 sm:$0xff]  ;;  %s6589_s30 = scalar_lea.vmem [#allocation4], %s2921_s20 }
  0x47   : > { %v564_v58 = vld [vmem:[%s2924_s21 + $0x100] sm:$0xff]  ;;  %v2933_v60 = vld [vmem:[%s2924_s21 + $0x108] sm:$0x3f]  ;;  %v2936_v61 = vld [vmem:[%s2924_s21 + $0x110] sm:$0xff]  ;;  %s527_s15 = scalar_select %p526_p10, %s2764_s18, 1 }
  0x48   : > { %v2939_v62 = vld [vmem:[%s2924_s21 + $0x118] sm:$0x3f]  ;;  %v2942_v63 = vmul.f32 %v2930_v59, %v564_v58  ;;  %v2945_v0 = vld [vmem:[%s2924_s21 + $0x120] sm:$0xff]  ;;  %v2948_v1 = vld [vmem:[%s2924_s21 + $0x128] sm:$0x3f]  ;;  %v2955_v3 = vmul.f32 %v2930_v59, %v2933_v60  ;;  %v2959_v4 = vmul.f32 %v2930_v59, %v2936_v61  ;;  %s6788_s8 = scalar_lea.vmem (%p2783_p5), %s6913_s4, %s2524_s5 }
  0x49   : > { %7122 = vst [vmem:[#allocation5_spill] sm:$0xff] %v2939_v62  ;;  %7123 = vst [vmem:[#allocation6_spill] sm:$0xff] %v2945_v0  ;;  %v2951_v2 = vld [vmem:[%s2924_s21 + $0x130] sm:$0xff]  ;;  %v2963_v5 = vmul.f32 %v2930_v59, %v2939_v62  ;;  %v2966_v6 = vld [vmem:[%s2924_s21 + $0x138] sm:$0x3f]  ;;  %v2976_v9 = vmul.f32 %v2930_v59, %v2945_v0  ;;  %v2980_v10 = vmul.f32 %v2930_v59, %v2948_v1  ;;  %v816_v0 = vmul.f32 0.0, %v3087_v41  ;;  %s528_s26 = scalar_lea.vmem %s6911_s2, %s527_s15  ;;  %s531_s29 = scalar_lea.vmem %s6912_s3, %s527_s15 }
  0x4a   : > { %7124 = vst [vmem:[#allocation7_spill] sm:$0xff] %v2948_v1  ;;  %7125 = vst [vmem:[#allocation8_spill] sm:$0xff] %v2951_v2  ;;  %v2969_v7 = vld [vmem:[%s2924_s21 + $0x140] sm:$0xff]  ;;  %v2972_v8 = vld [vmem:[%s2924_s21 + $0x148] sm:$0x3f]  ;;  %v2984_v11 = vmul.f32 %v2930_v59, %v2951_v2  ;;  %v2997_v15 = vmul.f32 %v2930_v59, %v2966_v6 }
  0x4b   : > { %7126 = vst [vmem:[#allocation9_spill] sm:$0xff] %v2966_v6  ;;  %7127 = vst [vmem:[#allocation10_spill] sm:$0xff] %v2969_v7  ;;  %v2987_v12 = vld [vmem:[%s2924_s21 + $0x150] sm:$0xff]  ;;  %v2990_v13 = vld [vmem:[%s2924_s21 + $0x158] sm:$0x3f]  ;;  %v3001_v16 = vmul.f32 %v2930_v59, %v2969_v7  ;;  %v3005_v17 = vmul.f32 %v2930_v59, %v2972_v8 }
  0x4c   : > { %7128 = vst [vmem:[#allocation11_spill] sm:$0xff] %v2972_v8  ;;  %7129 = vst [vmem:[#allocation12_spill] sm:$0xff] %v2987_v12  ;;  %v2993_v14 = vld [vmem:[%s2924_s21 + $0x160] sm:$0xff]  ;;  %v3008_v18 = vld [vmem:[%s2924_s21 + $0x168] sm:$0x3f]  ;;  %v3018_v21 = vmul.f32 %v2930_v59, %v2987_v12  ;;  %v3022_v22 = vmul.f32 %v2930_v59, %v2990_v13 }
  0x4d   : > { %7130 = vst [vmem:[#allocation13_spill] sm:$0xff] %v2990_v13  ;;  %7131 = vst [vmem:[#allocation14_spill] sm:$0xff] %v2993_v14  ;;  %v3011_v19 = vld [vmem:[%s2924_s21 + $0x170] sm:$0xff]  ;;  %v3014_v20 = vld [vmem:[%s2924_s21 + $0x178] sm:$0x3f]  ;;  %v3026_v23 = vmul.f32 %v2930_v59, %v2993_v14  ;;  %v3039_v27 = vmul.f32 %v2930_v59, %v3008_v18 }
  0x4e   : > { %7132 = vst [vmem:[#allocation15_spill] sm:$0xff] %v3008_v18  ;;  %7133 = vst [vmem:[#allocation16_spill] sm:$0xff] %v3011_v19  ;;  %v3029_v24 = vld [vmem:[%s2924_s21 + $0x180] sm:$0xff]  ;;  %v3032_v25 = vld [vmem:[%s2924_s21 + $0x188] sm:$0x3f]  ;;  %v3043_v28 = vmul.f32 %v2930_v59, %v3011_v19  ;;  %v3047_v29 = vmul.f32 %v2930_v59, %v3014_v20 }
  0x4f   : > { %7134 = vst [vmem:[#allocation17_spill] sm:$0xff] %v3014_v20  ;;  %7135 = vst [vmem:[#allocation18_spill] sm:$0xff] %v3029_v24  ;;  %v3035_v26 = vld [vmem:[%s2924_s21 + $0x190] sm:$0xff]  ;;  %v3050_v30 = vld [vmem:[%s2924_s21 + $0x198] sm:$0x3f]  ;;  %v3060_v33 = vmul.f32 %v2930_v59, %v3029_v24  ;;  %v3064_v34 = vmul.f32 %v2930_v59, %v3032_v25 }
  0x50   : > { %7136 = vst [vmem:[#allocation19_spill] sm:$0xff] %v3032_v25  ;;  %7137 = vst [vmem:[#allocation20_spill] sm:$0xff] %v3035_v26  ;;  %v3053_v31 = vld [vmem:[%s2924_s21 + $0x1a0] sm:$0xff]  ;;  %v3056_v32 = vld [vmem:[%s2924_s21 + $0x1a8] sm:$0x3f]  ;;  %v3068_v35 = vmul.f32 %v2930_v59, %v3035_v26  ;;  %v3072_v36 = vmul.f32 %v2930_v59, %v3050_v30 }
  0x51   : > { %7138 = vst [vmem:[#allocation21_spill] sm:$0xff] %v3050_v30  ;;  %7139 = vst [vmem:[#allocation22_spill] sm:$0xff] %v3053_v31  ;;  %v3076_v37 = vmul.f32 %v2930_v59, %v3053_v31  ;;  %v3080_v38 = vmul.f32 %v2930_v59, %v3056_v32  ;;  %v620_v39 = vld [vmem:[%s2924_s21 + $0x101] sm:$0xff]  ;;  %v3084_v40 = vld [vmem:[%s2924_s21 + $0x109] sm:$0x3f] }
  0x52   : > { %7140 = vst [vmem:[#allocation23_spill] sm:$0xff] %v3056_v32  ;;  %7141 = vst [vmem:[#allocation24_spill] sm:$0xff] %v3084_v40  ;;  %v563_v42 = vld [vmem:[%s2924_s21 + $0xf8] sm:$0x3f]  ;;  %v3097_v45 = vld [vmem:[%s2924_s21 + $0x121] sm:$0xff]  ;;  %v847_v46 = vmul.f32 %v3087_v41, %v620_v39  ;;  %v848_v47 = vmul.f32 %v3087_v41, %v3084_v40 }
  0x53   : > { %v3091_v43 = vld [vmem:[%s2924_s21 + $0x111] sm:$0xff]  ;;  %v3094_v44 = vld [vmem:[%s2924_s21 + $0x119] sm:$0x3f]  ;;  %7144 = vst [vmem:[#allocation27_spill] sm:$0xff] %v3097_v45  ;;  %v3104_v49 = vld [vmem:[%s2924_s21 + $0x129] sm:$0x3f]  ;;  %v851_v54 = vmul.f32 %v3087_v41, %v3097_v45  ;;  %v735_v20 = vmul.f32 %v2930_v59, %v563_v42 }
  0x54   : > { %7142 = vst [vmem:[#allocation25_spill] sm:$0xff] %v3091_v43  ;;  %7143 = vst [vmem:[#allocation26_spill] sm:$0xff] %v3094_v44  ;;  %v619_v48 = vld [vmem:[%s2924_s21 + $0xf9] sm:$0x3f]  ;;  %v3107_v50 = vld [vmem:[%s2924_s21 + $0x131] sm:$0xff]  ;;  %v849_v52 = vmul.f32 %v3087_v41, %v3091_v43  ;;  %v850_v53 = vmul.f32 %v3087_v41, %v3094_v44  ;;  %v852_v58 = vmul.f32 %v3087_v41, %v3104_v49 }
  0x55   : > { %7145 = vst [vmem:[#allocation28_spill] sm:$0xff] %v3104_v49  ;;  %7146 = vst [vmem:[#allocation29_spill] sm:$0xff] %v3107_v50  ;;  %v3110_v51 = vld [vmem:[%s2924_s21 + $0x139] sm:$0x3f]  ;;  %v3119_v55 = vld [vmem:[%s2924_s21 + $0x141] sm:$0xff]  ;;  %v853_v39 = vmul.f32 %v3087_v41, %v3107_v50  ;;  %v846_v14 = vmul.f32 %v3087_v41, %v619_v48  ;;  %v3199_v8 = vadd.f32 %v847_v46, %v2942_v63 }
  0x56   : > { %7147 = vst [vmem:[#allocation30_spill] sm:$0xff] %v3110_v51  ;;  %7148 = vst [vmem:[#allocation31_spill] sm:$0xff] %v3119_v55  ;;  %v3122_v56 = vld [vmem:[%s2924_s21 + $0x149] sm:$0x3f]  ;;  %v3125_v57 = vld [vmem:[%s2924_s21 + $0x151] sm:$0xff]  ;;  %v854_v44 = vmul.f32 %v3087_v41, %v3110_v51  ;;  %v855_v32 = vmul.f32 %v3087_v41, %v3119_v55  ;;  %v3202_v48 = vadd.f32 %v848_v47, %v2955_v3 }
  0x57   : > { %7149 = vst [vmem:[#allocation32_spill] sm:$0xff] %v3122_v56  ;;  %7150 = vst [vmem:[#allocation33_spill] sm:$0xff] %v3125_v57  ;;  %v3134_v43 = vld [vmem:[%s2924_s21 + $0x159] sm:$0x3f]  ;;  %v3137_v45 = vld [vmem:[%s2924_s21 + $0x161] sm:$0xff]  ;;  %v856_v49 = vmul.f32 %v3087_v41, %v3122_v56  ;;  %v857_v50 = vmul.f32 %v3087_v41, %v3125_v57  ;;  %v3196_v12 = vadd.f32 %v846_v14, %v735_v20 }
  0x58   : > { %7151 = vst [vmem:[#allocation34_spill] sm:$0xff] %v3134_v43  ;;  %7152 = vst [vmem:[#allocation35_spill] sm:$0xff] %v3137_v45  ;;  %v3140_v40 = vld [vmem:[%s2924_s21 + $0x169] sm:$0x3f]  ;;  %v3149_v31 = vld [vmem:[%s2924_s21 + $0x171] sm:$0xff]  ;;  %v858_v26 = vmul.f32 %v3087_v41, %v3134_v43  ;;  %v859_v55 = vmul.f32 %v3087_v41, %v3137_v45  ;;  %v3217_v14 = vadd.f32 %v853_v39, %v2984_v11 }
  0x59   : > { %7153 = vst [vmem:[#allocation36_spill] sm:$0xff] %v3140_v40  ;;  %7154 = vst [vmem:[#allocation37_spill] sm:$0xff] %v3149_v31  ;;  %v3152_v51 = vld [vmem:[%s2924_s21 + $0x179] sm:$0x3f]  ;;  %v3155_v30 = vld [vmem:[%s2924_s21 + $0x181] sm:$0xff]  ;;  %v860_v25 = vmul.f32 %v3087_v41, %v3140_v40  ;;  %v861_v19 = vmul.f32 %v3087_v41, %v3149_v31  ;;  %v3220_v63 = vadd.f32 %v854_v44, %v2997_v15 }
  0x5a   : > { %7155 = vst [vmem:[#allocation38_spill] sm:$0xff] %v3152_v51  ;;  %7156 = vst [vmem:[#allocation39_spill] sm:$0xff] %v3155_v30  ;;  %v3164_v56 = vld [vmem:[%s2924_s21 + $0x189] sm:$0x3f]  ;;  %v3167_v24 = vld [vmem:[%s2924_s21 + $0x191] sm:$0xff]  ;;  %v862_v43 = vmul.f32 %v3087_v41, %v3152_v51  ;;  %v863_v45 = vmul.f32 %v3087_v41, %v3155_v30  ;;  %v3223_v3 = vadd.f32 %v855_v32, %v3001_v16 }
  0x5b   : > { %7157 = vst [vmem:[#allocation40_spill] sm:$0xff] %v3164_v56  ;;  %7158 = vst [vmem:[#allocation41_spill] sm:$0xff] %v3167_v24  ;;  %v3170_v57 = vld [vmem:[%s2924_s21 + $0x199] sm:$0x3f]  ;;  %v3180_v18 = vld [vmem:[%s2924_s21 + $0x1a1] sm:$0xff]  ;;  %v864_v13 = vmul.f32 %v3087_v41, %v3164_v56  ;;  %v865_v42 = vmul.f32 %v3087_v41, %v3167_v24  ;;  %v3205_v56 = vadd.f32 %v849_v52, %v2959_v4 }
  0x5c   : > { %7159 = vst [vmem:[#allocation42_spill] sm:$0xff] %v3170_v57  ;;  %7160 = vst [vmem:[#allocation43_spill] sm:$0xff] %v3180_v18  ;;  %v3183_v40 = vld [vmem:[%s2924_s21 + $0x1a9] sm:$0x3f]  ;;  %v866_v31 = vmul.f32 %v3087_v41, %v3170_v57  ;;  %v867_v51 = vmul.f32 %v3087_v41, %v3180_v18  ;;  %v3208_v24 = vadd.f32 %v850_v53, %v2963_v5  ;;  %v3284_v32 = vld [vmem:[%s2924_s21 + $0x13a] sm:$0x3f] }
  0x5d   : > { %7161 = vst [vmem:[#allocation44_spill] sm:$0xff] %v3183_v40  ;;  %v868_v30 = vmul.f32 %v3087_v41, %v3183_v40  ;;  %v3211_v57 = vadd.f32 %v851_v54, %v2976_v9  ;;  %v3214_v18 = vadd.f32 %v852_v58, %v2980_v10  ;;  %v3226_v4 = vadd.f32 %v856_v49, %v3005_v17  ;;  %v3315_v46 = vld [vmem:[%s2924_s21 + $0x182] sm:$0xff]  ;;  %v3318_v47 = vld [vmem:[%s2924_s21 + $0x18a] sm:$0x3f]  ;;  %v3329_v53 = vld [vmem:[%s2924_s21 + $0x192] sm:$0xff] }
  0x5e   : > { %v3229_v5 = vadd.f32 %v857_v50, %v3018_v21  ;;  %v3232_v9 = vadd.f32 %v858_v26, %v3022_v22  ;;  %v3235_v10 = vadd.f32 %v859_v55, %v3026_v23  ;;  %v3238_v11 = vadd.f32 %v860_v25, %v3039_v27  ;;  %v676_v25 = vld [vmem:[%s2924_s21 + $0x102] sm:$0xff]  ;;  %v3269_v26 = vld [vmem:[%s2924_s21 + $0x112] sm:$0xff]  ;;  %v3272_v27 = vld [vmem:[%s2924_s21 + $0x11a] sm:$0x3f]  ;;  %7168 = vst [vmem:[#allocation51_spill] sm:$0xff] %v3284_v32 }
  0x5f   : > { %v3241_v15 = vadd.f32 %v861_v19, %v3043_v28  ;;  %v3244_v16 = vadd.f32 %v862_v43, %v3047_v29  ;;  %v3247_v17 = vadd.f32 %v863_v45, %v3060_v33  ;;  %v3250_v20 = vadd.f32 %v864_v13, %v3064_v34  ;;  %v3266_v13 = vld [vmem:[%s2924_s21 + $0x10a] sm:$0x3f]  ;;  %7163 = vst [vmem:[#allocation46_spill] sm:$0xff] %v3269_v26  ;;  %v3275_v28 = vld [vmem:[%s2924_s21 + $0x122] sm:$0xff]  ;;  %v3293_v34 = vld [vmem:[%s2924_s21 + $0x152] sm:$0xff] }
  0x60   : > { %v3253_v21 = vadd.f32 %v865_v42, %v3068_v35  ;;  %v3256_v19 = vadd.f32 %v866_v31, %v3072_v36  ;;  %v3259_v22 = vadd.f32 %v867_v51, %v3076_v37  ;;  %v3262_v23 = vadd.f32 %v868_v30, %v3080_v38  ;;  %7162 = vst [vmem:[#allocation45_spill] sm:$0xff] %v3266_v13  ;;  %v3278_v29 = vld [vmem:[%s2924_s21 + $0x12a] sm:$0x3f]  ;;  %v3281_v31 = vld [vmem:[%s2924_s21 + $0x132] sm:$0xff]  ;;  %v3287_v30 = vld [vmem:[%s2924_s21 + $0x142] sm:$0xff] }
  0x61   : > { %7164 = vst [vmem:[#allocation47_spill] sm:$0xff] %v3272_v27  ;;  %7165 = vst [vmem:[#allocation48_spill] sm:$0xff] %v3275_v28  ;;  %v3290_v33 = vld [vmem:[%s2924_s21 + $0x14a] sm:$0x3f]  ;;  %v3296_v35 = vld [vmem:[%s2924_s21 + $0x15a] sm:$0x3f] }
  0x62   : > { %7166 = vst [vmem:[#allocation49_spill] sm:$0xff] %v3278_v29  ;;  %7167 = vst [vmem:[#allocation50_spill] sm:$0xff] %v3281_v31  ;;  %v3299_v36 = vld [vmem:[%s2927_s17 + $0x2] ss:$0 sm:$0xff]  ;;  %v3305_v38 = vld [vmem:[%s2924_s21 + $0x16a] sm:$0x3f] }
  0x63   : > { %7169 = vst [vmem:[#allocation52_spill] sm:$0xff] %v3287_v30  ;;  %7170 = vst [vmem:[#allocation53_spill] sm:$0xff] %v3290_v33  ;;  %v3302_v37 = vld [vmem:[%s2924_s21 + $0x162] sm:$0xff]  ;;  %v3308_v43 = vld [vmem:[%s2924_s21 + $0x172] sm:$0xff]  ;;  %v958_v44 = vmul.f32 %v3299_v36, %v676_v25  ;;  %v959_v49 = vmul.f32 %v3299_v36, %v3266_v13  ;;  %v960_v50 = vmul.f32 %v3299_v36, %v3269_v26 }
  0x64   : > { %7171 = vst [vmem:[#allocation54_spill] sm:$0xff] %v3293_v34  ;;  %7172 = vst [vmem:[#allocation55_spill] sm:$0xff] %v3296_v35  ;;  %v3312_v45 = vld [vmem:[%s2924_s21 + $0x17a] sm:$0x3f]  ;;  %v961_v51 = vmul.f32 %v3299_v36, %v3272_v27  ;;  %v962_v52 = vmul.f32 %v3299_v36, %v3275_v28  ;;  %v3335_v55 = vld [vmem:[%s2924_s21 + $0x1a2] sm:$0xff]  ;;  %v963_v58 = vmul.f32 %v3299_v36, %v3278_v29 }
  0x65   : > { %7173 = vst [vmem:[#allocation56_spill] sm:$0xff] %v3299_v36  ;;  %7174 = vst [vmem:[#allocation57_spill] sm:$0xff] %v3302_v37  ;;  %v3332_v54 = vld [vmem:[%s2924_s21 + $0x19a] sm:$0x3f]  ;;  %v964_v39 = vmul.f32 %v3299_v36, %v3281_v31  ;;  %v965_v42 = vmul.f32 %v3299_v36, %v3284_v32  ;;  %v966_v25 = vmul.f32 %v3299_v36, %v3287_v30  ;;  %v3346_v28 = vld [vmem:[%s2924_s21 + $0x1aa] sm:$0x3f] }
  0x66   : > { %7175 = vst [vmem:[#allocation58_spill] sm:$0xff] %v3305_v38  ;;  %7176 = vst [vmem:[#allocation59_spill] sm:$0xff] %v3308_v43  ;;  %v967_v27 = vmul.f32 %v3299_v36, %v3290_v33  ;;  %v968_v29 = vmul.f32 %v3299_v36, %v3293_v34  ;;  %v969_v31 = vmul.f32 %v3299_v36, %v3296_v35  ;;  %v3379_v7 = vld [vmem:[%s2924_s21 + $0x8] sm:$0x3f] }
  0x67   : > { %7177 = vst [vmem:[#allocation60_spill] sm:$0xff] %v3312_v45  ;;  %7178 = vst [vmem:[#allocation61_spill] sm:$0xff] %v3315_v46  ;;  %v970_v32 = vmul.f32 %v3299_v36, %v3302_v37  ;;  %v971_v30 = vmul.f32 %v3299_v36, %v3305_v38  ;;  %v972_v26 = vmul.f32 %v3299_v36, %v3308_v43  ;;  %v675_v43 = vld [vmem:[%s2924_s21 + $0xfa] sm:$0x3f]  ;;  %v3392_v6 = vld [vmem:[%s2924_s21 + $0x28] sm:$0x3f] }
  0x68   : > { %7179 = vst [vmem:[#allocation62_spill] sm:$0xff] %v3318_v47  ;;  %7180 = vst [vmem:[#allocation63_spill] sm:$0xff] %v3329_v53  ;;  %v973_v33 = vmul.f32 %v3299_v36, %v3312_v45  ;;  %v974_v34 = vmul.f32 %v3299_v36, %v3315_v46  ;;  %v975_v35 = vmul.f32 %v3299_v36, %v3318_v47  ;;  %v3376_v45 = vld [vmem:[%s2924_s21] sm:$0xff]  ;;  %v3382_v46 = vld [vmem:[%s2924_s21 + $0x10] sm:$0xff] }
  0x69   : > { %7181 = vst [vmem:[#allocation64_spill] sm:$0xff] %v3332_v54  ;;  %7182 = vst [vmem:[#allocation65_spill] sm:$0xff] %v3335_v55  ;;  %v976_v37 = vmul.f32 %v3299_v36, %v3329_v53  ;;  %v977_v38 = vmul.f32 %v3299_v36, %v3332_v54  ;;  %v978_v13 = vmul.f32 %v3299_v36, %v3335_v55  ;;  %v3385_v47 = vld [vmem:[%s2924_s21 + $0x18] sm:$0x3f]  ;;  %v3389_v54 = vld [vmem:[%s2924_s21 + $0x20] sm:$0xff] }
  0x6a   : > { %7183 = vst [vmem:[#allocation66_spill] sm:$0xff] %v3346_v28  ;;  %v979_v40 = vmul.f32 %v3299_v36, %v3346_v28  ;;  %7184 = vst [vmem:[#allocation67_spill] sm:$0xff] %v3376_v45  ;;  %v957_v53 = vmul.f32 %v3299_v36, %v675_v43  ;;  %v3395_v55 = vld [vmem:[%s2924_s21 + $0x30] sm:$0xff]  ;;  %v705_v28 = vmul.f32 0.0, %v2930_v59  ;;  %v3400_v2 = vmul.f32 %v2930_v59, %v3376_v45 }
  0x6b   : > { %7185 = vst [vmem:[#allocation68_spill] sm:$0xff] %v3379_v7  ;;  %7186 = vst [vmem:[#allocation69_spill] sm:$0xff] %v3382_v46  ;;  %v3404_v1 = vmul.f32 %v2930_v59, %v3379_v7  ;;  %v3408_v43 = vmul.f32 %v2930_v59, %v3382_v46  ;;  %v3412_v36 = vmul.f32 %v2930_v59, %v3385_v47 }
  0x6c   : > { %7187 = vst [vmem:[#allocation70_spill] sm:$0xff] %v3385_v47  ;;  %7188 = vst [vmem:[#allocation71_spill] sm:$0xff] %v3389_v54  ;;  %v3417_v45 = vmul.f32 %v2930_v59, %v3389_v54  ;;  %v3421_v62 = vmul.f32 %v2930_v59, %v3392_v6  ;;  %v3425_v7 = vmul.f32 %v2930_v59, %v3395_v55  ;;  %v3431_v47 = vld [vmem:[%s2924_s21 + $0x38] sm:$0x3f] }
  0x6d   : > { %7189 = vst [vmem:[#allocation72_spill] sm:$0xff] %v3392_v6  ;;  %7190 = vst [vmem:[#allocation73_spill] sm:$0xff] %v3395_v55  ;;  %v3428_v46 = vadd.f32 %v957_v53, %v3196_v12  ;;  %v3437_v54 = vadd.f32 %v958_v44, %v3199_v8  ;;  %v3440_v6 = vadd.f32 %v959_v49, %v3202_v48  ;;  %v3449_v12 = vld [vmem:[%s2924_s21 + $0x48] sm:$0x3f]  ;;  %v3452_v53 = vld [vmem:[%s2924_s21 + $0x50] sm:$0xff] }
  0x6e   : > { %7191 = vst [vmem:[#allocation74_spill] sm:$0xff] %v3412_v36  ;;  %7192 = vst [vmem:[#allocation75_spill] sm:$0xff] %v3421_v62  ;;  %v3434_v36 = vld [vmem:[%s2924_s21 + $0x40] sm:$0xff]  ;;  %v3443_v62 = vadd.f32 %v960_v50, %v3205_v56  ;;  %v3446_v55 = vadd.f32 %v961_v51, %v3208_v24  ;;  %v3458_v8 = vadd.f32 %v962_v52, %v3211_v57  ;;  %v3473_v49 = vld [vmem:[%s2924_s21 + $0x68] sm:$0x3f] }
  0x6f   : > { %7193 = vst [vmem:[#allocation76_spill] sm:$0xff] %v3428_v46  ;;  %7194 = vst [vmem:[#allocation77_spill] sm:$0xff] %v3431_v47  ;;  %v3455_v46 = vld [vmem:[%s2924_s21 + $0x58] sm:$0x3f]  ;;  %v3461_v48 = vadd.f32 %v963_v58, %v3214_v18  ;;  %v3464_v56 = vadd.f32 %v964_v39, %v3217_v14  ;;  %v3467_v24 = vadd.f32 %v965_v42, %v3220_v63  ;;  %v3470_v44 = vld [vmem:[%s2924_s21 + $0x60] sm:$0xff] }
  0x70   : > { %7195 = vst [vmem:[#allocation78_spill] sm:$0xff] %v3434_v36  ;;  %7196 = vst [vmem:[#allocation79_spill] sm:$0xff] %v3449_v12  ;;  %v3476_v50 = vld [vmem:[%s2924_s21 + $0x70] sm:$0xff]  ;;  %v3479_v57 = vadd.f32 %v966_v25, %v3223_v3  ;;  %v3482_v18 = vadd.f32 %v967_v27, %v3226_v4  ;;  %v3485_v14 = vadd.f32 %v968_v29, %v3229_v5  ;;  %v3491_v51 = vld [vmem:[%s2924_s21 + $0x78] sm:$0x3f] }
  0x71   : > { %7197 = vst [vmem:[#allocation80_spill] sm:$0xff] %v3452_v53  ;;  %7198 = vst [vmem:[#allocation81_spill] sm:$0xff] %v3455_v46  ;;  %v3488_v63 = vadd.f32 %v969_v31, %v3232_v9  ;;  %v3494_v52 = vld [vmem:[%s2924_s21 + $0x80] sm:$0xff]  ;;  %v3497_v58 = vld [vmem:[%s2924_s21 + $0x88] sm:$0x3f]  ;;  %v3500_v3 = vadd.f32 %v970_v32, %v3235_v10  ;;  %v3503_v4 = vadd.f32 %v971_v30, %v3238_v11 }
  0x72   : > { %7199 = vst [vmem:[#allocation82_spill] sm:$0xff] %v3470_v44  ;;  %7200 = vst [vmem:[#allocation83_spill] sm:$0xff] %v3473_v49  ;;  %v3506_v5 = vadd.f32 %v972_v26, %v3241_v15  ;;  %v3509_v9 = vadd.f32 %v973_v33, %v3244_v16  ;;  %v3512_v27 = vld [vmem:[%s2924_s21 + $0x90] sm:$0xff]  ;;  %v3515_v29 = vld [vmem:[%s2924_s21 + $0x98] sm:$0x3f]  ;;  %v3521_v10 = vadd.f32 %v974_v34, %v3247_v17 }
  0x73   : > { %7201 = vst [vmem:[#allocation84_spill] sm:$0xff] %v3476_v50  ;;  %7202 = vst [vmem:[#allocation85_spill] sm:$0xff] %v3488_v63  ;;  %v3518_v31 = vld [vmem:[%s2924_s21 + $0xa0] sm:$0xff]  ;;  %v3524_v11 = vadd.f32 %v975_v35, %v3250_v20  ;;  %v3527_v15 = vadd.f32 %v976_v37, %v3253_v21  ;;  %v3530_v16 = vadd.f32 %v977_v38, %v3256_v19  ;;  %v3533_v26 = vld [vmem:[%s2924_s21 + $0xa8] sm:$0x3f] }
  0x74   : > { %7203 = vst [vmem:[#allocation86_spill] sm:$0xff] %v3491_v51  ;;  %7204 = vst [vmem:[#allocation87_spill] sm:$0xff] %v3494_v52  ;;  %v3536_v32 = vld [vmem:[%s2924_s21 + $0xb0] sm:$0xff]  ;;  %v3539_v30 = vld [vmem:[%s2924_s21 + $0xb8] sm:$0x3f]  ;;  %v3543_v17 = vmul.f32 %v2930_v59, %v3431_v47  ;;  %v3547_v20 = vmul.f32 %v2930_v59, %v3434_v36  ;;  %v3550_v21 = vadd.f32 %v978_v13, %v3259_v22 }
  0x75   : > { %7205 = vst [vmem:[#allocation88_spill] sm:$0xff] %v3497_v58  ;;  %7206 = vst [vmem:[#allocation89_spill] sm:$0xff] %v3500_v3  ;;  %v3553_v19 = vadd.f32 %v979_v40, %v3262_v23  ;;  %v3556_v33 = vld [vmem:[%s2924_s21 + $0xc0] sm:$0xff]  ;;  %v3559_v34 = vld [vmem:[%s2924_s21 + $0xc8] sm:$0x3f]  ;;  %v3566_v37 = vmul.f32 %v2930_v59, %v3449_v12  ;;  %v3570_v22 = vmul.f32 %v2930_v59, %v3452_v53 }
  0x76   : > { %7207 = vst [vmem:[#allocation90_spill] sm:$0xff] %v3503_v4  ;;  %7208 = vst [vmem:[#allocation91_spill] sm:$0xff] %v3506_v5  ;;  %v3562_v35 = vld [vmem:[%s2924_s21 + $0x1] sm:$0xff]  ;;  %v3574_v40 = vmul.f32 %v2930_v59, %v3455_v46  ;;  %v3576_v23 = vadd.f32 %v816_v0, %v705_v28  ;;  %v3585_v39 = vld [vmem:[%s2924_s21 + $0xf0] sm:$0xff]  ;;  %v3589_v42 = vmul.f32 %v2930_v59, %v3470_v44 }
  0x77   : > { %7209 = vst [vmem:[#allocation92_spill] sm:$0xff] %v3509_v9  ;;  %7210 = vst [vmem:[#allocation93_spill] sm:$0xff] %v3512_v27  ;;  %v3579_v13 = vld [vmem:[%s2924_s21 + $0xe0] sm:$0xff]  ;;  %v3582_v38 = vld [vmem:[%s2924_s21 + $0xe8] sm:$0x3f]  ;;  %v3593_v25 = vmul.f32 %v2930_v59, %v3473_v49  ;;  %v3597_v0 = vmul.f32 %v2930_v59, %v3476_v50  ;;  %v3601_v28 = vmul.f32 %v2930_v59, %v3491_v51 }
  0x78   : > { %7211 = vst [vmem:[#allocation94_spill] sm:$0xff] %v3515_v29  ;;  %7212 = vst [vmem:[#allocation95_spill] sm:$0xff] %v3518_v31  ;;  %v3604_v46 = vld [vmem:[%s2924_s21 + $0x9] sm:$0x3f]  ;;  %v3607_v53 = vld [vmem:[%s2924_s21 + $0x11] sm:$0xff]  ;;  %v3614_v49 = vmul.f32 %v2930_v59, %v3494_v52  ;;  %v3618_v50 = vmul.f32 %v2930_v59, %v3497_v58  ;;  %v3622_v12 = vmul.f32 %v2930_v59, %v3512_v27 }
  0x79   : > { %7213 = vst [vmem:[#allocation96_spill] sm:$0xff] %v3521_v10  ;;  %7214 = vst [vmem:[#allocation97_spill] sm:$0xff] %v3524_v11  ;;  %v3610_v44 = vld [vmem:[%s2924_s21 + $0x19] sm:$0x3f]  ;;  %v3626_v51 = vmul.f32 %v2930_v59, %v3515_v29  ;;  %v3629_v36 = vld [vmem:[%s2924_s21 + $0x21] sm:$0xff]  ;;  %v3639_v52 = vmul.f32 %v2930_v59, %v3518_v31  ;;  %v3643_v58 = vmul.f32 %v2930_v59, %v3533_v26 }
  0x7a   : > { %7215 = vst [vmem:[#allocation98_spill] sm:$0xff] %v3527_v15  ;;  %7216 = vst [vmem:[#allocation99_spill] sm:$0xff] %v3530_v16  ;;  %v3632_v47 = vld [vmem:[%s2924_s21 + $0x29] sm:$0x3f]  ;;  %v3647_v27 = vmul.f32 %v2930_v59, %v3536_v32  ;;  %v817_v29 = vmul.f32 %v3087_v41, %v3562_v35  ;;  %v3659_v31 = vmul.f32 %v2930_v59, %v3539_v30  ;;  %v7274_v16 = vld [vmem:[#allocation17_spill] sm:$0xff] }
  0x7b   : > { %7217 = vst [vmem:[#allocation100_spill] sm:$0xff] %v3533_v26  ;;  %7218 = vst [vmem:[#allocation101_spill] sm:$0xff] %v3536_v32  ;;  %v3663_v26 = vmul.f32 %v2930_v59, %v3556_v33  ;;  %v3667_v32 = vmul.f32 %v2930_v59, %v3559_v34  ;;  %v7276_v15 = vld [vmem:[#allocation18_spill] sm:$0xff]  ;;  %v7278_v11 = vld [vmem:[#allocation19_spill] sm:$0xff] }
  0x7c   : > { %7219 = vst [vmem:[#allocation102_spill] sm:$0xff] %v3539_v30  ;;  %7220 = vst [vmem:[#allocation103_spill] sm:$0xff] %v3550_v21  ;;  %v3679_v30 = vmul.f32 %v2930_v59, %v3585_v39  ;;  %v3773_v21 = vld [vmem:[%s2924_s21 + $0x51] sm:$0xff]  ;;  %v3798_v9 = vld [vmem:[%s2924_s21 + $0x69] sm:$0x3f] }
  0x7d   : > { %7221 = vst [vmem:[#allocation104_spill] sm:$0xff] %v3553_v19  ;;  %7222 = vst [vmem:[#allocation105_spill] sm:$0xff] %v3556_v33  ;;  %v818_v33 = vmul.f32 %v3087_v41, %v3604_v46  ;;  %v3801_v5 = vld [vmem:[%s2924_s21 + $0x71] sm:$0xff]  ;;  %v3823_v3 = vld [vmem:[%s2924_s21 + $0x81] sm:$0xff] }
  0x7e   : > { %7223 = vst [vmem:[#allocation106_spill] sm:$0xff] %v3559_v34  ;;  %7224 = vst [vmem:[#allocation107_spill] sm:$0xff] %v3562_v35  ;;  %v3675_v35 = vmul.f32 %v2930_v59, %v3582_v38  ;;  %v820_v34 = vmul.f32 %v3087_v41, %v3610_v44  ;;  %v7283_v4 = vld [vmem:[#allocation20_spill] sm:$0xff] }
  0x7f   : > { %7225 = vst [vmem:[#allocation108_spill] sm:$0xff] %v3576_v23  ;;  %7226 = vst [vmem:[#allocation109_spill] sm:$0xff] %v3579_v13  ;;  %v3635_v23 = vld [vmem:[%s2924_s21 + $0x31] sm:$0xff] }
  0x80   : > { %7227 = vst [vmem:[#allocation110_spill] sm:$0xff] %v3582_v38  ;;  %7228 = vst [vmem:[#allocation111_spill] sm:$0xff] %v3585_v39  ;;  %v3691_v38 = vmul.f32 %v3087_v41, %v3632_v47  ;;  %v7254_v39 = vld [vmem:[#allocation5_spill] sm:$0xff] }
  0x81   : > { %7229 = vst [vmem:[#allocation112_spill] sm:$0xff] %v3597_v0  ;;  %7230 = vst [vmem:[#allocation113_spill] sm:$0xff] %v3601_v28  ;;  %v3776_v28 = vld [vmem:[%s2924_s21 + $0x59] sm:$0x3f] }
  0x82   : > { %7231 = vst [vmem:[#allocation114_spill] sm:$0xff] %v3604_v46  ;;  %7232 = vst [vmem:[#allocation115_spill] sm:$0xff] %v3607_v53  ;;  %v3698_v46 = vld [vmem:[%s2927_s17 + $0x3] ss:$0 sm:$0xff]  ;;  %v7272_v0 = vld [vmem:[#allocation16_spill] sm:$0xff] }
  0x83   : > { %7233 = vst [vmem:[#allocation116_spill] sm:$0xff] %v3610_v44  ;;  %7234 = vst [vmem:[#allocation117_spill] sm:$0xff] %v3614_v49  ;;  %v3709_v44 = vadd.f32 %v817_v29, %v3400_v2  ;;  %v7256_v2 = vld [vmem:[#allocation7_spill] sm:$0xff]  ;;  %v3795_v10 = vmul.f32 %v3698_v46, %v7278_v11 }
  0x84   : > { %7235 = vst [vmem:[#allocation118_spill] sm:$0xff] %v3618_v50  ;;  %7236 = vst [vmem:[#allocation119_spill] sm:$0xff] %v3622_v12  ;;  %v3655_v12 = vld [vmem:[%s2924_s21 + $0x41] sm:$0xff]  ;;  %v3729_v29 = vmul.f32 %v3698_v46, %v7256_v2  ;;  %v3748_v2 = vld [vmem:[%s2924_s21 + $0x1b0] sm:$0xff] }
  0x85   : > { %7237 = vst [vmem:[#allocation120_spill] sm:$0xff] %v3626_v51  ;;  %7238 = vst [vmem:[#allocation121_spill] sm:$0xff] %v3629_v36  ;;  %v3652_v51 = vld [vmem:[%s2924_s21 + $0x39] sm:$0x3f]  ;;  %v7266_v50 = vld [vmem:[#allocation14_spill] sm:$0xff] }
  0x86   : > { %7239 = vst [vmem:[#allocation122_spill] sm:$0xff] %v3632_v47  ;;  %7240 = vst [vmem:[#allocation123_spill] sm:$0xff] %v3635_v23  ;;  %v3713_v47 = vmul.f32 %v3698_v46, %v2933_v60  ;;  %v7257_v60 = vld [vmem:[#allocation8_spill] sm:$0xff]  ;;  %v7267_v49 = vld [vmem:[#allocation15_spill] sm:$0xff] }
  0x87   : > { %7241 = vst [vmem:[#allocation124_spill] sm:$0xff] %v3639_v52  ;;  %7242 = vst [vmem:[#allocation125_spill] sm:$0xff] %v3643_v58  ;;  %v7264_v58 = vld [vmem:[#allocation12_spill] sm:$0xff]  ;;  %v7265_v52 = vld [vmem:[#allocation13_spill] sm:$0xff]  ;;  %v3770_v19 = vmul.f32 %v3698_v46, %v7267_v49  ;;  %v3791_v49 = vmul.f32 %v3698_v46, %v7276_v15 }
  0x88   : > { %7243 = vst [vmem:[#allocation126_spill] sm:$0xff] %v3647_v27  ;;  %7244 = vst [vmem:[#allocation127_spill] sm:$0xff] %v3652_v51  ;;  %v3671_v27 = vmul.f32 %v2930_v59, %v3579_v13  ;;  %v821_v13 = vmul.f32 %v3087_v41, %v3629_v36  ;;  %v3695_v59 = vmul.f32 %v3087_v41, %v3635_v23 }
  0x89   : > { %7245 = vst [vmem:[#allocation128_spill] sm:$0xff] %v3655_v12  ;;  %7246 = vst [vmem:[#allocation129_spill] sm:$0xff] %v3659_v31  ;;  %v3706_v36 = vmul.f32 %v3087_v41, %v3655_v12  ;;  %v3717_v23 = vmul.f32 %v3698_v46, %v2936_v61  ;;  %v7258_v61 = vld [vmem:[#allocation9_spill] sm:$0xff]  ;;  %v3751_v31 = vld [vmem:[%s2924_s21 + $0x1b8] sm:$0x3f] }
  0x8a   : > { %7247 = vst [vmem:[#allocation130_spill] sm:$0xff] %v3663_v26  ;;  %7248 = vst [vmem:[#allocation131_spill] sm:$0xff] %v3667_v32  ;;  %v819_v26 = vmul.f32 %v3087_v41, %v3607_v53  ;;  %v3702_v53 = vmul.f32 %v3087_v41, %v3652_v51  ;;  %v3721_v51 = vmul.f32 %v3698_v46, %v7254_v39  ;;  %v7260_v32 = vld [vmem:[#allocation11_spill] sm:$0xff] }
  0x8b   : > { %7249 = vst [vmem:[#allocation132_spill] sm:$0xff] %v3671_v27  ;;  %7250 = vst [vmem:[#allocation133_spill] sm:$0xff] %v3675_v35  ;;  %v3737_v35 = vmul.f32 %v3698_v46, %v7258_v61  ;;  %v7259_v27 = vld [vmem:[#allocation10_spill] sm:$0xff]  ;;  %v3758_v61 = vmul.f32 %v3698_v46, %v7264_v58  ;;  %v3890_v63 = vadd.f32 %v821_v13, %v3417_v45 }
  0x8c   : > { %7251 = vst [vmem:[#allocation134_spill] sm:$0xff] %v3679_v30  ;;  %7252 = vst [vmem:[#allocation135_spill] sm:$0xff] %v3698_v46  ;;  %v7255_v30 = vld [vmem:[#allocation6_spill] sm:$0xff]  ;;  %v3741_v39 = vmul.f32 %v3698_v46, %v7259_v27  ;;  %v3762_v27 = vmul.f32 %v3698_v46, %v7265_v52  ;;  %v3783_v52 = vmul.f32 %v3698_v46, %v7272_v0  ;;  %v3804_v0 = vld [vmem:[%s2924_s21 + $0x79] sm:$0x3f] }
  0x8d   : > { %7253 = vst [vmem:[#allocation136_spill] sm:$0xff] %v3709_v44  ;;  %v3725_v12 = vmul.f32 %v3698_v46, %v7255_v30  ;;  %v3733_v44 = vmul.f32 %v3698_v46, %v7257_v60  ;;  %v3745_v30 = vmul.f32 %v3698_v46, %v7260_v32  ;;  %7261 = vst [vmem:[#allocation5_spill] sm:$0xff] %v3748_v2  ;;  %v3754_v60 = vld [vmem:[%s2924_s21 + $0x49] sm:$0x3f]  ;;  %v3779_v58 = vld [vmem:[%s2924_s21 + $0x61] sm:$0xff] }
  0x8e   : > { %7262 = vst [vmem:[#allocation6_spill] sm:$0xff] %v3751_v31  ;;  %7263 = vst [vmem:[#allocation7_spill] sm:$0xff] %v3754_v60  ;;  %v3766_v32 = vmul.f32 %v3698_v46, %v7266_v50  ;;  %v3787_v50 = vmul.f32 %v3698_v46, %v7274_v16  ;;  %v3808_v16 = vmul.f32 %v3698_v46, %v7283_v4  ;;  %v3829_v4 = vld [vmem:[%s2924_s21 + $0x91] sm:$0xff] }
  0x8f   : > { %7268 = vst [vmem:[#allocation8_spill] sm:$0xff] %v3770_v19  ;;  %7269 = vst [vmem:[#allocation9_spill] sm:$0xff] %v3773_v21  ;;  %v3826_v19 = vld [vmem:[%s2924_s21 + $0x89] sm:$0x3f] }
  0x90   : > { %7270 = vst [vmem:[#allocation10_spill] sm:$0xff] %v3776_v28  ;;  %7271 = vst [vmem:[#allocation11_spill] sm:$0xff] %v3779_v58 }
  0x91   : > { %7273 = vst [vmem:[#allocation12_spill] sm:$0xff] %v3783_v52  ;;  %7275 = vst [vmem:[#allocation13_spill] sm:$0xff] %v3787_v50  ;;  %v7285_v50 = vld [vmem:[#allocation21_spill] sm:$0xff] }
  0x92   : > { %7277 = vst [vmem:[#allocation14_spill] sm:$0xff] %v3791_v49  ;;  %7279 = vst [vmem:[#allocation15_spill] sm:$0xff] %v3795_v10  ;;  %v3812_v15 = vmul.f32 %v3698_v46, %v7285_v50  ;;  %v7287_v49 = vld [vmem:[#allocation22_spill] sm:$0xff]  ;;  %v7289_v10 = vld [vmem:[#allocation23_spill] sm:$0xff]  ;;  %v826_v50 = vmul.f32 %v3087_v41, %v3754_v60  ;;  %v827_v60 = vmul.f32 %v3087_v41, %v3773_v21 }
  0x93   : > { %7280 = vst [vmem:[#allocation16_spill] sm:$0xff] %v3798_v9  ;;  %7281 = vst [vmem:[#allocation17_spill] sm:$0xff] %v3801_v5  ;;  %v3816_v11 = vmul.f32 %v3698_v46, %v7287_v49  ;;  %v3820_v52 = vmul.f32 %v3698_v46, %v7289_v10  ;;  %v3838_v49 = vmul.f32 %v3698_v46, %v3748_v2  ;;  %v3863_v2 = vld [vmem:[%s2924_s21 + $0xb1] sm:$0xff] }
  0x94   : > { %7282 = vst [vmem:[#allocation18_spill] sm:$0xff] %v3804_v0  ;;  %7284 = vst [vmem:[#allocation19_spill] sm:$0xff] %v3808_v16  ;;  %v3842_v10 = vmul.f32 %v3698_v46, %v3751_v31  ;;  %v3851_v16 = vld [vmem:[%s2924_s21 + $0xa9] sm:$0x3f]  ;;  %v3860_v31 = vadd.f32 %v819_v26, %v3408_v43  ;;  %v3866_v46 = vld [vmem:[%s2924_s21 + $0xb9] sm:$0x3f]  ;;  %v830_v21 = vmul.f32 %v3087_v41, %v3798_v9 }
  0x95   : > { %7286 = vst [vmem:[#allocation20_spill] sm:$0xff] %v3812_v15  ;;  %7288 = vst [vmem:[#allocation21_spill] sm:$0xff] %v3816_v11  ;;  %v3834_v15 = vadd.f32 %v818_v33, %v3404_v1  ;;  %v3848_v11 = vld [vmem:[%s2924_s21 + $0xa1] sm:$0xff]  ;;  %v828_v1 = vmul.f32 %v3087_v41, %v3776_v28  ;;  %v829_v33 = vmul.f32 %v3087_v41, %v3779_v58  ;;  %v3881_v43 = vld [vmem:[%s2924_s21 + $0xc9] sm:$0x3f] }
  0x96   : > { %7290 = vst [vmem:[#allocation22_spill] sm:$0xff] %v3820_v52  ;;  %7291 = vst [vmem:[#allocation23_spill] sm:$0xff] %v3823_v3  ;;  %v3845_v52 = vld [vmem:[%s2924_s21 + $0x99] sm:$0x3f]  ;;  %v831_v28 = vmul.f32 %v3087_v41, %v3801_v5  ;;  %v7304_v58 = vld [vmem:[#allocation74_spill] sm:$0xff]  ;;  %v833_v26 = vmul.f32 %v3087_v41, %v3823_v3  ;;  %v835_v9 = vmul.f32 %v3087_v41, %v3829_v4 }
  0x97   : > { %7292 = vst [vmem:[#allocation137_spill] sm:$0xff] %v3826_v19  ;;  %7293 = vst [vmem:[#allocation138_spill] sm:$0xff] %v3829_v4  ;;  %v3893_v5 = vld [vmem:[%s2924_s21 + $0xe1] sm:$0xff]  ;;  %v837_v3 = vmul.f32 %v3087_v41, %v3848_v11  ;;  %v839_v45 = vmul.f32 %v3087_v41, %v3863_v2  ;;  %v840_v13 = vmul.f32 %v3087_v41, %v3866_v46 }
  0x98   : > { %7294 = vst [vmem:[#allocation139_spill] sm:$0xff] %v3834_v15  ;;  %7295 = vst [vmem:[#allocation140_spill] sm:$0xff] %v3838_v49  ;;  %v3869_v15 = vld [vmem:[%s2924_s21 + $0xc1] sm:$0xff]  ;;  %v3878_v49 = vadd.f32 %v820_v34, %v7304_v58  ;;  %v3899_v34 = vld [vmem:[%s2924_s21 + $0xf1] sm:$0xff]  ;;  %v836_v58 = vmul.f32 %v3087_v41, %v3845_v52 }
  0x99   : > { %7296 = vst [vmem:[#allocation141_spill] sm:$0xff] %v3842_v10  ;;  %7297 = vst [vmem:[#allocation142_spill] sm:$0xff] %v3845_v52  ;;  %v832_v10 = vmul.f32 %v3087_v41, %v3804_v0  ;;  %v3896_v0 = vld [vmem:[%s2924_s21 + $0xe9] sm:$0x3f]  ;;  %v3919_v52 = vadd.f32 %v3695_v59, %v3425_v7  ;;  %v845_v59 = vmul.f32 %v3087_v41, %v3899_v34 }
  0x9a   : > { %7298 = vst [vmem:[#allocation143_spill] sm:$0xff] %v3848_v11  ;;  %7299 = vst [vmem:[#allocation144_spill] sm:$0xff] %v3851_v16  ;;  %v844_v7 = vmul.f32 %v3087_v41, %v3896_v0  ;;  %v7381_v11 = vld [vmem:[#allocation129_spill] sm:$0xff] }
  0x9b   : > { %7300 = vst [vmem:[#allocation145_spill] sm:$0xff] %v3860_v31  ;;  %7301 = vst [vmem:[#allocation146_spill] sm:$0xff] %v3863_v2  ;;  %v834_v31 = vmul.f32 %v3087_v41, %v3826_v19  ;;  %v838_v19 = vmul.f32 %v3087_v41, %v3851_v16  ;;  %v842_v16 = vmul.f32 %v3087_v41, %v3881_v43  ;;  %v4084_v2 = vld [vmem:[%s2924_s21 + $0x3a] sm:$0x3f] }
  0x9c   : > { %7302 = vst [vmem:[#allocation147_spill] sm:$0xff] %v3866_v46  ;;  %7303 = vst [vmem:[#allocation148_spill] sm:$0xff] %v3869_v15  ;;  %v3932_v46 = vadd.f32 %v826_v50, %v3566_v37  ;;  %v3958_v50 = vadd.f32 %v3717_v23, %v3437_v54  ;;  %v3978_v54 = vadd.f32 %v3737_v35, %v3461_v48  ;;  %v7325_v48 = vld [vmem:[#allocation85_spill] sm:$0xff] }
  0x9d   : > { %7305 = vst [vmem:[#allocation74_spill] sm:$0xff] %v3878_v49  ;;  %7306 = vst [vmem:[#allocation149_spill] sm:$0xff] %v3881_v43  ;;  %v7311_v49 = vld [vmem:[#allocation75_spill] sm:$0xff]  ;;  %v3941_v43 = vadd.f32 %v827_v60, %v3570_v22  ;;  %v3966_v22 = vadd.f32 %v3725_v12, %v3443_v62  ;;  %v3986_v62 = vadd.f32 %v3745_v30, %v3467_v24  ;;  %v7329_v24 = vld [vmem:[#allocation12_spill] sm:$0xff] }
  0x9e   : > { %7307 = vst [vmem:[#allocation150_spill] sm:$0xff] %v3890_v63  ;;  %7308 = vst [vmem:[#allocation151_spill] sm:$0xff] %v3893_v5  ;;  %v3909_v4 = vadd.f32 %v3691_v38, %v7311_v49  ;;  %v841_v63 = vmul.f32 %v3087_v41, %v3869_v15  ;;  %v3925_v38 = vadd.f32 %v3702_v53, %v3543_v17  ;;  %v7340_v30 = vld [vmem:[#allocation96_spill] sm:$0xff]  ;;  %v7341_v60 = vld [vmem:[#allocation19_spill] sm:$0xff] }
  0x9f   : > { %7309 = vst [vmem:[#allocation152_spill] sm:$0xff] %v3896_v0  ;;  %7310 = vst [vmem:[#allocation153_spill] sm:$0xff] %v3899_v34  ;;  %v3929_v49 = vadd.f32 %v3706_v36, %v3547_v20  ;;  %v843_v15 = vmul.f32 %v3087_v41, %v3893_v5  ;;  %v3944_v53 = vadd.f32 %v828_v1, %v3574_v40  ;;  %v7312_v20 = vld [vmem:[#allocation76_spill] sm:$0xff]  ;;  %v7332_v40 = vld [vmem:[#allocation13_spill] sm:$0xff] }
  0xa0   : > { %v3947_v36 = vadd.f32 %v829_v33, %v3589_v42  ;;  %v3950_v17 = vadd.f32 %v830_v21, %v3593_v25  ;;  %v3954_v37 = vadd.f32 %v3713_v47, %v7312_v20  ;;  %7314 = vst [vmem:[#allocation76_spill] sm:$0xff] %v3958_v50  ;;  %v3962_v41 = vadd.f32 %v3721_v51, %v3440_v6  ;;  %v7328_v51 = vld [vmem:[#allocation89_spill] sm:$0xff]  ;;  %v7335_v42 = vld [vmem:[#allocation14_spill] sm:$0xff]  ;;  %v7370_v0 = vld [vmem:[#allocation120_spill] sm:$0xff] }
  0xa1   : > { %7316 = vst [vmem:[#allocation155_spill] sm:$0xff] %v3966_v22  ;;  %v3970_v21 = vadd.f32 %v3729_v29, %v3446_v55  ;;  %v3974_v47 = vadd.f32 %v3733_v44, %v3458_v8  ;;  %7319 = vst [vmem:[#allocation158_spill] sm:$0xff] %v3978_v54  ;;  %v3982_v6 = vadd.f32 %v3741_v39, %v3464_v56  ;;  %v7326_v44 = vld [vmem:[#allocation8_spill] sm:$0xff]  ;;  %v7338_v29 = vld [vmem:[#allocation15_spill] sm:$0xff] }
  0xa2   : > { %7313 = vst [vmem:[#allocation75_spill] sm:$0xff] %v3954_v37  ;;  %7315 = vst [vmem:[#allocation154_spill] sm:$0xff] %v3962_v41  ;;  %v3990_v55 = vadd.f32 %v3758_v61, %v3479_v57  ;;  %v3994_v12 = vadd.f32 %v3762_v27, %v3482_v18  ;;  %v3998_v8 = vadd.f32 %v3766_v32, %v3485_v14  ;;  %v7331_v57 = vld [vmem:[#allocation90_spill] sm:$0xff]  ;;  %v7334_v18 = vld [vmem:[#allocation91_spill] sm:$0xff] }
  0xa3   : > { %7317 = vst [vmem:[#allocation156_spill] sm:$0xff] %v3970_v21  ;;  %7318 = vst [vmem:[#allocation157_spill] sm:$0xff] %v3974_v47  ;;  %v4002_v56 = vadd.f32 %v7326_v44, %v7325_v48  ;;  %v4006_v35 = vadd.f32 %v7329_v24, %v7328_v51  ;;  %v4010_v23 = vadd.f32 %v7332_v40, %v7331_v57  ;;  %v7337_v14 = vld [vmem:[#allocation92_spill] sm:$0xff]  ;;  %v7343_v27 = vld [vmem:[#allocation97_spill] sm:$0xff] }
  0xa4   : > { %7320 = vst [vmem:[#allocation159_spill] sm:$0xff] %v3982_v6  ;;  %7321 = vst [vmem:[#allocation160_spill] sm:$0xff] %v3986_v62  ;;  %v4014_v25 = vadd.f32 %v7335_v42, %v7334_v18  ;;  %v4018_v39 = vadd.f32 %v7338_v29, %v7337_v14  ;;  %v4022_v61 = vadd.f32 %v7341_v60, %v7340_v30  ;;  %v7344_v32 = vld [vmem:[#allocation20_spill] sm:$0xff]  ;;  %v7346_v33 = vld [vmem:[#allocation98_spill] sm:$0xff] }
  0xa5   : > { %7322 = vst [vmem:[#allocation161_spill] sm:$0xff] %v3990_v55  ;;  %7323 = vst [vmem:[#allocation162_spill] sm:$0xff] %v3994_v12  ;;  %v4026_v1 = vadd.f32 %v7344_v32, %v7343_v27  ;;  %v7347_v20 = vld [vmem:[#allocation21_spill] sm:$0xff]  ;;  %v7349_v44 = vld [vmem:[#allocation99_spill] sm:$0xff] }
  0xa6   : > { %7324 = vst [vmem:[#allocation163_spill] sm:$0xff] %v3998_v8  ;;  %7327 = vst [vmem:[#allocation85_spill] sm:$0xff] %v4002_v56  ;;  %v4030_v48 = vadd.f32 %v7347_v20, %v7346_v33  ;;  %v7350_v51 = vld [vmem:[#allocation22_spill] sm:$0xff]  ;;  %v7354_v18 = vld [vmem:[#allocation112_spill] sm:$0xff] }
  0xa7   : > { %7330 = vst [vmem:[#allocation8_spill] sm:$0xff] %v4006_v35  ;;  %7333 = vst [vmem:[#allocation89_spill] sm:$0xff] %v4010_v23  ;;  %v4034_v24 = vadd.f32 %v7350_v51, %v7349_v44  ;;  %v4037_v57 = vld [vmem:[%s2924_s21 + $0x2] sm:$0xff]  ;;  %v4040_v40 = vld [vmem:[%s2924_s21 + $0xa] sm:$0x3f]  ;;  %v4043_v42 = vadd.f32 %v831_v28, %v7354_v18 }
  0xa8   : > { %7336 = vst [vmem:[#allocation12_spill] sm:$0xff] %v4014_v25  ;;  %7339 = vst [vmem:[#allocation90_spill] sm:$0xff] %v4018_v39  ;;  %v7355_v14 = vld [vmem:[#allocation113_spill] sm:$0xff]  ;;  %v7356_v30 = vld [vmem:[#allocation103_spill] sm:$0xff] }
  0xa9   : > { %7342 = vst [vmem:[#allocation13_spill] sm:$0xff] %v4022_v61  ;;  %7345 = vst [vmem:[#allocation91_spill] sm:$0xff] %v4026_v1  ;;  %v4046_v29 = vadd.f32 %v832_v10, %v7355_v14  ;;  %v7357_v60 = vld [vmem:[#allocation140_spill] sm:$0xff]  ;;  %v7360_v33 = vld [vmem:[#allocation141_spill] sm:$0xff] }
  0xaa   : > { %7348 = vst [vmem:[#allocation14_spill] sm:$0xff] %v4030_v48  ;;  %7351 = vst [vmem:[#allocation92_spill] sm:$0xff] %v4034_v24  ;;  %v4050_v27 = vadd.f32 %v7357_v60, %v7356_v30  ;;  %v7359_v32 = vld [vmem:[#allocation104_spill] sm:$0xff]  ;;  %v4063_v28 = vld [vmem:[%s2924_s21 + $0x22] sm:$0xff] }
  0xab   : > { %7352 = vst [vmem:[#allocation15_spill] sm:$0xff] %v4037_v57  ;;  %7353 = vst [vmem:[#allocation96_spill] sm:$0xff] %v4040_v40  ;;  %v4054_v20 = vadd.f32 %v7360_v33, %v7359_v32  ;;  %v4057_v44 = vld [vmem:[%s2924_s21 + $0x12] sm:$0xff]  ;;  %v4060_v51 = vld [vmem:[%s2924_s21 + $0x1a] sm:$0x3f]  ;;  %v4075_v32 = vadd.f32 %v836_v58, %v7370_v0  ;;  %v4096_v0 = vadd.f32 %v840_v13, %v7381_v11 }
  0xac   : > { %7358 = vst [vmem:[#allocation19_spill] sm:$0xff] %v4050_v27  ;;  %7362 = vst [vmem:[#allocation20_spill] sm:$0xff] %v4057_v44  ;;  %v7365_v18 = vld [vmem:[#allocation117_spill] sm:$0xff]  ;;  %v7366_v14 = vld [vmem:[#allocation118_spill] sm:$0xff] }
  0xad   : > { %7361 = vst [vmem:[#allocation97_spill] sm:$0xff] %v4054_v20  ;;  %7363 = vst [vmem:[#allocation98_spill] sm:$0xff] %v4060_v51  ;;  %v4066_v10 = vadd.f32 %v833_v26, %v7365_v18  ;;  %v4069_v34 = vadd.f32 %v834_v31, %v7366_v14  ;;  %v7368_v30 = vld [vmem:[#allocation119_spill] sm:$0xff]  ;;  %v4078_v33 = vld [vmem:[%s2924_s21 + $0x2a] sm:$0x3f] }
  0xae   : > { %7364 = vst [vmem:[#allocation21_spill] sm:$0xff] %v4063_v28  ;;  %v4072_v60 = vadd.f32 %v835_v9, %v7368_v30  ;;  %7371 = vst [vmem:[#allocation112_spill] sm:$0xff] %v4075_v32  ;;  %v4081_v5 = vld [vmem:[%s2924_s21 + $0x32] sm:$0xff]  ;;  %v7377_v31 = vld [vmem:[#allocation125_spill] sm:$0xff] }
  0xaf   : > { %7367 = vst [vmem:[#allocation99_spill] sm:$0xff] %v4069_v34  ;;  %7372 = vst [vmem:[#allocation113_spill] sm:$0xff] %v4078_v33  ;;  %v7375_v26 = vld [vmem:[#allocation124_spill] sm:$0xff]  ;;  %v4090_v14 = vadd.f32 %v838_v19, %v7377_v31  ;;  %v7379_v9 = vld [vmem:[#allocation126_spill] sm:$0xff] }
  0xb0   : > { %7369 = vst [vmem:[#allocation22_spill] sm:$0xff] %v4072_v60  ;;  %7373 = vst [vmem:[#allocation103_spill] sm:$0xff] %v4081_v5  ;;  %v4087_v18 = vadd.f32 %v837_v3, %v7375_v26  ;;  %v4093_v30 = vadd.f32 %v839_v45, %v7379_v9  ;;  %v4099_v58 = vld [vmem:[%s2924_s21 + $0x42] sm:$0xff]  ;;  %v4102_v20 = vld [vmem:[%s2924_s21 + $0x4a] sm:$0x3f] }
  0xb1   : > { %7374 = vst [vmem:[#allocation140_spill] sm:$0xff] %v4084_v2  ;;  %7378 = vst [vmem:[#allocation141_spill] sm:$0xff] %v4090_v14  ;;  %v4105_v27 = vld [vmem:[%s2924_s21 + $0x52] sm:$0xff]  ;;  %v7386_v3 = vld [vmem:[#allocation130_spill] sm:$0xff] }
  0xb2   : > { %7376 = vst [vmem:[#allocation104_spill] sm:$0xff] %v4087_v18  ;;  %7380 = vst [vmem:[#allocation117_spill] sm:$0xff] %v4093_v30  ;;  %v4108_v26 = vadd.f32 %v841_v63, %v7386_v3  ;;  %v7388_v19 = vld [vmem:[#allocation131_spill] sm:$0xff]  ;;  %v7390_v45 = vld [vmem:[#allocation132_spill] sm:$0xff] }
  0xb3   : > { %7382 = vst [vmem:[#allocation118_spill] sm:$0xff] %v4096_v0  ;;  %7383 = vst [vmem:[#allocation119_spill] sm:$0xff] %v4099_v58  ;;  %v4111_v31 = vadd.f32 %v842_v16, %v7388_v19  ;;  %v4114_v9 = vadd.f32 %v843_v15, %v7390_v45  ;;  %v7392_v30 = vld [vmem:[#allocation133_spill] sm:$0xff]  ;;  %v4120_v13 = vld [vmem:[%s2924_s21 + $0x5a] sm:$0x3f] }
  0xb4   : > { %7384 = vst [vmem:[#allocation120_spill] sm:$0xff] %v4102_v20  ;;  %7385 = vst [vmem:[#allocation124_spill] sm:$0xff] %v4105_v27  ;;  %v4117_v11 = vadd.f32 %v844_v7, %v7392_v30  ;;  %v4123_v0 = vld [vmem:[%s2924_s21 + $0x62] sm:$0xff]  ;;  %v4126_v14 = vld [vmem:[%s2924_s21 + $0x6a] sm:$0x3f] }
  0xb5   : > { %7387 = vst [vmem:[#allocation125_spill] sm:$0xff] %v4108_v26  ;;  %7389 = vst [vmem:[#allocation126_spill] sm:$0xff] %v4111_v31  ;;  %v7397_v18 = vld [vmem:[#allocation134_spill] sm:$0xff]  ;;  %v7399_v63 = vld [vmem:[#allocation56_spill] sm:$0xff] }
  0xb6   : > { %7391 = vst [vmem:[#allocation129_spill] sm:$0xff] %v4114_v9  ;;  %7393 = vst [vmem:[#allocation130_spill] sm:$0xff] %v4117_v11  ;;  %v4129_v24 = vadd.f32 %v845_v59, %v7397_v18  ;;  %v4132_v3 = vmul.f32 0.0, %v7399_v63  ;;  %v4136_v16 = vmul.f32 %v7399_v63, %v4037_v57  ;;  %v4140_v15 = vmul.f32 %v7399_v63, %v4040_v40  ;;  %v4143_v7 = vld [vmem:[%s2924_s21 + $0x72] sm:$0xff]  ;;  %v4146_v30 = vld [vmem:[%s2924_s21 + $0x7a] sm:$0x3f] }
  0xb7   : > { %7394 = vst [vmem:[#allocation131_spill] sm:$0xff] %v4120_v13  ;;  %7395 = vst [vmem:[#allocation132_spill] sm:$0xff] %v4123_v0  ;;  %v4149_v19 = vld [vmem:[%s2924_s21 + $0x82] sm:$0xff]  ;;  %v4153_v59 = vmul.f32 %v7399_v63, %v4057_v44  ;;  %v4157_v18 = vmul.f32 %v7399_v63, %v4060_v51  ;;  %v4161_v45 = vmul.f32 %v7399_v63, %v4063_v28  ;;  %v7410_v26 = vld [vmem:[#allocation27_spill] sm:$0xff] }
  0xb8   : > { %7396 = vst [vmem:[#allocation133_spill] sm:$0xff] %v4126_v14  ;;  %7398 = vst [vmem:[#allocation134_spill] sm:$0xff] %v4129_v24  ;;  %v4165_v40 = vmul.f32 %v7399_v63, %v4078_v33  ;;  %v4169_v57 = vmul.f32 %v7399_v63, %v4081_v5  ;;  %v4173_v44 = vmul.f32 %v7399_v63, %v4084_v2  ;;  %v4200_v24 = vld [vmem:[%s2927_s17 + $0x4] ss:$0 sm:$0xff]  ;;  %v7412_v48 = vld [vmem:[#allocation28_spill] sm:$0xff] }
  0xb9   : > { %7400 = vst [vmem:[#allocation56_spill] sm:$0xff] %v4143_v7  ;;  %7401 = vst [vmem:[#allocation164_spill] sm:$0xff] %v4146_v30  ;;  %v4177_v51 = vmul.f32 %v7399_v63, %v4099_v58  ;;  %v4181_v28 = vmul.f32 %v7399_v63, %v4102_v20  ;;  %v4185_v33 = vmul.f32 %v7399_v63, %v4105_v27  ;;  %v7404_v27 = vld [vmem:[#allocation24_spill] sm:$0xff]  ;;  %v7406_v11 = vld [vmem:[#allocation25_spill] sm:$0xff] }
  0xba   : > { %7402 = vst [vmem:[#allocation165_spill] sm:$0xff] %v4149_v19  ;;  %v4189_v5 = vmul.f32 %v7399_v63, %v4120_v13  ;;  %v4193_v2 = vmul.f32 %v7399_v63, %v4123_v0  ;;  %v4197_v58 = vmul.f32 %v7399_v63, %v4126_v14  ;;  %7403 = vst [vmem:[#allocation166_spill] sm:$0xff] %v4200_v24  ;;  %v4238_v1 = vld [vmem:[%s2924_s21 + $0x1b9] sm:$0x3f]  ;;  %v7417_v61 = vld [vmem:[#allocation29_spill] sm:$0xff] }
  0xbb   : > { %v4204_v20 = vmul.f32 %v7399_v63, %v4143_v7  ;;  %v4208_v13 = vmul.f32 %v7399_v63, %v4146_v30  ;;  %v4212_v0 = vmul.f32 %v7399_v63, %v4149_v19  ;;  %v4216_v14 = vmul.f32 %v4200_v24, %v7404_v27  ;;  %v7408_v7 = vld [vmem:[#allocation26_spill] sm:$0xff]  ;;  %v4235_v27 = vld [vmem:[%s2924_s21 + $0x1b1] sm:$0xff]  ;;  %7415 = vst [vmem:[#allocation168_spill] sm:$0xff] %v4238_v1  ;;  %v4263_v8 = vld [vmem:[%s2924_s21 + $0x9a] sm:$0x3f] }
  0xbc   : > { %v4220_v9 = vmul.f32 %v4200_v24, %v7406_v11  ;;  %v4224_v31 = vmul.f32 %v4200_v24, %v7408_v7  ;;  %v4228_v30 = vmul.f32 %v4200_v24, %v7410_v26  ;;  %v4232_v19 = vmul.f32 %v4200_v24, %v7412_v48  ;;  %7414 = vst [vmem:[#allocation167_spill] sm:$0xff] %v4235_v27  ;;  %v4241_v11 = vld [vmem:[%s2924_s21 + $0x8a] sm:$0x3f]  ;;  %v7421_v25 = vld [vmem:[#allocation31_spill] sm:$0xff]  ;;  %v7423_v23 = vld [vmem:[#allocation32_spill] sm:$0xff] }
  0xbd   : > { %7405 = vst [vmem:[#allocation24_spill] sm:$0xff] %v4216_v14  ;;  %7416 = vst [vmem:[#allocation169_spill] sm:$0xff] %v4241_v11  ;;  %v4245_v7 = vmul.f32 %v4200_v24, %v7417_v61  ;;  %v7419_v39 = vld [vmem:[#allocation30_spill] sm:$0xff]  ;;  %v4253_v48 = vmul.f32 %v4200_v24, %v7421_v25  ;;  %v4257_v35 = vmul.f32 %v4200_v24, %v7423_v23  ;;  %v4260_v56 = vld [vmem:[%s2924_s21 + $0x92] sm:$0xff] }
  0xbe   : > { %7407 = vst [vmem:[#allocation25_spill] sm:$0xff] %v4220_v9  ;;  %7409 = vst [vmem:[#allocation26_spill] sm:$0xff] %v4224_v31  ;;  %v4249_v26 = vmul.f32 %v4200_v24, %v7419_v39  ;;  %v4266_v61 = vld [vmem:[%s2924_s21 + $0xa2] sm:$0xff]  ;;  %v7432_v62 = vld [vmem:[#allocation35_spill] sm:$0xff]  ;;  %v945_v50 = vmul.f32 %v7399_v63, %v4241_v11  ;;  %v946_v14 = vmul.f32 %v7399_v63, %v4260_v56 }
  0xbf   : > { %7411 = vst [vmem:[#allocation27_spill] sm:$0xff] %v4228_v30  ;;  %7413 = vst [vmem:[#allocation28_spill] sm:$0xff] %v4232_v19  ;;  %v7428_v12 = vld [vmem:[#allocation33_spill] sm:$0xff]  ;;  %v7430_v55 = vld [vmem:[#allocation34_spill] sm:$0xff]  ;;  %v4278_v23 = vmul.f32 %v4200_v24, %v7432_v62 }
  0xc0   : > { %7418 = vst [vmem:[#allocation29_spill] sm:$0xff] %v4245_v7  ;;  %7420 = vst [vmem:[#allocation30_spill] sm:$0xff] %v4249_v26  ;;  %v4270_v39 = vmul.f32 %v4200_v24, %v7428_v12  ;;  %v4274_v25 = vmul.f32 %v4200_v24, %v7430_v55  ;;  %v4285_v6 = vld [vmem:[%s2924_s21 + $0xaa] sm:$0x3f]  ;;  %v4288_v26 = vld [vmem:[%s2924_s21 + $0xb2] sm:$0xff] }
  0xc1   : > { %7422 = vst [vmem:[#allocation31_spill] sm:$0xff] %v4253_v48  ;;  %7424 = vst [vmem:[#allocation32_spill] sm:$0xff] %v4257_v35  ;;  %v7434_v35 = vld [vmem:[#allocation36_spill] sm:$0xff]  ;;  %v7441_v62 = vld [vmem:[#allocation39_spill] sm:$0xff]  ;;  %v949_v37 = vmul.f32 %v7399_v63, %v4285_v6  ;;  %v950_v11 = vmul.f32 %v7399_v63, %v4288_v26 }
  0xc2   : > { %7425 = vst [vmem:[#allocation170_spill] sm:$0xff] %v4260_v56  ;;  %7426 = vst [vmem:[#allocation171_spill] sm:$0xff] %v4263_v8  ;;  %v4282_v48 = vmul.f32 %v4200_v24, %v7434_v35  ;;  %v4291_v12 = vld [vmem:[%s2924_s21 + $0xba] sm:$0x3f]  ;;  %v4305_v47 = vld [vmem:[%s2924_s21 + $0xca] sm:$0x3f] }
  0xc3   : > { %7427 = vst [vmem:[#allocation172_spill] sm:$0xff] %v4266_v61  ;;  %7429 = vst [vmem:[#allocation33_spill] sm:$0xff] %v4270_v39  ;;  %v7439_v39 = vld [vmem:[#allocation37_spill] sm:$0xff]  ;;  %v7442_v7 = vld [vmem:[#allocation40_spill] sm:$0xff]  ;;  %v951_v56 = vmul.f32 %v7399_v63, %v4291_v12 }
  0xc4   : > { %7431 = vst [vmem:[#allocation34_spill] sm:$0xff] %v4274_v25  ;;  %7433 = vst [vmem:[#allocation35_spill] sm:$0xff] %v4278_v23  ;;  %v1201_v55 = vmul.f32 %v4200_v24, %v7439_v39  ;;  %v7440_v25 = vld [vmem:[#allocation38_spill] sm:$0xff]  ;;  %v1203_v23 = vmul.f32 %v4200_v24, %v7441_v62  ;;  %v1204_v35 = vmul.f32 %v4200_v24, %v7442_v7  ;;  %v7446_v21 = vld [vmem:[#allocation41_spill] sm:$0xff] }
  0xc5   : > { %7435 = vst [vmem:[#allocation36_spill] sm:$0xff] %v4282_v48  ;;  %7436 = vst [vmem:[#allocation173_spill] sm:$0xff] %v4285_v6  ;;  %v1202_v54 = vmul.f32 %v4200_v24, %v7440_v25  ;;  %v4302_v48 = vld [vmem:[%s2924_s21 + $0xc2] sm:$0xff]  ;;  %v1205_v30 = vmul.f32 %v4200_v24, %v7446_v21  ;;  %v7448_v31 = vld [vmem:[#allocation43_spill] sm:$0xff]  ;;  %v1209_v21 = vmul.f32 %v4200_v24, %v4235_v27 }
  0xc6   : > { %7437 = vst [vmem:[#allocation174_spill] sm:$0xff] %v4288_v26  ;;  %7438 = vst [vmem:[#allocation175_spill] sm:$0xff] %v4291_v12  ;;  %v4308_v19 = vld [vmem:[%s2924_s21 + $0xe2] sm:$0xff]  ;;  %v1207_v25 = vmul.f32 %v4200_v24, %v7448_v31  ;;  %v7449_v41 = vld [vmem:[#allocation44_spill] sm:$0xff]  ;;  %v947_v31 = vmul.f32 %v7399_v63, %v4263_v8  ;;  %v952_v27 = vmul.f32 %v7399_v63, %v4302_v48 }
  0xc7   : > { %7443 = vst [vmem:[#allocation37_spill] sm:$0xff] %v4302_v48  ;;  %7444 = vst [vmem:[#allocation38_spill] sm:$0xff] %v4305_v47  ;;  %v7447_v22 = vld [vmem:[#allocation42_spill] sm:$0xff]  ;;  %v1208_v62 = vmul.f32 %v4200_v24, %v7449_v41  ;;  %v4322_v7 = vld [vmem:[%s2924_s21 + $0xf2] sm:$0xff]  ;;  %v948_v41 = vmul.f32 %v7399_v63, %v4266_v61  ;;  %v954_v8 = vmul.f32 %v7399_v63, %v4308_v19 }
  0xc8   : > { %7445 = vst [vmem:[#allocation39_spill] sm:$0xff] %v4308_v19  ;;  %v1206_v39 = vmul.f32 %v4200_v24, %v7447_v22  ;;  %v4319_v9 = vld [vmem:[%s2924_s21 + $0xea] sm:$0x3f]  ;;  %7451 = vst [vmem:[#allocation41_spill] sm:$0xff] %v4322_v7  ;;  %v1210_v22 = vmul.f32 %v4200_v24, %v4238_v1  ;;  %v953_v1 = vmul.f32 %v7399_v63, %v4305_v47  ;;  %v7452_v24 = vld [vmem:[#allocation108_spill] sm:$0xff] }
  0xc9   : > { %7450 = vst [vmem:[#allocation40_spill] sm:$0xff] %v4319_v9  ;;  %v955_v61 = vmul.f32 %v7399_v63, %v4319_v9  ;;  %v956_v6 = vmul.f32 %v7399_v63, %v4322_v7  ;;  %v4354_v26 = vadd.f32 %v4132_v3, %v7452_v24  ;;  %v7453_v12 = vld [vmem:[#allocation136_spill] sm:$0xff]  ;;  %v7454_v48 = vld [vmem:[#allocation139_spill] sm:$0xff]  ;;  %v7455_v60 = vld [vmem:[#allocation145_spill] sm:$0xff]  ;;  %v4378_v3 = vadd.f32 %v4165_v40, %v3909_v4 }
  0xca   : > { %v4358_v32 = vadd.f32 %v4136_v16, %v7453_v12  ;;  %v4362_v47 = vadd.f32 %v4140_v15, %v7454_v48  ;;  %v4366_v19 = vadd.f32 %v4153_v59, %v7455_v60  ;;  %v7456_v9 = vld [vmem:[#allocation74_spill] sm:$0xff]  ;;  %v4382_v16 = vadd.f32 %v4169_v57, %v3919_v52  ;;  %v7485_v59 = vld [vmem:[#allocation28_spill] sm:$0xff]  ;;  %v7488_v48 = vld [vmem:[#allocation29_spill] sm:$0xff] }
  0xcb   : > { %v4370_v34 = vadd.f32 %v4157_v18, %v7456_v9  ;;  %v7457_v63 = vld [vmem:[#allocation150_spill] sm:$0xff]  ;;  %v4386_v60 = vadd.f32 %v4173_v44, %v3925_v38  ;;  %v4390_v9 = vadd.f32 %v4177_v51, %v3929_v49  ;;  %v4394_v15 = vadd.f32 %v4181_v28, %v3932_v46  ;;  %v7472_v44 = vld [vmem:[#allocation75_spill] sm:$0xff]  ;;  %v7475_v51 = vld [vmem:[#allocation76_spill] sm:$0xff] }
  0xcc   : > { %v4374_v24 = vadd.f32 %v4161_v45, %v7457_v63  ;;  %v4398_v4 = vadd.f32 %v4185_v33, %v3941_v43  ;;  %v4402_v52 = vadd.f32 %v4189_v5, %v3944_v53  ;;  %v4406_v38 = vadd.f32 %v4193_v2, %v3947_v36  ;;  %v7466_v53 = vld [vmem:[#allocation99_spill] sm:$0xff]  ;;  %v7468_v2 = vld [vmem:[#allocation22_spill] sm:$0xff]  ;;  %v7487_v45 = vld [vmem:[#allocation157_spill] sm:$0xff] }
  0xcd   : > { %7458 = vst [vmem:[#allocation42_spill] sm:$0xff] %v4394_v15  ;;  %v4410_v49 = vadd.f32 %v4197_v58, %v3950_v17  ;;  %v4414_v46 = vadd.f32 %v4204_v20, %v4043_v42  ;;  %v4418_v43 = vadd.f32 %v4208_v13, %v4046_v29  ;;  %v4422_v5 = vadd.f32 %v4212_v0, %v4066_v10  ;;  %v7470_v17 = vld [vmem:[#allocation112_spill] sm:$0xff]  ;;  %v7476_v29 = vld [vmem:[#allocation25_spill] sm:$0xff]  ;;  %v7478_v33 = vld [vmem:[#allocation154_spill] sm:$0xff] }
  0xce   : > { %7459 = vst [vmem:[#allocation43_spill] sm:$0xff] %v4398_v4  ;;  %7460 = vst [vmem:[#allocation44_spill] sm:$0xff] %v4402_v52  ;;  %v4425_v57 = vadd.f32 %v945_v50, %v7466_v53  ;;  %v4428_v36 = vadd.f32 %v946_v14, %v7468_v2  ;;  %v4431_v40 = vadd.f32 %v947_v31, %v7470_v17  ;;  %v7473_v42 = vld [vmem:[#allocation24_spill] sm:$0xff]  ;;  %v7479_v10 = vld [vmem:[#allocation26_spill] sm:$0xff] }
  0xcf   : > { %7461 = vst [vmem:[#allocation108_spill] sm:$0xff] %v4406_v38  ;;  %7462 = vst [vmem:[#allocation136_spill] sm:$0xff] %v4410_v49  ;;  %v4435_v20 = vadd.f32 %v7473_v42, %v7472_v44  ;;  %v4439_v28 = vadd.f32 %v7476_v29, %v7475_v51  ;;  %v4443_v0 = vadd.f32 %v7479_v10, %v7478_v33  ;;  %v7481_v50 = vld [vmem:[#allocation155_spill] sm:$0xff]  ;;  %v7484_v14 = vld [vmem:[#allocation156_spill] sm:$0xff] }
  0xd0   : > { %7463 = vst [vmem:[#allocation139_spill] sm:$0xff] %v4414_v46  ;;  %7464 = vst [vmem:[#allocation145_spill] sm:$0xff] %v4418_v43  ;;  %v7482_v58 = vld [vmem:[#allocation27_spill] sm:$0xff]  ;;  %v4451_v18 = vadd.f32 %v7485_v59, %v7484_v14  ;;  %v4455_v12 = vadd.f32 %v7488_v48, %v7487_v45  ;;  %v7490_v31 = vld [vmem:[#allocation158_spill] sm:$0xff] }
  0xd1   : > { %7465 = vst [vmem:[#allocation74_spill] sm:$0xff] %v4422_v5  ;;  %7467 = vst [vmem:[#allocation150_spill] sm:$0xff] %v4425_v57  ;;  %v4447_v13 = vadd.f32 %v7482_v58, %v7481_v50  ;;  %v7491_v63 = vld [vmem:[#allocation30_spill] sm:$0xff]  ;;  %v7493_v2 = vld [vmem:[#allocation159_spill] sm:$0xff] }
  0xd2   : > { %7469 = vst [vmem:[#allocation99_spill] sm:$0xff] %v4428_v36  ;;  %7471 = vst [vmem:[#allocation22_spill] sm:$0xff] %v4431_v40  ;;  %v4459_v53 = vadd.f32 %v7491_v63, %v7490_v31  ;;  %v7494_v17 = vld [vmem:[#allocation31_spill] sm:$0xff]  ;;  %v7496_v42 = vld [vmem:[#allocation160_spill] sm:$0xff] }
  0xd3   : > { %7474 = vst [vmem:[#allocation112_spill] sm:$0xff] %v4435_v20  ;;  %7477 = vst [vmem:[#allocation75_spill] sm:$0xff] %v4439_v28  ;;  %v4463_v44 = vadd.f32 %v7494_v17, %v7493_v2  ;;  %v7497_v51 = vld [vmem:[#allocation32_spill] sm:$0xff]  ;;  %v7499_v33 = vld [vmem:[#allocation161_spill] sm:$0xff] }
  0xd4   : > { %7480 = vst [vmem:[#allocation24_spill] sm:$0xff] %v4443_v0  ;;  %7483 = vst [vmem:[#allocation76_spill] sm:$0xff] %v4447_v13  ;;  %v4467_v29 = vadd.f32 %v7497_v51, %v7496_v42  ;;  %v7500_v10 = vld [vmem:[#allocation33_spill] sm:$0xff]  ;;  %v7502_v58 = vld [vmem:[#allocation162_spill] sm:$0xff] }
  0xd5   : > { %7486 = vst [vmem:[#allocation25_spill] sm:$0xff] %v4451_v18  ;;  %7489 = vst [vmem:[#allocation154_spill] sm:$0xff] %v4455_v12  ;;  %v4471_v50 = vadd.f32 %v7500_v10, %v7499_v33  ;;  %v7503_v14 = vld [vmem:[#allocation34_spill] sm:$0xff]  ;;  %v7505_v45 = vld [vmem:[#allocation163_spill] sm:$0xff] }
  0xd6   : > { %7492 = vst [vmem:[#allocation26_spill] sm:$0xff] %v4459_v53  ;;  %7495 = vst [vmem:[#allocation155_spill] sm:$0xff] %v4463_v44  ;;  %v4475_v59 = vadd.f32 %v7503_v14, %v7502_v58  ;;  %v7506_v48 = vld [vmem:[#allocation35_spill] sm:$0xff]  ;;  %v7508_v63 = vld [vmem:[#allocation85_spill] sm:$0xff] }
  0xd7   : > { %7498 = vst [vmem:[#allocation27_spill] sm:$0xff] %v4467_v29  ;;  %7501 = vst [vmem:[#allocation156_spill] sm:$0xff] %v4471_v50  ;;  %v4479_v31 = vadd.f32 %v7506_v48, %v7505_v45  ;;  %v7509_v7 = vld [vmem:[#allocation36_spill] sm:$0xff]  ;;  %v7513_v42 = vld [vmem:[#allocation89_spill] sm:$0xff] }
  0xd8   : > { %7504 = vst [vmem:[#allocation28_spill] sm:$0xff] %v4475_v59  ;;  %v4483_v2 = vadd.f32 %v7509_v7, %v7508_v63  ;;  %v7511_v17 = vld [vmem:[#allocation8_spill] sm:$0xff]  ;;  %v4489_v51 = vadd.f32 %v1202_v54, %v7513_v42  ;;  %v7517_v50 = vld [vmem:[#allocation90_spill] sm:$0xff]  ;;  %v7519_v14 = vld [vmem:[#allocation13_spill] sm:$0xff] }
  0xd9   : > { %7507 = vst [vmem:[#allocation157_spill] sm:$0xff] %v4479_v31  ;;  %v4486_v44 = vadd.f32 %v1201_v55, %v7511_v17  ;;  %v7515_v33 = vld [vmem:[#allocation12_spill] sm:$0xff]  ;;  %v4495_v58 = vadd.f32 %v1204_v35, %v7517_v50  ;;  %v4498_v59 = vadd.f32 %v1205_v30, %v7519_v14  ;;  %v7521_v45 = vld [vmem:[#allocation91_spill] sm:$0xff]  ;;  %v7523_v7 = vld [vmem:[#allocation14_spill] sm:$0xff] }
  0xda   : > { %7510 = vst [vmem:[#allocation29_spill] sm:$0xff] %v4483_v2  ;;  %7514 = vst [vmem:[#allocation30_spill] sm:$0xff] %v4489_v51  ;;  %v4492_v10 = vadd.f32 %v1203_v23, %v7515_v33  ;;  %v4501_v48 = vadd.f32 %v1206_v39, %v7521_v45  ;;  %v4504_v63 = vadd.f32 %v1207_v25, %v7523_v7  ;;  %v7525_v55 = vld [vmem:[#allocation92_spill] sm:$0xff]  ;;  %v7529_v23 = vld [vmem:[#allocation141_spill] sm:$0xff] }
  0xdb   : > { %7512 = vst [vmem:[#allocation158_spill] sm:$0xff] %v4486_v44  ;;  %7518 = vst [vmem:[#allocation31_spill] sm:$0xff] %v4495_v58  ;;  %v4507_v17 = vadd.f32 %v1208_v62, %v7525_v55  ;;  %v7527_v54 = vld [vmem:[#allocation104_spill] sm:$0xff]  ;;  %v4513_v33 = vadd.f32 %v949_v37, %v7529_v23  ;;  %v7531_v35 = vld [vmem:[#allocation19_spill] sm:$0xff] }
  0xdc   : > { %7516 = vst [vmem:[#allocation159_spill] sm:$0xff] %v4492_v10  ;;  %7520 = vst [vmem:[#allocation160_spill] sm:$0xff] %v4498_v59  ;;  %v4510_v42 = vadd.f32 %v948_v41, %v7527_v54  ;;  %v4516_v50 = vadd.f32 %v1209_v21, %v7531_v35  ;;  %v7533_v30 = vld [vmem:[#allocation97_spill] sm:$0xff]  ;;  %v7537_v25 = vld [vmem:[#allocation118_spill] sm:$0xff] }
  0xdd   : > { %7522 = vst [vmem:[#allocation32_spill] sm:$0xff] %v4501_v48  ;;  %7524 = vst [vmem:[#allocation161_spill] sm:$0xff] %v4504_v63  ;;  %v4519_v14 = vadd.f32 %v1210_v22, %v7533_v30  ;;  %v7535_v39 = vld [vmem:[#allocation117_spill] sm:$0xff]  ;;  %v4525_v7 = vadd.f32 %v951_v56, %v7537_v25  ;;  %v7541_v41 = vld [vmem:[#allocation126_spill] sm:$0xff] }
  0xde   : > { %7526 = vst [vmem:[#allocation33_spill] sm:$0xff] %v4507_v17  ;;  %7528 = vst [vmem:[#allocation162_spill] sm:$0xff] %v4510_v42  ;;  %v4522_v45 = vadd.f32 %v950_v11, %v7535_v39  ;;  %v7539_v62 = vld [vmem:[#allocation125_spill] sm:$0xff]  ;;  %v4531_v54 = vadd.f32 %v953_v1, %v7541_v41  ;;  %v7545_v21 = vld [vmem:[#allocation130_spill] sm:$0xff] }
  0xdf   : > { %7530 = vst [vmem:[#allocation34_spill] sm:$0xff] %v4513_v33  ;;  %7532 = vst [vmem:[#allocation163_spill] sm:$0xff] %v4516_v50  ;;  %v4528_v55 = vadd.f32 %v952_v27, %v7539_v62  ;;  %v7543_v37 = vld [vmem:[#allocation129_spill] sm:$0xff]  ;;  %v4537_v35 = vadd.f32 %v955_v61, %v7545_v21  ;;  %v7547_v22 = vld [vmem:[#allocation134_spill] sm:$0xff] }
  0xe0   : > { %7534 = vst [vmem:[#allocation35_spill] sm:$0xff] %v4519_v14  ;;  %7536 = vst [vmem:[#allocation85_spill] sm:$0xff] %v4522_v45  ;;  %v4534_v23 = vadd.f32 %v954_v8, %v7543_v37  ;;  %v4540_v30 = vadd.f32 %v956_v6, %v7547_v22  ;;  %v7549_v11 = vld [vmem:[#allocation67_spill] sm:$0xff]  ;;  %v7551_v56 = vld [vmem:[#allocation68_spill] sm:$0xff] }
  0xe1   : > { %7538 = vst [vmem:[#allocation36_spill] sm:$0xff] %v4525_v7  ;;  %7540 = vst [vmem:[#allocation8_spill] sm:$0xff] %v4528_v55  ;;  %v7550_v39 = vld [vmem:[#allocation135_spill] sm:$0xff]  ;;  %v7552_v25 = vld [vmem:[#allocation69_spill] sm:$0xff] }
  0xe2   : > { %7542 = vst [vmem:[#allocation89_spill] sm:$0xff] %v4531_v54  ;;  %7544 = vst [vmem:[#allocation12_spill] sm:$0xff] %v4534_v23  ;;  %v4544_v14 = vmul.f32 %v7550_v39, %v7549_v11  ;;  %v4548_v27 = vmul.f32 %v7550_v39, %v7551_v56  ;;  %v4552_v1 = vmul.f32 %v7550_v39, %v7552_v25  ;;  %v7553_v8 = vld [vmem:[#allocation70_spill] sm:$0xff]  ;;  %v7554_v61 = vld [vmem:[#allocation71_spill] sm:$0xff] }
  0xe3   : > { %7546 = vst [vmem:[#allocation90_spill] sm:$0xff] %v4537_v35  ;;  %7548 = vst [vmem:[#allocation13_spill] sm:$0xff] %v4540_v30  ;;  %v4556_v62 = vmul.f32 %v7550_v39, %v7553_v8  ;;  %v4560_v6 = vmul.f32 %v7550_v39, %v7554_v61  ;;  %v7555_v41 = vld [vmem:[#allocation72_spill] sm:$0xff]  ;;  %v7556_v21 = vld [vmem:[#allocation73_spill] sm:$0xff] }
  0xe4   : > { %v4564_v37 = vmul.f32 %v7550_v39, %v7555_v41  ;;  %v4568_v22 = vmul.f32 %v7550_v39, %v7556_v21  ;;  %v7557_v11 = vld [vmem:[#allocation77_spill] sm:$0xff]  ;;  %v7558_v25 = vld [vmem:[#allocation78_spill] sm:$0xff]  ;;  %v7559_v30 = vld [vmem:[#allocation79_spill] sm:$0xff] }
  0xe5   : > { %v4572_v56 = vmul.f32 %v7550_v39, %v7557_v11  ;;  %v4576_v8 = vmul.f32 %v7550_v39, %v7558_v25  ;;  %v4580_v61 = vmul.f32 %v7550_v39, %v7559_v30  ;;  %v7560_v35 = vld [vmem:[#allocation80_spill] sm:$0xff]  ;;  %v7561_v23 = vld [vmem:[#allocation81_spill] sm:$0xff]  ;;  %v7563_v54 = vld [vmem:[#allocation82_spill] sm:$0xff] }
  0xe6   : > { %v4584_v41 = vmul.f32 %v7550_v39, %v7560_v35  ;;  %v4588_v21 = vmul.f32 %v7550_v39, %v7561_v23  ;;  %v4592_v11 = vmul.f32 %v7550_v39, %v7563_v54  ;;  %v7565_v55 = vld [vmem:[#allocation83_spill] sm:$0xff]  ;;  %v7567_v50 = vld [vmem:[#allocation84_spill] sm:$0xff]  ;;  %v7569_v7 = vld [vmem:[#allocation86_spill] sm:$0xff] }
  0xe7   : > { %v4596_v25 = vmul.f32 %v7550_v39, %v7565_v55  ;;  %v4600_v30 = vmul.f32 %v7550_v39, %v7567_v50  ;;  %v4604_v35 = vmul.f32 %v7550_v39, %v7569_v7  ;;  %v7571_v45 = vld [vmem:[#allocation87_spill] sm:$0xff]  ;;  %v7573_v17 = vld [vmem:[#allocation88_spill] sm:$0xff]  ;;  %v7575_v63 = vld [vmem:[#allocation93_spill] sm:$0xff] }
  0xe8   : > { %7562 = vst [vmem:[#allocation91_spill] sm:$0xff] %v4588_v21  ;;  %7564 = vst [vmem:[#allocation14_spill] sm:$0xff] %v4592_v11  ;;  %v4608_v23 = vmul.f32 %v7550_v39, %v7571_v45  ;;  %v4612_v54 = vmul.f32 %v7550_v39, %v7573_v17  ;;  %v4616_v55 = vmul.f32 %v7550_v39, %v7575_v63  ;;  %v7577_v48 = vld [vmem:[#allocation94_spill] sm:$0xff]  ;;  %v7579_v59 = vld [vmem:[#allocation95_spill] sm:$0xff] }
  0xe9   : > { %7566 = vst [vmem:[#allocation92_spill] sm:$0xff] %v4596_v25  ;;  %7568 = vst [vmem:[#allocation104_spill] sm:$0xff] %v4600_v30  ;;  %v4620_v50 = vmul.f32 %v7550_v39, %v7577_v48  ;;  %v4624_v7 = vmul.f32 %v7550_v39, %v7579_v59  ;;  %v4627_v45 = vld [vmem:[%s2927_s17 + $0x5] ss:$0 sm:$0xff]  ;;  %v7582_v58 = vld [vmem:[#allocation100_spill] sm:$0xff] }
  0xea   : > { %7570 = vst [vmem:[#allocation141_spill] sm:$0xff] %v4604_v35  ;;  %7572 = vst [vmem:[#allocation19_spill] sm:$0xff] %v4608_v23  ;;  %v1059_v17 = vmul.f32 %v7550_v39, %v7582_v58  ;;  %v7583_v10 = vld [vmem:[#allocation101_spill] sm:$0xff]  ;;  %v7584_v63 = vld [vmem:[#allocation102_spill] sm:$0xff] }
  0xeb   : > { %7574 = vst [vmem:[#allocation97_spill] sm:$0xff] %v4612_v54  ;;  %7576 = vst [vmem:[#allocation117_spill] sm:$0xff] %v4616_v55  ;;  %v1060_v51 = vmul.f32 %v7550_v39, %v7583_v10  ;;  %v1061_v44 = vmul.f32 %v7550_v39, %v7584_v63  ;;  %v7585_v2 = vld [vmem:[#allocation45_spill] sm:$0xff]  ;;  %v7586_v31 = vld [vmem:[#allocation46_spill] sm:$0xff] }
  0xec   : > { %7578 = vst [vmem:[#allocation118_spill] sm:$0xff] %v4620_v50  ;;  %7580 = vst [vmem:[#allocation125_spill] sm:$0xff] %v4624_v7  ;;  %v1305_v48 = vmul.f32 %v4627_v45, %v7585_v2  ;;  %v1306_v59 = vmul.f32 %v4627_v45, %v7586_v31  ;;  %v7587_v29 = vld [vmem:[#allocation47_spill] sm:$0xff]  ;;  %v7588_v12 = vld [vmem:[#allocation48_spill] sm:$0xff] }
  0xed   : > { %7581 = vst [vmem:[#allocation126_spill] sm:$0xff] %v4627_v45  ;;  %v1307_v53 = vmul.f32 %v4627_v45, %v7587_v29  ;;  %v1308_v58 = vmul.f32 %v4627_v45, %v7588_v12  ;;  %v7589_v18 = vld [vmem:[#allocation49_spill] sm:$0xff]  ;;  %v7590_v13 = vld [vmem:[#allocation50_spill] sm:$0xff]  ;;  %v7591_v0 = vld [vmem:[#allocation51_spill] sm:$0xff] }
  0xee   : > { %v1309_v10 = vmul.f32 %v4627_v45, %v7589_v18  ;;  %v1310_v63 = vmul.f32 %v4627_v45, %v7590_v13  ;;  %v1311_v28 = vmul.f32 %v4627_v45, %v7591_v0  ;;  %v7592_v2 = vld [vmem:[#allocation52_spill] sm:$0xff]  ;;  %v7593_v33 = vld [vmem:[#allocation53_spill] sm:$0xff]  ;;  %v7596_v12 = vld [vmem:[#allocation54_spill] sm:$0xff] }
  0xef   : > { %v1312_v20 = vmul.f32 %v4627_v45, %v7592_v2  ;;  %v1313_v31 = vmul.f32 %v4627_v45, %v7593_v33  ;;  %v4654_v42 = vld [vmem:[%s2924_s21 + $0x1b2] sm:$0xff]  ;;  %v4657_v29 = vld [vmem:[%s2924_s21 + $0x1ba] sm:$0x3f]  ;;  %v1314_v40 = vmul.f32 %v4627_v45, %v7596_v12  ;;  %v7598_v13 = vld [vmem:[#allocation57_spill] sm:$0xff] }
  0xf0   : > { %7594 = vst [vmem:[#allocation129_spill] sm:$0xff] %v4654_v42  ;;  %7595 = vst [vmem:[#allocation130_spill] sm:$0xff] %v4657_v29  ;;  %v7597_v18 = vld [vmem:[#allocation55_spill] sm:$0xff]  ;;  %v1316_v36 = vmul.f32 %v4627_v45, %v7598_v13  ;;  %v7599_v0 = vld [vmem:[#allocation58_spill] sm:$0xff] }
  0xf1   : > { %v1315_v7 = vmul.f32 %v4627_v45, %v7597_v18  ;;  %v1317_v50 = vmul.f32 %v4627_v45, %v7599_v0  ;;  %v4668_v2 = vld [vmem:[%s2924_s21 + $0xd0] sm:$0xff]  ;;  %v4671_v57 = vld [vmem:[%s2924_s21 + $0xd8] sm:$0x3f]  ;;  %v7604_v12 = vld [vmem:[#allocation61_spill] sm:$0xff] }
  0xf2   : > { %7600 = vst [vmem:[#allocation134_spill] sm:$0xff] %v4668_v2  ;;  %7601 = vst [vmem:[#allocation67_spill] sm:$0xff] %v4671_v57  ;;  %v7602_v33 = vld [vmem:[#allocation59_spill] sm:$0xff]  ;;  %v7603_v5 = vld [vmem:[#allocation60_spill] sm:$0xff]  ;;  %v1320_v18 = vmul.f32 %v4627_v45, %v7604_v12 }
  0xf3   : > { %v1318_v55 = vmul.f32 %v4627_v45, %v7602_v33  ;;  %v1319_v54 = vmul.f32 %v4627_v45, %v7603_v5  ;;  %v7605_v43 = vld [vmem:[#allocation62_spill] sm:$0xff]  ;;  %v7606_v23 = vld [vmem:[#allocation63_spill] sm:$0xff]  ;;  %v7607_v46 = vld [vmem:[#allocation64_spill] sm:$0xff] }
  0xf4   : > { %v1321_v13 = vmul.f32 %v4627_v45, %v7605_v43  ;;  %v1322_v0 = vmul.f32 %v4627_v45, %v7606_v23  ;;  %v1323_v35 = vmul.f32 %v4627_v45, %v7607_v46  ;;  %v7608_v49 = vld [vmem:[#allocation65_spill] sm:$0xff]  ;;  %v7609_v30 = vld [vmem:[#allocation66_spill] sm:$0xff]  ;;  %v1326_v43 = vmul.f32 %v4627_v45, %v4654_v42  ;;  %v7614_v21 = vld [vmem:[#allocation111_spill] sm:$0xff] }
  0xf5   : > { %v1324_v33 = vmul.f32 %v4627_v45, %v7608_v49  ;;  %v1325_v5 = vmul.f32 %v4627_v45, %v7609_v30  ;;  %v7610_v38 = vld [vmem:[#allocation105_spill] sm:$0xff]  ;;  %v7611_v12 = vld [vmem:[#allocation106_spill] sm:$0xff]  ;;  %v1327_v23 = vmul.f32 %v4627_v45, %v4657_v29  ;;  %v1064_v46 = vmul.f32 %v7550_v39, %v4668_v2  ;;  %v4708_v15 = vld [vmem:[%s2924_s21 + $0xf8] sm:$0x3f] }
  0xf6   : > { %v1062_v25 = vmul.f32 %v7550_v39, %v7610_v38  ;;  %v1063_v52 = vmul.f32 %v7550_v39, %v7611_v12  ;;  %v1065_v49 = vmul.f32 %v7550_v39, %v4671_v57  ;;  %v7612_v11 = vld [vmem:[#allocation109_spill] sm:$0xff]  ;;  %v7613_v4 = vld [vmem:[#allocation110_spill] sm:$0xff]  ;;  %v1068_v12 = vmul.f32 %v7550_v39, %v7614_v21  ;;  %7615 = vst [vmem:[#allocation135_spill] sm:$0xff] %v4708_v15  ;;  %v7633_v45 = vld [vmem:[#allocation19_spill] sm:$0xff] }
  0xf7   : > { %v1066_v30 = vmul.f32 %v7550_v39, %v7612_v11  ;;  %v1067_v38 = vmul.f32 %v7550_v39, %v7613_v4  ;;  %v1069_v29 = vmul.f32 %v4708_v15, %v7550_v39  ;;  %v4713_v42 = vld [vmem:[%s2924_s21 + $0x100] sm:$0xff]  ;;  %v4719_v57 = vadd.f32 %v4544_v14, %v4354_v26 }
  0xf8   : > { %7616 = vst [vmem:[#allocation68_spill] sm:$0xff] %v4713_v42  ;;  %v1070_v2 = vmul.f32 %v4713_v42, %v7550_v39  ;;  %v4723_v4 = vadd.f32 %v4548_v27, %v4354_v26  ;;  %v4727_v21 = vadd.f32 %v4552_v1, %v4358_v32  ;;  %v4731_v11 = vadd.f32 %v4556_v62, %v4362_v47  ;;  %v7617_v27 = vld [vmem:[#allocation42_spill] sm:$0xff]  ;;  %v7618_v1 = vld [vmem:[#allocation91_spill] sm:$0xff]  ;;  %v7630_v42 = vld [vmem:[#allocation141_spill] sm:$0xff] }
  0xf9   : > { %v4735_v15 = vadd.f32 %v4560_v6, %v4366_v19  ;;  %v4739_v14 = vadd.f32 %v4564_v37, %v4370_v34  ;;  %v4743_v39 = vadd.f32 %v4568_v22, %v4374_v24  ;;  %v4747_v32 = vadd.f32 %v4572_v56, %v4378_v3  ;;  %v7620_v62 = vld [vmem:[#allocation43_spill] sm:$0xff]  ;;  %v7621_v6 = vld [vmem:[#allocation14_spill] sm:$0xff]  ;;  %v7623_v37 = vld [vmem:[#allocation44_spill] sm:$0xff] }
  0xfa   : > { %v4751_v47 = vadd.f32 %v4576_v8, %v4382_v16  ;;  %v4755_v19 = vadd.f32 %v4580_v61, %v4386_v60  ;;  %v4759_v34 = vadd.f32 %v4584_v41, %v4390_v9  ;;  %v4763_v24 = vadd.f32 %v7618_v1, %v7617_v27  ;;  %v7624_v22 = vld [vmem:[#allocation92_spill] sm:$0xff]  ;;  %v7632_v41 = vld [vmem:[#allocation139_spill] sm:$0xff]  ;;  %v7634_v1 = vld [vmem:[#allocation145_spill] sm:$0xff] }
  0xfb   : > { %v4767_v3 = vadd.f32 %v7621_v6, %v7620_v62  ;;  %v4771_v16 = vadd.f32 %v7624_v22, %v7623_v37  ;;  %v7626_v56 = vld [vmem:[#allocation108_spill] sm:$0xff]  ;;  %v4783_v27 = vadd.f32 %v7633_v45, %v7632_v41  ;;  %v7637_v6 = vld [vmem:[#allocation74_spill] sm:$0xff] }
  0xfc   : > { %7619 = vst [vmem:[#allocation69_spill] sm:$0xff] %v4763_v24  ;;  %v7627_v8 = vld [vmem:[#allocation104_spill] sm:$0xff]  ;;  %v7635_v24 = vld [vmem:[#allocation97_spill] sm:$0xff]  ;;  %v7640_v22 = vld [vmem:[#allocation150_spill] sm:$0xff] }
  0xfd   : > { %7622 = vst [vmem:[#allocation70_spill] sm:$0xff] %v4767_v3  ;;  %7625 = vst [vmem:[#allocation71_spill] sm:$0xff] %v4771_v16  ;;  %v4775_v60 = vadd.f32 %v7627_v8, %v7626_v56  ;;  %v7629_v61 = vld [vmem:[#allocation136_spill] sm:$0xff]  ;;  %v4787_v62 = vadd.f32 %v7635_v24, %v7634_v1  ;;  %v7638_v3 = vld [vmem:[#allocation117_spill] sm:$0xff] }
  0xfe   : > { %v4779_v9 = vadd.f32 %v7630_v42, %v7629_v61  ;;  %v4791_v37 = vadd.f32 %v7638_v3, %v7637_v6  ;;  %v7641_v16 = vld [vmem:[#allocation118_spill] sm:$0xff]  ;;  %v7642_v8 = vld [vmem:[#allocation99_spill] sm:$0xff] }
  0xff   : > { %7628 = vst [vmem:[#allocation72_spill] sm:$0xff] %v4775_v60  ;;  %7636 = vst [vmem:[#allocation77_spill] sm:$0xff] %v4787_v62  ;;  %v4795_v56 = vadd.f32 %v7641_v16, %v7640_v22  ;;  %v7643_v60 = vld [vmem:[#allocation125_spill] sm:$0xff]  ;;  %v7644_v61 = vld [vmem:[#allocation22_spill] sm:$0xff] }
 0x100   : > { %7631 = vst [vmem:[#allocation73_spill] sm:$0xff] %v4779_v9  ;;  %7639 = vst [vmem:[#allocation78_spill] sm:$0xff] %v4791_v37  ;;  %v4799_v42 = vadd.f32 %v7643_v60, %v7642_v8  ;;  %v4802_v9 = vadd.f32 %v1059_v17, %v7644_v61  ;;  %v7645_v45 = vld [vmem:[#allocation162_spill] sm:$0xff]  ;;  %v7648_v62 = vld [vmem:[#allocation112_spill] sm:$0xff] }
 0x101   : > { %v4805_v41 = vadd.f32 %v1060_v51, %v7645_v45  ;;  %v7646_v24 = vld [vmem:[#allocation34_spill] sm:$0xff]  ;;  %v4811_v3 = vadd.f32 %v1305_v48, %v7648_v62  ;;  %v7650_v6 = vld [vmem:[#allocation75_spill] sm:$0xff]  ;;  %v7652_v16 = vld [vmem:[#allocation24_spill] sm:$0xff] }
 0x102   : > { %v4808_v1 = vadd.f32 %v1061_v44, %v7646_v24  ;;  %v4814_v37 = vadd.f32 %v1306_v59, %v7650_v6  ;;  %v4817_v22 = vadd.f32 %v1307_v53, %v7652_v16  ;;  %v7654_v60 = vld [vmem:[#allocation76_spill] sm:$0xff]  ;;  %v7656_v17 = vld [vmem:[#allocation25_spill] sm:$0xff]  ;;  %v7658_v51 = vld [vmem:[#allocation154_spill] sm:$0xff] }
 0x103   : > { %7649 = vst [vmem:[#allocation80_spill] sm:$0xff] %v4811_v3  ;;  %v4820_v8 = vadd.f32 %v1308_v58, %v7654_v60  ;;  %v4823_v61 = vadd.f32 %v1309_v10, %v7656_v17  ;;  %v4826_v45 = vadd.f32 %v1310_v63, %v7658_v51  ;;  %v7660_v44 = vld [vmem:[#allocation26_spill] sm:$0xff]  ;;  %v7662_v48 = vld [vmem:[#allocation155_spill] sm:$0xff]  ;;  %v7666_v53 = vld [vmem:[#allocation156_spill] sm:$0xff] }
 0x104   : > { %7647 = vst [vmem:[#allocation79_spill] sm:$0xff] %v4808_v1  ;;  %7651 = vst [vmem:[#allocation81_spill] sm:$0xff] %v4814_v37  ;;  %v4829_v24 = vadd.f32 %v1311_v28, %v7660_v44  ;;  %v4832_v62 = vadd.f32 %v1312_v20, %v7662_v48  ;;  %v7664_v59 = vld [vmem:[#allocation27_spill] sm:$0xff]  ;;  %v4838_v16 = vadd.f32 %v1314_v40, %v7666_v53  ;;  %v7668_v58 = vld [vmem:[#allocation28_spill] sm:$0xff] }
 0x105   : > { %7653 = vst [vmem:[#allocation82_spill] sm:$0xff] %v4817_v22  ;;  %7655 = vst [vmem:[#allocation83_spill] sm:$0xff] %v4820_v8  ;;  %v4835_v6 = vadd.f32 %v1313_v31, %v7664_v59  ;;  %v4841_v60 = vadd.f32 %v1315_v7, %v7668_v58  ;;  %v7670_v10 = vld [vmem:[#allocation157_spill] sm:$0xff]  ;;  %v7674_v28 = vld [vmem:[#allocation158_spill] sm:$0xff] }
 0x106   : > { %7657 = vst [vmem:[#allocation84_spill] sm:$0xff] %v4823_v61  ;;  %7659 = vst [vmem:[#allocation86_spill] sm:$0xff] %v4826_v45  ;;  %v4844_v17 = vadd.f32 %v1316_v36, %v7670_v10  ;;  %v7672_v63 = vld [vmem:[#allocation29_spill] sm:$0xff]  ;;  %v4850_v44 = vadd.f32 %v1318_v55, %v7674_v28  ;;  %v7676_v20 = vld [vmem:[#allocation30_spill] sm:$0xff] }
 0x107   : > { %7661 = vst [vmem:[#allocation87_spill] sm:$0xff] %v4829_v24  ;;  %7663 = vst [vmem:[#allocation88_spill] sm:$0xff] %v4832_v62  ;;  %v4847_v51 = vadd.f32 %v1317_v50, %v7672_v63  ;;  %v4853_v48 = vadd.f32 %v1319_v54, %v7676_v20  ;;  %v7678_v31 = vld [vmem:[#allocation159_spill] sm:$0xff]  ;;  %v7682_v7 = vld [vmem:[#allocation160_spill] sm:$0xff] }
 0x108   : > { %7665 = vst [vmem:[#allocation93_spill] sm:$0xff] %v4835_v6  ;;  %7667 = vst [vmem:[#allocation94_spill] sm:$0xff] %v4838_v16  ;;  %v4856_v59 = vadd.f32 %v1320_v18, %v7678_v31  ;;  %v7680_v40 = vld [vmem:[#allocation31_spill] sm:$0xff]  ;;  %v4862_v58 = vadd.f32 %v1322_v0, %v7682_v7  ;;  %v7684_v36 = vld [vmem:[#allocation32_spill] sm:$0xff] }
 0x109   : > { %7669 = vst [vmem:[#allocation95_spill] sm:$0xff] %v4841_v60  ;;  %7671 = vst [vmem:[#allocation100_spill] sm:$0xff] %v4844_v17  ;;  %v4859_v53 = vadd.f32 %v1321_v13, %v7680_v40  ;;  %v4865_v10 = vadd.f32 %v1323_v35, %v7684_v36  ;;  %v7686_v50 = vld [vmem:[#allocation161_spill] sm:$0xff]  ;;  %v7692_v18 = vld [vmem:[#allocation36_spill] sm:$0xff] }
 0x10a   : > { %7673 = vst [vmem:[#allocation101_spill] sm:$0xff] %v4847_v51  ;;  %7675 = vst [vmem:[#allocation102_spill] sm:$0xff] %v4850_v44  ;;  %v4868_v63 = vadd.f32 %v1324_v33, %v7686_v50  ;;  %v7688_v55 = vld [vmem:[#allocation33_spill] sm:$0xff]  ;;  %v4877_v31 = vadd.f32 %v1063_v52, %v7692_v18  ;;  %v7694_v13 = vld [vmem:[#allocation163_spill] sm:$0xff] }
 0x10b   : > { %7677 = vst [vmem:[#allocation45_spill] sm:$0xff] %v4853_v48  ;;  %7679 = vst [vmem:[#allocation46_spill] sm:$0xff] %v4856_v59  ;;  %v4871_v28 = vadd.f32 %v1325_v5, %v7688_v55  ;;  %v7690_v54 = vld [vmem:[#allocation85_spill] sm:$0xff]  ;;  %v4880_v40 = vadd.f32 %v1326_v43, %v7694_v13  ;;  %v7696_v0 = vld [vmem:[#allocation35_spill] sm:$0xff]  ;;  %v4892_v5 = vadd.f32 %v1066_v30, %v4354_v26 }
 0x10c   : > { %7681 = vst [vmem:[#allocation47_spill] sm:$0xff] %v4859_v53  ;;  %7683 = vst [vmem:[#allocation48_spill] sm:$0xff] %v4862_v58  ;;  %v4874_v20 = vadd.f32 %v1062_v25, %v7690_v54  ;;  %v4883_v7 = vadd.f32 %v1327_v23, %v7696_v0  ;;  %v7698_v35 = vld [vmem:[#allocation8_spill] sm:$0xff]  ;;  %v7700_v33 = vld [vmem:[#allocation89_spill] sm:$0xff]  ;;  %v4895_v25 = vadd.f32 %v1067_v38, %v4354_v26 }
 0x10d   : > { %7685 = vst [vmem:[#allocation49_spill] sm:$0xff] %v4865_v10  ;;  %7687 = vst [vmem:[#allocation50_spill] sm:$0xff] %v4868_v63  ;;  %v4886_v36 = vadd.f32 %v1064_v46, %v7698_v35  ;;  %v4889_v50 = vadd.f32 %v1065_v49, %v7700_v33  ;;  %v7704_v52 = vld [vmem:[#allocation12_spill] sm:$0xff]  ;;  %v7706_v43 = vld [vmem:[#allocation90_spill] sm:$0xff] }
 0x10e   : > { %7689 = vst [vmem:[#allocation51_spill] sm:$0xff] %v4871_v28  ;;  %7691 = vst [vmem:[#allocation52_spill] sm:$0xff] %v4874_v20  ;;  %v4898_v55 = vadd.f32 %v1068_v12, %v7704_v52  ;;  %v4901_v54 = vadd.f32 %v1069_v29, %v7706_v43  ;;  %v7708_v23 = vld [vmem:[#allocation13_spill] sm:$0xff]  ;;  %v7710_v46 = vld [vmem:[#allocation107_spill] sm:$0xff] }
 0x10f   : > { %7693 = vst [vmem:[#allocation53_spill] sm:$0xff] %v4877_v31  ;;  %7695 = vst [vmem:[#allocation54_spill] sm:$0xff] %v4880_v40  ;;  %v4904_v18 = vadd.f32 %v1070_v2, %v7708_v23  ;;  %v7711_v13 = vld [vmem:[#allocation166_spill] sm:$0xff]  ;;  %v7713_v35 = vld [vmem:[#allocation115_spill] sm:$0xff] }
 0x110   : > { %7697 = vst [vmem:[#allocation55_spill] sm:$0xff] %v4883_v7  ;;  %7699 = vst [vmem:[#allocation57_spill] sm:$0xff] %v4886_v36  ;;  %v4908_v0 = vmul.f32 %v7711_v13, %v7710_v46  ;;  %v7712_v49 = vld [vmem:[#allocation114_spill] sm:$0xff]  ;;  %v4916_v26 = vmul.f32 %v7711_v13, %v7713_v35  ;;  %v7714_v38 = vld [vmem:[#allocation116_spill] sm:$0xff] }
 0x111   : > { %7701 = vst [vmem:[#allocation58_spill] sm:$0xff] %v4889_v50  ;;  %7702 = vst [vmem:[#allocation59_spill] sm:$0xff] %v4892_v5  ;;  %v4912_v30 = vmul.f32 %v7711_v13, %v7712_v49  ;;  %v4920_v12 = vmul.f32 %v7711_v13, %v7714_v38  ;;  %v7715_v29 = vld [vmem:[#allocation121_spill] sm:$0xff]  ;;  %v7716_v33 = vld [vmem:[#allocation122_spill] sm:$0xff] }
 0x112   : > { %7703 = vst [vmem:[#allocation60_spill] sm:$0xff] %v4895_v25  ;;  %7705 = vst [vmem:[#allocation61_spill] sm:$0xff] %v4898_v55  ;;  %v4924_v2 = vmul.f32 %v7711_v13, %v7715_v29  ;;  %v4928_v52 = vmul.f32 %v7711_v13, %v7716_v33  ;;  %v7717_v43 = vld [vmem:[#allocation123_spill] sm:$0xff]  ;;  %v7719_v35 = vld [vmem:[#allocation128_spill] sm:$0xff] }
 0x113   : > { %7707 = vst [vmem:[#allocation62_spill] sm:$0xff] %v4901_v54  ;;  %7709 = vst [vmem:[#allocation63_spill] sm:$0xff] %v4904_v18  ;;  %v4932_v23 = vmul.f32 %v7711_v13, %v7717_v43  ;;  %v7718_v46 = vld [vmem:[#allocation127_spill] sm:$0xff]  ;;  %v4940_v38 = vmul.f32 %v7711_v13, %v7719_v35  ;;  %v7721_v33 = vld [vmem:[#allocation9_spill] sm:$0xff] }
 0x114   : > { %v4936_v49 = vmul.f32 %v7711_v13, %v7718_v46  ;;  %v7720_v7 = vld [vmem:[#allocation7_spill] sm:$0xff]  ;;  %v4948_v40 = vmul.f32 %v7711_v13, %v7721_v33  ;;  %v7722_v18 = vld [vmem:[#allocation10_spill] sm:$0xff]  ;;  %v7724_v35 = vld [vmem:[#allocation16_spill] sm:$0xff] }
 0x115   : > { %v4944_v29 = vmul.f32 %v7711_v13, %v7720_v7  ;;  %v4952_v43 = vmul.f32 %v7711_v13, %v7722_v18  ;;  %v7723_v46 = vld [vmem:[#allocation11_spill] sm:$0xff]  ;;  %v4960_v55 = vmul.f32 %v7711_v13, %v7724_v35  ;;  %v7725_v7 = vld [vmem:[#allocation17_spill] sm:$0xff]  ;;  %v7726_v33 = vld [vmem:[#allocation18_spill] sm:$0xff] }
 0x116   : > { %v4956_v54 = vmul.f32 %v7711_v13, %v7723_v46  ;;  %v4964_v25 = vmul.f32 %v7711_v13, %v7725_v7  ;;  %v4968_v5 = vmul.f32 %v7711_v13, %v7726_v33  ;;  %v7727_v18 = vld [vmem:[#allocation23_spill] sm:$0xff]  ;;  %v7728_v46 = vld [vmem:[#allocation137_spill] sm:$0xff]  ;;  %v7729_v35 = vld [vmem:[#allocation138_spill] sm:$0xff] }
 0x117   : > { %v4972_v50 = vmul.f32 %v7711_v13, %v7727_v18  ;;  %v4976_v36 = vmul.f32 %v7711_v13, %v7728_v46  ;;  %v4980_v28 = vmul.f32 %v7711_v13, %v7729_v35  ;;  %v7730_v7 = vld [vmem:[#allocation142_spill] sm:$0xff]  ;;  %v7731_v33 = vld [vmem:[#allocation143_spill] sm:$0xff]  ;;  %v7733_v1 = vld [vmem:[#allocation144_spill] sm:$0xff] }
 0x118   : > { %v4984_v31 = vmul.f32 %v7711_v13, %v7730_v7  ;;  %v4988_v20 = vmul.f32 %v7711_v13, %v7731_v33  ;;  %v4991_v18 = vld [vmem:[%s2927_s17 + $0x6] ss:$0 sm:$0xff]  ;;  %v4995_v46 = vmul.f32 %v7711_v13, %v7733_v1  ;;  %v7734_v63 = vld [vmem:[#allocation146_spill] sm:$0xff]  ;;  %v2557_v10 = vld [vmem:[%s2924_s21 + $0x118] sm:$0x3f] }
 0x119   : > { %7732 = vst [vmem:[#allocation64_spill] sm:$0xff] %v4991_v18  ;;  %v4999_v35 = vmul.f32 %v7711_v13, %v7734_v63  ;;  %v5003_v7 = vmul.f32 %v2557_v10, %v4991_v18  ;;  %v2558_v58 = vld [vmem:[%s2924_s21 + $0x120] sm:$0xff]  ;;  %v2559_v53 = vld [vmem:[%s2924_s21 + $0x128] sm:$0x3f]  ;;  %v2560_v59 = vld [vmem:[%s2924_s21 + $0x130] sm:$0xff] }
 0x11a   : > { %v5007_v33 = vmul.f32 %v2558_v58, %v4991_v18  ;;  %v5011_v1 = vmul.f32 %v2559_v53, %v4991_v18  ;;  %v5015_v63 = vmul.f32 %v2560_v59, %v4991_v18  ;;  %v2561_v48 = vld [vmem:[%s2924_s21 + $0x138] sm:$0x3f]  ;;  %v2562_v44 = vld [vmem:[%s2924_s21 + $0x140] sm:$0xff]  ;;  %v2563_v51 = vld [vmem:[%s2924_s21 + $0x148] sm:$0x3f] }
 0x11b   : > { %7735 = vst [vmem:[#allocation65_spill] sm:$0xff] %v4999_v35  ;;  %7736 = vst [vmem:[#allocation66_spill] sm:$0xff] %v5003_v7  ;;  %v5019_v10 = vmul.f32 %v2561_v48, %v4991_v18  ;;  %v5023_v58 = vmul.f32 %v2562_v44, %v4991_v18  ;;  %v5027_v53 = vmul.f32 %v2563_v51, %v4991_v18  ;;  %v2564_v17 = vld [vmem:[%s2924_s21 + $0x150] sm:$0xff]  ;;  %v2565_v60 = vld [vmem:[%s2924_s21 + $0x158] sm:$0x3f] }
 0x11c   : > { %7737 = vst [vmem:[#allocation105_spill] sm:$0xff] %v5007_v33  ;;  %7738 = vst [vmem:[#allocation106_spill] sm:$0xff] %v5011_v1  ;;  %v5031_v59 = vmul.f32 %v2564_v17, %v4991_v18  ;;  %v5035_v48 = vmul.f32 %v2565_v60, %v4991_v18  ;;  %v2566_v16 = vld [vmem:[%s2924_s21 + $0x160] sm:$0xff]  ;;  %v5042_v6 = vld [vmem:[%s2924_s21 + $0xd1] sm:$0xff] }
 0x11d   : > { %7739 = vst [vmem:[#allocation109_spill] sm:$0xff] %v5015_v63  ;;  %7740 = vst [vmem:[#allocation110_spill] sm:$0xff] %v5019_v10  ;;  %v5039_v44 = vmul.f32 %v2566_v16, %v4991_v18  ;;  %v5045_v51 = vld [vmem:[%s2924_s21 + $0xd9] sm:$0x3f]  ;;  %v2567_v62 = vld [vmem:[%s2924_s21 + $0x168] sm:$0x3f] }
 0x11e   : > { %7741 = vst [vmem:[#allocation111_spill] sm:$0xff] %v5023_v58  ;;  %7742 = vst [vmem:[#allocation42_spill] sm:$0xff] %v5027_v53  ;;  %v5049_v53 = vmul.f32 %v2567_v62, %v4991_v18  ;;  %v2568_v17 = vld [vmem:[%s2924_s21 + $0x170] sm:$0xff]  ;;  %v2569_v60 = vld [vmem:[%s2924_s21 + $0x178] sm:$0x3f] }
 0x11f   : > { %7743 = vst [vmem:[#allocation91_spill] sm:$0xff] %v5031_v59  ;;  %7744 = vst [vmem:[#allocation43_spill] sm:$0xff] %v5035_v48  ;;  %v5053_v59 = vmul.f32 %v2568_v17, %v4991_v18  ;;  %v1433_v48 = vmul.f32 %v2569_v60, %v4991_v18  ;;  %v2570_v24 = vld [vmem:[%s2924_s21 + $0x180] sm:$0xff]  ;;  %v2572_v45 = vld [vmem:[%s2924_s21 + $0x190] sm:$0xff] }
 0x120   : > { %7745 = vst [vmem:[#allocation14_spill] sm:$0xff] %v5039_v44  ;;  %7746 = vst [vmem:[#allocation44_spill] sm:$0xff] %v5042_v6  ;;  %v1434_v16 = vmul.f32 %v2570_v24, %v4991_v18  ;;  %v2571_v44 = vld [vmem:[%s2924_s21 + $0x188] sm:$0x3f]  ;;  %v1436_v10 = vmul.f32 %v2572_v45, %v4991_v18  ;;  %v2573_v61 = vld [vmem:[%s2924_s21 + $0x198] sm:$0x3f] }
 0x121   : > { %7747 = vst [vmem:[#allocation92_spill] sm:$0xff] %v5045_v51  ;;  %7748 = vst [vmem:[#allocation108_spill] sm:$0xff] %v5049_v53  ;;  %v1435_v58 = vmul.f32 %v2571_v44, %v4991_v18  ;;  %v1437_v62 = vmul.f32 %v2573_v61, %v4991_v18  ;;  %v2574_v53 = vld [vmem:[%s2924_s21 + $0x1a0] sm:$0xff]  ;;  %v2575_v63 = vld [vmem:[%s2924_s21 + $0x1a8] sm:$0x3f] }
 0x122   : > { %7749 = vst [vmem:[#allocation104_spill] sm:$0xff] %v5053_v59  ;;  %v1438_v17 = vmul.f32 %v2574_v53, %v4991_v18  ;;  %v7750_v59 = vld [vmem:[#allocation147_spill] sm:$0xff]  ;;  %v1439_v24 = vmul.f32 %v2575_v63, %v4991_v18  ;;  %v7751_v8 = vld [vmem:[#allocation5_spill] sm:$0xff]  ;;  %v7752_v1 = vld [vmem:[#allocation6_spill] sm:$0xff]  ;;  %v1181_v53 = vmul.f32 %v7711_v13, %v5042_v6 }
 0x123   : > { %v1178_v60 = vmul.f32 %v7711_v13, %v7750_v59  ;;  %v1440_v44 = vmul.f32 %v4991_v18, %v7751_v8  ;;  %v1441_v45 = vmul.f32 %v4991_v18, %v7752_v1  ;;  %v7753_v22 = vld [vmem:[#allocation148_spill] sm:$0xff]  ;;  %v7754_v61 = vld [vmem:[#allocation149_spill] sm:$0xff]  ;;  %v1182_v59 = vmul.f32 %v7711_v13, %v5045_v51  ;;  %v7755_v7 = vld [vmem:[#allocation151_spill] sm:$0xff] }
 0x124   : > { %v1179_v33 = vmul.f32 %v7711_v13, %v7753_v22  ;;  %v1180_v37 = vmul.f32 %v7711_v13, %v7754_v61  ;;  %v1183_v63 = vmul.f32 %v7711_v13, %v7755_v7  ;;  %v7756_v3 = vld [vmem:[#allocation152_spill] sm:$0xff]  ;;  %v7757_v35 = vld [vmem:[#allocation153_spill] sm:$0xff]  ;;  %v5101_v51 = vadd.f32 %v4908_v0, %v4719_v57  ;;  %v7761_v0 = vld [vmem:[#allocation70_spill] sm:$0xff] }
 0x125   : > { %v1184_v8 = vmul.f32 %v7711_v13, %v7756_v3  ;;  %v1185_v1 = vmul.f32 %v7711_v13, %v7757_v35  ;;  %v5090_v18 = vld [vmem:[%s2924_s21 + $0xf9] sm:$0x3f]  ;;  %v5095_v61 = vld [vmem:[%s2924_s21 + $0x101] sm:$0xff]  ;;  %v5105_v3 = vadd.f32 %v4912_v30, %v4723_v4  ;;  %v5109_v35 = vadd.f32 %v4916_v26, %v4727_v21  ;;  %v7762_v30 = vld [vmem:[#allocation71_spill] sm:$0xff] }
 0x126   : > { %7758 = vst [vmem:[#allocation136_spill] sm:$0xff] %v5090_v18  ;;  %v1186_v22 = vmul.f32 %v5090_v18, %v7711_v13  ;;  %7759 = vst [vmem:[#allocation141_spill] sm:$0xff] %v5095_v61  ;;  %v1187_v6 = vmul.f32 %v5095_v61, %v7711_v13  ;;  %v5113_v7 = vadd.f32 %v4920_v12, %v4731_v11  ;;  %v7760_v13 = vld [vmem:[#allocation69_spill] sm:$0xff]  ;;  %v7763_v26 = vld [vmem:[#allocation72_spill] sm:$0xff] }
 0x127   : > { %v5117_v18 = vadd.f32 %v4924_v2, %v4735_v15  ;;  %v5121_v57 = vadd.f32 %v4928_v52, %v4739_v14  ;;  %v5125_v4 = vadd.f32 %v4932_v23, %v4743_v39  ;;  %v5129_v21 = vadd.f32 %v4936_v49, %v4747_v32  ;;  %v7764_v12 = vld [vmem:[#allocation73_spill] sm:$0xff]  ;;  %v7766_v52 = vld [vmem:[#allocation78_spill] sm:$0xff]  ;;  %v7771_v23 = vld [vmem:[#allocation80_spill] sm:$0xff] }
 0x128   : > { %v5133_v11 = vadd.f32 %v4940_v38, %v4751_v47  ;;  %v5137_v15 = vadd.f32 %v4944_v29, %v4755_v19  ;;  %v5141_v14 = vadd.f32 %v4948_v40, %v4759_v34  ;;  %v5145_v39 = vadd.f32 %v4952_v43, %v7760_v13  ;;  %v7765_v2 = vld [vmem:[#allocation77_spill] sm:$0xff]  ;;  %v7772_v49 = vld [vmem:[#allocation66_spill] sm:$0xff]  ;;  %v7802_v61 = vld [vmem:[#allocation108_spill] sm:$0xff] }
 0x129   : > { %v5149_v32 = vadd.f32 %v4956_v54, %v7761_v0  ;;  %v5153_v47 = vadd.f32 %v4960_v55, %v7762_v30  ;;  %v5157_v19 = vadd.f32 %v4964_v25, %v7763_v26  ;;  %v5161_v34 = vadd.f32 %v4968_v5, %v7764_v12  ;;  %v7774_v38 = vld [vmem:[#allocation81_spill] sm:$0xff]  ;;  %v7778_v43 = vld [vmem:[#allocation106_spill] sm:$0xff]  ;;  %v7787_v26 = vld [vmem:[#allocation111_spill] sm:$0xff] }
 0x12a   : > { %v5165_v40 = vadd.f32 %v4972_v50, %v4783_v27  ;;  %v5169_v54 = vadd.f32 %v4976_v36, %v7765_v2  ;;  %v5173_v55 = vadd.f32 %v4980_v28, %v7766_v52  ;;  %v5177_v25 = vadd.f32 %v4984_v31, %v4795_v56  ;;  %v7769_v50 = vld [vmem:[#allocation65_spill] sm:$0xff]  ;;  %v7777_v31 = vld [vmem:[#allocation82_spill] sm:$0xff]  ;;  %v7789_v2 = vld [vmem:[#allocation87_spill] sm:$0xff] }
 0x12b   : > { %v5181_v5 = vadd.f32 %v4988_v20, %v4799_v42  ;;  %v5185_v27 = vadd.f32 %v4995_v46, %v4802_v9  ;;  %v5189_v36 = vadd.f32 %v7769_v50, %v4805_v41  ;;  %v5193_v28 = vadd.f32 %v7772_v49, %v7771_v23  ;;  %v7775_v29 = vld [vmem:[#allocation105_spill] sm:$0xff]  ;;  %v7780_v20 = vld [vmem:[#allocation83_spill] sm:$0xff]  ;;  %v7783_v46 = vld [vmem:[#allocation84_spill] sm:$0xff] }
 0x12c   : > { %v5197_v56 = vadd.f32 %v7775_v29, %v7774_v38  ;;  %v5201_v42 = vadd.f32 %v7778_v43, %v7777_v31  ;;  %v7781_v13 = vld [vmem:[#allocation109_spill] sm:$0xff]  ;;  %v7784_v0 = vld [vmem:[#allocation110_spill] sm:$0xff]  ;;  %v7792_v23 = vld [vmem:[#allocation88_spill] sm:$0xff] }
 0x12d   : > { %7767 = vst [vmem:[#allocation139_spill] sm:$0xff] %v5181_v5  ;;  %7768 = vst [vmem:[#allocation19_spill] sm:$0xff] %v5185_v27  ;;  %v5205_v9 = vadd.f32 %v7781_v13, %v7780_v20  ;;  %v5209_v41 = vadd.f32 %v7784_v0, %v7783_v46  ;;  %v7786_v30 = vld [vmem:[#allocation86_spill] sm:$0xff]  ;;  %v7793_v49 = vld [vmem:[#allocation91_spill] sm:$0xff] }
 0x12e   : > { %7770 = vst [vmem:[#allocation145_spill] sm:$0xff] %v5189_v36  ;;  %7773 = vst [vmem:[#allocation97_spill] sm:$0xff] %v5193_v28  ;;  %v5213_v12 = vadd.f32 %v7787_v26, %v7786_v30  ;;  %v7790_v52 = vld [vmem:[#allocation42_spill] sm:$0xff]  ;;  %v5221_v38 = vadd.f32 %v7793_v49, %v7792_v23  ;;  %v7795_v29 = vld [vmem:[#allocation93_spill] sm:$0xff] }
 0x12f   : > { %7776 = vst [vmem:[#allocation74_spill] sm:$0xff] %v5197_v56  ;;  %7779 = vst [vmem:[#allocation117_spill] sm:$0xff] %v5201_v42  ;;  %v5217_v50 = vadd.f32 %v7790_v52, %v7789_v2  ;;  %v7796_v31 = vld [vmem:[#allocation43_spill] sm:$0xff]  ;;  %v7798_v20 = vld [vmem:[#allocation94_spill] sm:$0xff] }
 0x130   : > { %7782 = vst [vmem:[#allocation150_spill] sm:$0xff] %v5205_v9  ;;  %7785 = vst [vmem:[#allocation118_spill] sm:$0xff] %v5209_v41  ;;  %v5225_v43 = vadd.f32 %v7796_v31, %v7795_v29  ;;  %v7799_v13 = vld [vmem:[#allocation14_spill] sm:$0xff]  ;;  %v7801_v0 = vld [vmem:[#allocation95_spill] sm:$0xff] }
 0x131   : > { %7788 = vst [vmem:[#allocation99_spill] sm:$0xff] %v5213_v12  ;;  %7791 = vst [vmem:[#allocation125_spill] sm:$0xff] %v5217_v50  ;;  %v5229_v46 = vadd.f32 %v7799_v13, %v7798_v20  ;;  %v5233_v30 = vadd.f32 %v7802_v61, %v7801_v0  ;;  %v7804_v26 = vld [vmem:[#allocation100_spill] sm:$0xff]  ;;  %v7807_v52 = vld [vmem:[#allocation101_spill] sm:$0xff] }
 0x132   : > { %7794 = vst [vmem:[#allocation22_spill] sm:$0xff] %v5221_v38  ;;  %7797 = vst [vmem:[#allocation162_spill] sm:$0xff] %v5225_v43  ;;  %v7805_v12 = vld [vmem:[#allocation104_spill] sm:$0xff]  ;;  %v5240_v50 = vadd.f32 %v1433_v48, %v7807_v52  ;;  %v7809_v23 = vld [vmem:[#allocation102_spill] sm:$0xff] }
 0x133   : > { %7800 = vst [vmem:[#allocation34_spill] sm:$0xff] %v5229_v46  ;;  %7803 = vst [vmem:[#allocation112_spill] sm:$0xff] %v5233_v30  ;;  %v5237_v2 = vadd.f32 %v7805_v12, %v7804_v26  ;;  %v5243_v49 = vadd.f32 %v1434_v16, %v7809_v23  ;;  %v7811_v29 = vld [vmem:[#allocation45_spill] sm:$0xff]  ;;  %v7813_v43 = vld [vmem:[#allocation46_spill] sm:$0xff] }
 0x134   : > { %7808 = vst [vmem:[#allocation24_spill] sm:$0xff] %v5240_v50  ;;  %v5246_v31 = vadd.f32 %v1435_v58, %v7811_v29  ;;  %v5249_v20 = vadd.f32 %v1436_v10, %v7813_v43  ;;  %v7815_v13 = vld [vmem:[#allocation47_spill] sm:$0xff]  ;;  %v7817_v61 = vld [vmem:[#allocation48_spill] sm:$0xff]  ;;  %v7819_v12 = vld [vmem:[#allocation49_spill] sm:$0xff] }
 0x135   : > { %7806 = vst [vmem:[#allocation75_spill] sm:$0xff] %v5237_v2  ;;  %7810 = vst [vmem:[#allocation76_spill] sm:$0xff] %v5243_v49  ;;  %v5252_v46 = vadd.f32 %v1437_v62, %v7815_v13  ;;  %v5255_v0 = vadd.f32 %v1438_v17, %v7817_v61  ;;  %v5258_v26 = vadd.f32 %v1439_v24, %v7819_v12  ;;  %v7821_v48 = vld [vmem:[#allocation50_spill] sm:$0xff]  ;;  %v7823_v16 = vld [vmem:[#allocation79_spill] sm:$0xff] }
 0x136   : > { %7812 = vst [vmem:[#allocation25_spill] sm:$0xff] %v5246_v31  ;;  %7814 = vst [vmem:[#allocation154_spill] sm:$0xff] %v5249_v20  ;;  %v5261_v52 = vadd.f32 %v1440_v44, %v7821_v48  ;;  %v5264_v23 = vadd.f32 %v1178_v60, %v7823_v16  ;;  %v7825_v58 = vld [vmem:[#allocation52_spill] sm:$0xff]  ;;  %v7827_v10 = vld [vmem:[#allocation53_spill] sm:$0xff] }
 0x137   : > { %7816 = vst [vmem:[#allocation26_spill] sm:$0xff] %v5252_v46  ;;  %7818 = vst [vmem:[#allocation155_spill] sm:$0xff] %v5255_v0  ;;  %v5267_v29 = vadd.f32 %v1179_v33, %v7825_v58  ;;  %v5270_v43 = vadd.f32 %v1180_v37, %v7827_v10  ;;  %v7829_v62 = vld [vmem:[#allocation51_spill] sm:$0xff]  ;;  %v7831_v17 = vld [vmem:[#allocation57_spill] sm:$0xff] }
 0x138   : > { %7820 = vst [vmem:[#allocation27_spill] sm:$0xff] %v5258_v26  ;;  %7822 = vst [vmem:[#allocation156_spill] sm:$0xff] %v5261_v52  ;;  %v5273_v13 = vadd.f32 %v1441_v45, %v7829_v62  ;;  %v5276_v61 = vadd.f32 %v1181_v53, %v7831_v17  ;;  %v7833_v24 = vld [vmem:[#allocation58_spill] sm:$0xff]  ;;  %v7835_v44 = vld [vmem:[#allocation59_spill] sm:$0xff] }
 0x139   : > { %7824 = vst [vmem:[#allocation28_spill] sm:$0xff] %v5264_v23  ;;  %7826 = vst [vmem:[#allocation157_spill] sm:$0xff] %v5267_v29  ;;  %v5279_v12 = vadd.f32 %v1182_v59, %v7833_v24  ;;  %v5282_v48 = vadd.f32 %v1183_v63, %v7835_v44  ;;  %v7837_v60 = vld [vmem:[#allocation60_spill] sm:$0xff]  ;;  %v7839_v33 = vld [vmem:[#allocation61_spill] sm:$0xff] }
 0x13a   : > { %7828 = vst [vmem:[#allocation29_spill] sm:$0xff] %v5270_v43  ;;  %7830 = vst [vmem:[#allocation158_spill] sm:$0xff] %v5273_v13  ;;  %v5285_v16 = vadd.f32 %v1184_v8, %v7837_v60  ;;  %v5288_v58 = vadd.f32 %v1185_v1, %v7839_v33  ;;  %v7841_v37 = vld [vmem:[#allocation62_spill] sm:$0xff]  ;;  %v7843_v45 = vld [vmem:[#allocation63_spill] sm:$0xff] }
 0x13b   : > { %7832 = vst [vmem:[#allocation30_spill] sm:$0xff] %v5276_v61  ;;  %7834 = vst [vmem:[#allocation159_spill] sm:$0xff] %v5279_v12  ;;  %v5291_v10 = vadd.f32 %v1186_v22, %v7841_v37  ;;  %v5294_v62 = vadd.f32 %v1187_v6, %v7843_v45  ;;  %v7845_v53 = vld [vmem:[#allocation15_spill] sm:$0xff]  ;;  %v7846_v17 = vld [vmem:[#allocation126_spill] sm:$0xff] }
 0x13c   : > { %7836 = vst [vmem:[#allocation31_spill] sm:$0xff] %v5282_v48  ;;  %7838 = vst [vmem:[#allocation160_spill] sm:$0xff] %v5285_v16  ;;  %v5298_v61 = vmul.f32 %v7846_v17, %v7845_v53  ;;  %v7847_v59 = vld [vmem:[#allocation96_spill] sm:$0xff]  ;;  %v7849_v1 = vld [vmem:[#allocation98_spill] sm:$0xff] }
 0x13d   : > { %7840 = vst [vmem:[#allocation32_spill] sm:$0xff] %v5288_v58  ;;  %7842 = vst [vmem:[#allocation161_spill] sm:$0xff] %v5291_v10  ;;  %v5302_v63 = vmul.f32 %v7846_v17, %v7847_v59  ;;  %v7848_v24 = vld [vmem:[#allocation20_spill] sm:$0xff]  ;;  %v5310_v44 = vmul.f32 %v7846_v17, %v7849_v1  ;;  %v7850_v22 = vld [vmem:[#allocation21_spill] sm:$0xff] }
 0x13e   : > { %7844 = vst [vmem:[#allocation33_spill] sm:$0xff] %v5294_v62  ;;  %v5306_v8 = vmul.f32 %v7846_v17, %v7848_v24  ;;  %v5314_v6 = vmul.f32 %v7846_v17, %v7850_v22  ;;  %v7851_v60 = vld [vmem:[#allocation113_spill] sm:$0xff]  ;;  %v7852_v37 = vld [vmem:[#allocation103_spill] sm:$0xff]  ;;  %v7853_v53 = vld [vmem:[#allocation140_spill] sm:$0xff] }
 0x13f   : > { %v5318_v33 = vmul.f32 %v7846_v17, %v7851_v60  ;;  %v5322_v45 = vmul.f32 %v7846_v17, %v7852_v37  ;;  %v5326_v59 = vmul.f32 %v7846_v17, %v7853_v53  ;;  %v7854_v24 = vld [vmem:[#allocation119_spill] sm:$0xff]  ;;  %v7855_v62 = vld [vmem:[#allocation120_spill] sm:$0xff]  ;;  %v7870_v46 = vld [vmem:[#allocation173_spill] sm:$0xff] }
 0x140   : > { %v5330_v1 = vmul.f32 %v7846_v17, %v7854_v24  ;;  %v5334_v22 = vmul.f32 %v7846_v17, %v7855_v62  ;;  %v7856_v10 = vld [vmem:[#allocation124_spill] sm:$0xff]  ;;  %v7857_v58 = vld [vmem:[#allocation131_spill] sm:$0xff]  ;;  %v7859_v24 = vld [vmem:[#allocation133_spill] sm:$0xff] }
 0x141   : > { %v5338_v60 = vmul.f32 %v7846_v17, %v7856_v10  ;;  %v5342_v37 = vmul.f32 %v7846_v17, %v7857_v58  ;;  %v7858_v16 = vld [vmem:[#allocation132_spill] sm:$0xff]  ;;  %v5350_v48 = vmul.f32 %v7846_v17, %v7859_v24  ;;  %v7862_v58 = vld [vmem:[#allocation165_spill] sm:$0xff]  ;;  %v7864_v24 = vld [vmem:[#allocation170_spill] sm:$0xff] }
 0x142   : > { %v5346_v53 = vmul.f32 %v7846_v17, %v7858_v16  ;;  %v7860_v62 = vld [vmem:[#allocation56_spill] sm:$0xff]  ;;  %v5362_v52 = vmul.f32 %v7846_v17, %v7862_v58  ;;  %v7863_v16 = vld [vmem:[#allocation169_spill] sm:$0xff]  ;;  %v5370_v29 = vmul.f32 %v7846_v17, %v7864_v24  ;;  %v7872_v20 = vld [vmem:[#allocation174_spill] sm:$0xff] }
 0x143   : > { %v5354_v12 = vmul.f32 %v7846_v17, %v7860_v62  ;;  %v7861_v10 = vld [vmem:[#allocation164_spill] sm:$0xff]  ;;  %v5366_v43 = vmul.f32 %v7846_v17, %v7863_v16  ;;  %v7865_v62 = vld [vmem:[#allocation171_spill] sm:$0xff]  ;;  %v5385_v16 = vmul.f32 %v7846_v17, %v7870_v46  ;;  %v5389_v24 = vmul.f32 %v7846_v17, %v7872_v20  ;;  %v2579_v50 = vld [vmem:[%s2924_s21 + $0x121] sm:$0xff] }
 0x144   : > { %v5358_v13 = vmul.f32 %v7846_v17, %v7861_v10  ;;  %v5374_v26 = vmul.f32 %v7846_v17, %v7865_v62  ;;  %v7867_v10 = vld [vmem:[#allocation172_spill] sm:$0xff]  ;;  %v5381_v58 = vld [vmem:[%s2927_s17 + $0x7] ss:$0 sm:$0xff]  ;;  %v2580_v46 = vld [vmem:[%s2924_s21 + $0x129] sm:$0x3f] }
 0x145   : > { %v5378_v0 = vmul.f32 %v7846_v17, %v7867_v10  ;;  %7869 = vst [vmem:[#allocation163_spill] sm:$0xff] %v5381_v58  ;;  %7871 = vst [vmem:[#allocation35_spill] sm:$0xff] %v5385_v16  ;;  %v7874_v31 = vld [vmem:[#allocation175_spill] sm:$0xff]  ;;  %v2578_v49 = vld [vmem:[%s2924_s21 + $0x119] sm:$0x3f]  ;;  %v5401_v2 = vmul.f32 %v2579_v50, %v5381_v58  ;;  %v5405_v20 = vmul.f32 %v2580_v46, %v5381_v58 }
 0x146   : > { %7866 = vst [vmem:[#allocation85_spill] sm:$0xff] %v5374_v26  ;;  %7873 = vst [vmem:[#allocation8_spill] sm:$0xff] %v5389_v24  ;;  %v5393_v62 = vmul.f32 %v7846_v17, %v7874_v31  ;;  %v5397_v10 = vmul.f32 %v2578_v49, %v5381_v58  ;;  %v2581_v30 = vld [vmem:[%s2924_s21 + $0x131] sm:$0xff]  ;;  %v2582_v38 = vld [vmem:[%s2924_s21 + $0x139] sm:$0x3f] }
 0x147   : > { %7868 = vst [vmem:[#allocation36_spill] sm:$0xff] %v5378_v0  ;;  %7877 = vst [vmem:[#allocation90_spill] sm:$0xff] %v5401_v2  ;;  %v5409_v31 = vmul.f32 %v2581_v30, %v5381_v58  ;;  %v5413_v49 = vmul.f32 %v2582_v38, %v5381_v58  ;;  %v2583_v41 = vld [vmem:[%s2924_s21 + $0x141] sm:$0xff]  ;;  %v2584_v9 = vld [vmem:[%s2924_s21 + $0x149] sm:$0x3f] }
 0x148   : > { %7875 = vst [vmem:[#allocation89_spill] sm:$0xff] %v5393_v62  ;;  %7876 = vst [vmem:[#allocation12_spill] sm:$0xff] %v5397_v10  ;;  %v5417_v50 = vmul.f32 %v2583_v41, %v5381_v58  ;;  %v5421_v46 = vmul.f32 %v2584_v9, %v5381_v58  ;;  %v5435_v41 = vld [vmem:[%s2924_s21 + $0xda] sm:$0x3f]  ;;  %v2591_v2 = vld [vmem:[%s2924_s21 + $0x181] sm:$0xff] }
 0x149   : > { %7878 = vst [vmem:[#allocation13_spill] sm:$0xff] %v5405_v20  ;;  %7879 = vst [vmem:[#allocation107_spill] sm:$0xff] %v5409_v31  ;;  %v2585_v20 = vld [vmem:[%s2924_s21 + $0x151] sm:$0xff]  ;;  %v2586_v31 = vld [vmem:[%s2924_s21 + $0x159] sm:$0x3f]  ;;  %v1548_v56 = vmul.f32 %v2591_v2, %v5381_v58 }
 0x14a   : > { %7880 = vst [vmem:[#allocation166_spill] sm:$0xff] %v5413_v49  ;;  %7881 = vst [vmem:[#allocation114_spill] sm:$0xff] %v5417_v50  ;;  %v5425_v30 = vmul.f32 %v2585_v20, %v5381_v58  ;;  %v5429_v38 = vmul.f32 %v2586_v31, %v5381_v58  ;;  %v5432_v49 = vld [vmem:[%s2924_s21 + $0xd2] sm:$0xff]  ;;  %v2587_v50 = vld [vmem:[%s2924_s21 + $0x161] sm:$0xff] }
 0x14b   : > { %7882 = vst [vmem:[#allocation115_spill] sm:$0xff] %v5421_v46  ;;  %7885 = vst [vmem:[#allocation122_spill] sm:$0xff] %v5432_v49  ;;  %v5439_v9 = vmul.f32 %v2587_v50, %v5381_v58  ;;  %v2588_v46 = vld [vmem:[%s2924_s21 + $0x169] sm:$0x3f]  ;;  %v2590_v31 = vld [vmem:[%s2924_s21 + $0x179] sm:$0x3f] }
 0x14c   : > { %7883 = vst [vmem:[#allocation116_spill] sm:$0xff] %v5425_v30  ;;  %7884 = vst [vmem:[#allocation121_spill] sm:$0xff] %v5429_v38  ;;  %v5443_v20 = vmul.f32 %v2588_v46, %v5381_v58  ;;  %v2589_v30 = vld [vmem:[%s2924_s21 + $0x171] sm:$0xff]  ;;  %v1547_v38 = vmul.f32 %v2590_v31, %v5381_v58  ;;  %v2592_v10 = vld [vmem:[%s2924_s21 + $0x189] sm:$0x3f] }
 0x14d   : > { %7886 = vst [vmem:[#allocation123_spill] sm:$0xff] %v5435_v41  ;;  %7887 = vst [vmem:[#allocation127_spill] sm:$0xff] %v5439_v9  ;;  %v5447_v42 = vmul.f32 %v2589_v30, %v5381_v58  ;;  %v1549_v28 = vmul.f32 %v2592_v10, %v5381_v58  ;;  %v2593_v50 = vld [vmem:[%s2924_s21 + $0x191] sm:$0xff]  ;;  %v2594_v62 = vld [vmem:[%s2924_s21 + $0x199] sm:$0x3f] }
 0x14e   : > { %7888 = vst [vmem:[#allocation128_spill] sm:$0xff] %v5443_v20  ;;  %v1550_v9 = vmul.f32 %v2593_v50, %v5381_v58  ;;  %v1551_v46 = vmul.f32 %v2594_v62, %v5381_v58  ;;  %v2595_v20 = vld [vmem:[%s2924_s21 + $0x1a1] sm:$0xff]  ;;  %v7890_v23 = vld [vmem:[#allocation167_spill] sm:$0xff]  ;;  %v7891_v24 = vld [vmem:[#allocation168_spill] sm:$0xff]  ;;  %v1298_v62 = vmul.f32 %v7846_v17, %v5432_v49 }
 0x14f   : > { %7889 = vst [vmem:[#allocation7_spill] sm:$0xff] %v5447_v42  ;;  %v1552_v30 = vmul.f32 %v2595_v20, %v5381_v58  ;;  %v2596_v42 = vld [vmem:[%s2924_s21 + $0x1a9] sm:$0x3f]  ;;  %v1554_v2 = vmul.f32 %v5381_v58, %v7890_v23  ;;  %v1555_v10 = vmul.f32 %v5381_v58, %v7891_v24  ;;  %v7892_v36 = vld [vmem:[#allocation37_spill] sm:$0xff]  ;;  %v1299_v20 = vmul.f32 %v7846_v17, %v5435_v41  ;;  %v7894_v0 = vld [vmem:[#allocation39_spill] sm:$0xff] }
 0x150   : > { %v1553_v31 = vmul.f32 %v2596_v42, %v5381_v58  ;;  %v1296_v50 = vmul.f32 %v7846_v17, %v7892_v36  ;;  %v7893_v16 = vld [vmem:[#allocation38_spill] sm:$0xff]  ;;  %v1300_v42 = vmul.f32 %v7846_v17, %v7894_v0  ;;  %v7895_v5 = vld [vmem:[#allocation40_spill] sm:$0xff]  ;;  %v7896_v26 = vld [vmem:[#allocation41_spill] sm:$0xff]  ;;  %v5493_v41 = vadd.f32 %v5298_v61, %v5101_v51 }
 0x151   : > { %v1297_v27 = vmul.f32 %v7846_v17, %v7893_v16  ;;  %v1301_v23 = vmul.f32 %v7846_v17, %v7895_v5  ;;  %v1302_v24 = vmul.f32 %v7846_v17, %v7896_v26  ;;  %v5482_v58 = vld [vmem:[%s2924_s21 + $0xfa] sm:$0x3f]  ;;  %v5487_v16 = vld [vmem:[%s2924_s21 + $0x102] sm:$0xff]  ;;  %v5497_v5 = vadd.f32 %v5302_v63, %v5105_v3 }
 0x152   : > { %7897 = vst [vmem:[#allocation9_spill] sm:$0xff] %v5482_v58  ;;  %v1303_v36 = vmul.f32 %v5482_v58, %v7846_v17  ;;  %7898 = vst [vmem:[#allocation10_spill] sm:$0xff] %v5487_v16  ;;  %v1304_v49 = vmul.f32 %v5487_v16, %v7846_v17  ;;  %v5501_v0 = vadd.f32 %v5306_v8, %v5109_v35  ;;  %v7910_v61 = vld [vmem:[#allocation85_spill] sm:$0xff]  ;;  %v7916_v17 = vld [vmem:[#allocation35_spill] sm:$0xff] }
 0x153   : > { %v5505_v26 = vadd.f32 %v5310_v44, %v5113_v7  ;;  %v5509_v58 = vadd.f32 %v5314_v6, %v5117_v18  ;;  %v5513_v51 = vadd.f32 %v5318_v33, %v5121_v57  ;;  %v5517_v3 = vadd.f32 %v5322_v45, %v5125_v4  ;;  %v7919_v63 = vld [vmem:[#allocation8_spill] sm:$0xff]  ;;  %v7922_v8 = vld [vmem:[#allocation89_spill] sm:$0xff]  ;;  %v7926_v6 = vld [vmem:[#allocation74_spill] sm:$0xff] }
 0x154   : > { %v5521_v35 = vadd.f32 %v5326_v59, %v5129_v21  ;;  %v5525_v7 = vadd.f32 %v5330_v1, %v5133_v11  ;;  %v5529_v18 = vadd.f32 %v5334_v22, %v5137_v15  ;;  %v5533_v57 = vadd.f32 %v5338_v60, %v5141_v14  ;;  %v7925_v44 = vld [vmem:[#allocation12_spill] sm:$0xff]  ;;  %v7927_v33 = vld [vmem:[#allocation90_spill] sm:$0xff]  ;;  %v7928_v59 = vld [vmem:[#allocation117_spill] sm:$0xff] }
 0x155   : > { %v5537_v4 = vadd.f32 %v5342_v37, %v5145_v39  ;;  %v5541_v21 = vadd.f32 %v5346_v53, %v5149_v32  ;;  %v5545_v11 = vadd.f32 %v5350_v48, %v5153_v47  ;;  %v5549_v15 = vadd.f32 %v5354_v12, %v5157_v19  ;;  %v7912_v12 = vld [vmem:[#allocation139_spill] sm:$0xff]  ;;  %v7913_v48 = vld [vmem:[#allocation36_spill] sm:$0xff]  ;;  %v7929_v1 = vld [vmem:[#allocation13_spill] sm:$0xff] }
 0x156   : > { %7899 = vst [vmem:[#allocation11_spill] sm:$0xff] %v5525_v7  ;;  %7900 = vst [vmem:[#allocation16_spill] sm:$0xff] %v5529_v18  ;;  %v5553_v14 = vadd.f32 %v5358_v13, %v5161_v34  ;;  %v5557_v39 = vadd.f32 %v5362_v52, %v5165_v40  ;;  %v5561_v32 = vadd.f32 %v5366_v43, %v5169_v54  ;;  %v7915_v13 = vld [vmem:[#allocation19_spill] sm:$0xff]  ;;  %v7918_v52 = vld [vmem:[#allocation145_spill] sm:$0xff] }
 0x157   : > { %7901 = vst [vmem:[#allocation17_spill] sm:$0xff] %v5533_v57  ;;  %7902 = vst [vmem:[#allocation18_spill] sm:$0xff] %v5537_v4  ;;  %v5565_v47 = vadd.f32 %v5370_v29, %v5173_v55  ;;  %v5569_v19 = vadd.f32 %v7910_v61, %v5177_v25  ;;  %v5573_v34 = vadd.f32 %v7913_v48, %v7912_v12  ;;  %v7921_v43 = vld [vmem:[#allocation28_spill] sm:$0xff]  ;;  %v7924_v29 = vld [vmem:[#allocation97_spill] sm:$0xff] }
 0x158   : > { %7903 = vst [vmem:[#allocation23_spill] sm:$0xff] %v5541_v21  ;;  %7904 = vst [vmem:[#allocation137_spill] sm:$0xff] %v5545_v11  ;;  %v5577_v40 = vadd.f32 %v7916_v17, %v7915_v13  ;;  %v5581_v54 = vadd.f32 %v7919_v63, %v7918_v52  ;;  %v5585_v55 = vadd.f32 %v7922_v8, %v7921_v43  ;;  %v7930_v60 = vld [vmem:[#allocation150_spill] sm:$0xff]  ;;  %v7931_v37 = vld [vmem:[#allocation107_spill] sm:$0xff] }
 0x159   : > { %7905 = vst [vmem:[#allocation138_spill] sm:$0xff] %v5549_v15  ;;  %7906 = vst [vmem:[#allocation142_spill] sm:$0xff] %v5553_v14  ;;  %v5589_v25 = vadd.f32 %v7925_v44, %v7924_v29  ;;  %v5593_v45 = vadd.f32 %v7927_v33, %v7926_v6  ;;  %v5597_v22 = vadd.f32 %v7929_v1, %v7928_v59  ;;  %v7932_v61 = vld [vmem:[#allocation118_spill] sm:$0xff]  ;;  %v7934_v13 = vld [vmem:[#allocation99_spill] sm:$0xff] }
 0x15a   : > { %7907 = vst [vmem:[#allocation143_spill] sm:$0xff] %v5557_v39  ;;  %7908 = vst [vmem:[#allocation144_spill] sm:$0xff] %v5561_v32  ;;  %v5601_v53 = vadd.f32 %v7931_v37, %v7930_v60  ;;  %v7933_v12 = vld [vmem:[#allocation166_spill] sm:$0xff]  ;;  %v7936_v63 = vld [vmem:[#allocation125_spill] sm:$0xff] }
 0x15b   : > { %7909 = vst [vmem:[#allocation146_spill] sm:$0xff] %v5565_v47  ;;  %7911 = vst [vmem:[#allocation147_spill] sm:$0xff] %v5569_v19  ;;  %v5605_v48 = vadd.f32 %v7933_v12, %v7932_v61  ;;  %v7935_v17 = vld [vmem:[#allocation114_spill] sm:$0xff]  ;;  %v7937_v43 = vld [vmem:[#allocation115_spill] sm:$0xff] }
 0x15c   : > { %7914 = vst [vmem:[#allocation5_spill] sm:$0xff] %v5573_v34  ;;  %7917 = vst [vmem:[#allocation6_spill] sm:$0xff] %v5577_v40  ;;  %v5609_v52 = vadd.f32 %v7935_v17, %v7934_v13  ;;  %v5613_v8 = vadd.f32 %v7937_v43, %v7936_v63  ;;  %v7938_v29 = vld [vmem:[#allocation22_spill] sm:$0xff]  ;;  %v7939_v44 = vld [vmem:[#allocation116_spill] sm:$0xff] }
 0x15d   : > { %7920 = vst [vmem:[#allocation148_spill] sm:$0xff] %v5581_v54  ;;  %7923 = vst [vmem:[#allocation149_spill] sm:$0xff] %v5585_v55  ;;  %v5617_v6 = vadd.f32 %v7939_v44, %v7938_v29  ;;  %v7940_v33 = vld [vmem:[#allocation162_spill] sm:$0xff]  ;;  %v7941_v59 = vld [vmem:[#allocation121_spill] sm:$0xff] }
 0x15e   : > { %v5621_v1 = vadd.f32 %v7941_v59, %v7940_v33  ;;  %v7942_v60 = vld [vmem:[#allocation34_spill] sm:$0xff]  ;;  %v7943_v37 = vld [vmem:[#allocation127_spill] sm:$0xff]  ;;  %v7944_v12 = vld [vmem:[#allocation112_spill] sm:$0xff] }
 0x15f   : > { %v5625_v61 = vadd.f32 %v7943_v37, %v7942_v60  ;;  %v7945_v16 = vld [vmem:[#allocation128_spill] sm:$0xff]  ;;  %v7946_v17 = vld [vmem:[#allocation75_spill] sm:$0xff]  ;;  %v7950_v33 = vld [vmem:[#allocation25_spill] sm:$0xff] }
 0x160   : > { %v5629_v13 = vadd.f32 %v7945_v16, %v7944_v12  ;;  %v7947_v55 = vld [vmem:[#allocation7_spill] sm:$0xff]  ;;  %v7948_v43 = vld [vmem:[#allocation24_spill] sm:$0xff]  ;;  %v5642_v59 = vadd.f32 %v1549_v28, %v7950_v33  ;;  %v7951_v40 = vld [vmem:[#allocation154_spill] sm:$0xff] }
 0x161   : > { %v5633_v63 = vadd.f32 %v7947_v55, %v7946_v17  ;;  %v5636_v54 = vadd.f32 %v1547_v38, %v7948_v43  ;;  %v7949_v29 = vld [vmem:[#allocation76_spill] sm:$0xff]  ;;  %v5645_v60 = vadd.f32 %v1550_v9, %v7951_v40  ;;  %v7952_v37 = vld [vmem:[#allocation26_spill] sm:$0xff]  ;;  %v7953_v12 = vld [vmem:[#allocation155_spill] sm:$0xff] }
 0x162   : > { %v5639_v44 = vadd.f32 %v1548_v56, %v7949_v29  ;;  %v5648_v16 = vadd.f32 %v1551_v46, %v7952_v37  ;;  %v5651_v55 = vadd.f32 %v1552_v30, %v7953_v12  ;;  %v7955_v17 = vld [vmem:[#allocation27_spill] sm:$0xff]  ;;  %v7957_v43 = vld [vmem:[#allocation157_spill] sm:$0xff]  ;;  %v7961_v33 = vld [vmem:[#allocation156_spill] sm:$0xff] }
 0x163   : > { %v5654_v38 = vadd.f32 %v1553_v31, %v7955_v17  ;;  %v5657_v56 = vadd.f32 %v1296_v50, %v7957_v43  ;;  %v7959_v28 = vld [vmem:[#allocation29_spill] sm:$0xff]  ;;  %v5663_v9 = vadd.f32 %v1554_v2, %v7961_v33  ;;  %v7963_v46 = vld [vmem:[#allocation158_spill] sm:$0xff]  ;;  %v7967_v31 = vld [vmem:[#allocation159_spill] sm:$0xff] }
 0x164   : > { %7954 = vst [vmem:[#allocation151_spill] sm:$0xff] %v5651_v55  ;;  %v5660_v29 = vadd.f32 %v1297_v27, %v7959_v28  ;;  %v5666_v40 = vadd.f32 %v1555_v10, %v7963_v46  ;;  %v7965_v37 = vld [vmem:[#allocation30_spill] sm:$0xff]  ;;  %v5672_v12 = vadd.f32 %v1299_v20, %v7967_v31  ;;  %v7969_v17 = vld [vmem:[#allocation31_spill] sm:$0xff]  ;;  %v7971_v27 = vld [vmem:[#allocation160_spill] sm:$0xff] }
 0x165   : > { %7956 = vst [vmem:[#allocation152_spill] sm:$0xff] %v5654_v38  ;;  %7958 = vst [vmem:[#allocation153_spill] sm:$0xff] %v5657_v56  ;;  %v5669_v30 = vadd.f32 %v1298_v62, %v7965_v37  ;;  %v5675_v50 = vadd.f32 %v1300_v42, %v7969_v17  ;;  %v5678_v43 = vadd.f32 %v1301_v23, %v7971_v27  ;;  %v7973_v28 = vld [vmem:[#allocation32_spill] sm:$0xff]  ;;  %v7975_v10 = vld [vmem:[#allocation161_spill] sm:$0xff] }
 0x166   : > { %7960 = vst [vmem:[#allocation69_spill] sm:$0xff] %v5660_v29  ;;  %7962 = vst [vmem:[#allocation70_spill] sm:$0xff] %v5663_v9  ;;  %v5681_v2 = vadd.f32 %v1302_v24, %v7973_v28  ;;  %v5684_v33 = vadd.f32 %v1303_v36, %v7975_v10  ;;  %v7977_v46 = vld [vmem:[#allocation33_spill] sm:$0xff]  ;;  %v2599_v20 = vld [vmem:[%s2924_s21 + $0x10] sm:$0xff] }
 0x167   : > { %7964 = vst [vmem:[#allocation71_spill] sm:$0xff] %v5666_v40  ;;  %7966 = vst [vmem:[#allocation72_spill] sm:$0xff] %v5669_v30  ;;  %v5687_v62 = vadd.f32 %v1304_v49, %v7977_v46  ;;  %v7979_v37 = vld [vmem:[#allocation64_spill] sm:$0xff]  ;;  %v2601_v17 = vld [vmem:[%s2924_s21 + $0x20] sm:$0xff] }
 0x168   : > { %7968 = vst [vmem:[#allocation73_spill] sm:$0xff] %v5672_v12  ;;  %7970 = vst [vmem:[#allocation77_spill] sm:$0xff] %v5675_v50  ;;  %v1389_v31 = vmul.f32 %v2599_v20, %v7979_v37  ;;  %v2600_v42 = vld [vmem:[%s2924_s21 + $0x18] sm:$0x3f]  ;;  %v5697_v24 = vmul.f32 %v2601_v17, %v7979_v37  ;;  %v2602_v36 = vld [vmem:[%s2924_s21 + $0x28] sm:$0x3f] }
 0x169   : > { %7972 = vst [vmem:[#allocation78_spill] sm:$0xff] %v5678_v43  ;;  %7974 = vst [vmem:[#allocation65_spill] sm:$0xff] %v5681_v2  ;;  %v5693_v23 = vmul.f32 %v2600_v42, %v7979_v37  ;;  %v5701_v27 = vmul.f32 %v2602_v36, %v7979_v37  ;;  %v2603_v49 = vld [vmem:[%s2924_s21 + $0x30] sm:$0xff]  ;;  %v2604_v10 = vld [vmem:[%s2924_s21 + $0x38] sm:$0x3f] }
 0x16a   : > { %7976 = vst [vmem:[#allocation80_spill] sm:$0xff] %v5684_v33  ;;  %7978 = vst [vmem:[#allocation66_spill] sm:$0xff] %v5687_v62  ;;  %v5705_v28 = vmul.f32 %v2603_v49, %v7979_v37  ;;  %v5709_v46 = vmul.f32 %v2604_v10, %v7979_v37  ;;  %v2605_v20 = vld [vmem:[%s2924_s21 + $0x40] sm:$0xff]  ;;  %v2606_v17 = vld [vmem:[%s2924_s21 + $0x48] sm:$0x3f] }
 0x16b   : > { %v5713_v42 = vmul.f32 %v2605_v20, %v7979_v37  ;;  %v5717_v36 = vmul.f32 %v2606_v17, %v7979_v37  ;;  %v2607_v62 = vld [vmem:[%s2924_s21 + $0x50] sm:$0xff]  ;;  %v2608_v33 = vld [vmem:[%s2924_s21 + $0x58] sm:$0x3f]  ;;  %v2609_v2 = vld [vmem:[%s2924_s21 + $0x60] sm:$0xff] }
 0x16c   : > { %v5721_v49 = vmul.f32 %v2607_v62, %v7979_v37  ;;  %v5725_v10 = vmul.f32 %v2608_v33, %v7979_v37  ;;  %v5729_v20 = vmul.f32 %v2609_v2, %v7979_v37  ;;  %v2610_v43 = vld [vmem:[%s2924_s21 + $0x68] sm:$0x3f]  ;;  %v2611_v50 = vld [vmem:[%s2924_s21 + $0x70] sm:$0xff]  ;;  %v2612_v12 = vld [vmem:[%s2924_s21 + $0x78] sm:$0x3f] }
 0x16d   : > { %v5733_v17 = vmul.f32 %v2610_v43, %v7979_v37  ;;  %v5737_v62 = vmul.f32 %v2611_v50, %v7979_v37  ;;  %v5741_v33 = vmul.f32 %v2612_v12, %v7979_v37  ;;  %v2613_v30 = vld [vmem:[%s2924_s21 + $0x80] sm:$0xff]  ;;  %v2614_v29 = vld [vmem:[%s2924_s21 + $0x88] sm:$0x3f]  ;;  %v2615_v56 = vld [vmem:[%s2924_s21 + $0x90] sm:$0xff] }
 0x16e   : > { %7980 = vst [vmem:[#allocation81_spill] sm:$0xff] %v5721_v49  ;;  %7981 = vst [vmem:[#allocation105_spill] sm:$0xff] %v5725_v10  ;;  %v5745_v2 = vmul.f32 %v2613_v30, %v7979_v37  ;;  %v5749_v43 = vmul.f32 %v2614_v29, %v7979_v37  ;;  %v5753_v34 = vmul.f32 %v2615_v56, %v7979_v37  ;;  %v2616_v50 = vld [vmem:[%s2924_s21 + $0x98] sm:$0x3f]  ;;  %v2617_v19 = vld [vmem:[%s2924_s21 + $0xa0] sm:$0xff] }
 0x16f   : > { %7982 = vst [vmem:[#allocation82_spill] sm:$0xff] %v5729_v20  ;;  %7983 = vst [vmem:[#allocation106_spill] sm:$0xff] %v5733_v17  ;;  %v5757_v12 = vmul.f32 %v2616_v50, %v7979_v37  ;;  %v5761_v30 = vmul.f32 %v2617_v19, %v7979_v37  ;;  %v2618_v47 = vld [vmem:[%s2924_s21 + $0xa8] sm:$0x3f]  ;;  %v2619_v32 = vld [vmem:[%s2924_s21 + $0xb0] sm:$0xff] }
 0x170   : > { %7984 = vst [vmem:[#allocation83_spill] sm:$0xff] %v5737_v62  ;;  %7985 = vst [vmem:[#allocation109_spill] sm:$0xff] %v5741_v33  ;;  %v5765_v29 = vmul.f32 %v2618_v47, %v7979_v37  ;;  %v5769_v56 = vmul.f32 %v2619_v32, %v7979_v37  ;;  %v5787_v32 = vld [vmem:[%s2927_s17 + $0x8] ss:$0 sm:$0xff]  ;;  %v2633_v33 = vld [vmem:[%s2924_s21 + $0x16a] sm:$0x3f] }
 0x171   : > { %7986 = vst [vmem:[#allocation84_spill] sm:$0xff] %v5745_v2  ;;  %7987 = vst [vmem:[#allocation110_spill] sm:$0xff] %v5749_v43  ;;  %v2628_v39 = vld [vmem:[%s2924_s21 + $0x142] sm:$0xff]  ;;  %v2629_v43 = vld [vmem:[%s2924_s21 + $0x14a] sm:$0x3f] }
 0x172   : > { %7988 = vst [vmem:[#allocation86_spill] sm:$0xff] %v5753_v34  ;;  %7989 = vst [vmem:[#allocation111_spill] sm:$0xff] %v5757_v12  ;;  %v2620_v34 = vld [vmem:[%s2924_s21 + $0xb8] sm:$0x3f]  ;;  %v2621_v12 = vld [vmem:[%s2924_s21 + $0xc0] sm:$0xff] }
 0x173   : > { %7990 = vst [vmem:[#allocation87_spill] sm:$0xff] %v5761_v30  ;;  %7991 = vst [vmem:[#allocation42_spill] sm:$0xff] %v5765_v29  ;;  %v5773_v50 = vmul.f32 %v2620_v34, %v7979_v37  ;;  %v5777_v19 = vmul.f32 %v2621_v12, %v7979_v37  ;;  %v2622_v30 = vld [vmem:[%s2924_s21 + $0xc8] sm:$0x3f]  ;;  %v5784_v29 = vadd.f32 %v1389_v31, %v5493_v41  ;;  %v2626_v41 = vld [vmem:[%s2924_s21 + $0x132] sm:$0xff] }
 0x174   : > { %7992 = vst [vmem:[#allocation88_spill] sm:$0xff] %v5769_v56  ;;  %v5781_v47 = vmul.f32 %v2622_v30, %v7979_v37  ;;  %v2623_v56 = vld [vmem:[%s2924_s21 + $0x11a] sm:$0x3f]  ;;  %v5803_v31 = vmul.f32 %v2626_v41, %v5787_v32  ;;  %v2630_v14 = vld [vmem:[%s2924_s21 + $0x152] sm:$0xff]  ;;  %v2632_v15 = vld [vmem:[%s2924_s21 + $0x162] sm:$0xff] }
 0x175   : > { %7993 = vst [vmem:[#allocation91_spill] sm:$0xff] %v5773_v50  ;;  %7994 = vst [vmem:[#allocation93_spill] sm:$0xff] %v5777_v19  ;;  %v5791_v34 = vmul.f32 %v2623_v56, %v5787_v32  ;;  %v2624_v50 = vld [vmem:[%s2924_s21 + $0x122] sm:$0xff]  ;;  %v2625_v19 = vld [vmem:[%s2924_s21 + $0x12a] sm:$0x3f]  ;;  %v5819_v41 = vmul.f32 %v2630_v14, %v5787_v32 }
 0x176   : > { %7995 = vst [vmem:[#allocation43_spill] sm:$0xff] %v5781_v47  ;;  %v5795_v12 = vmul.f32 %v2624_v50, %v5787_v32  ;;  %v5799_v30 = vmul.f32 %v2625_v19, %v5787_v32  ;;  %v2627_v47 = vld [vmem:[%s2924_s21 + $0x13a] sm:$0x3f]  ;;  %v5811_v50 = vmul.f32 %v2628_v39, %v5787_v32  ;;  %v5815_v19 = vmul.f32 %v2629_v43, %v5787_v32  ;;  %v2634_v11 = vld [vmem:[%s2924_s21 + $0x172] sm:$0xff]  ;;  %v2641_v18 = vld [vmem:[%s2924_s21 + $0x1aa] sm:$0x3f] }
 0x177   : > { %v5807_v56 = vmul.f32 %v2627_v47, %v5787_v32  ;;  %v2631_v2 = vld [vmem:[%s2924_s21 + $0x15a] sm:$0x3f]  ;;  %v5827_v39 = vmul.f32 %v2632_v15, %v5787_v32  ;;  %v5831_v43 = vmul.f32 %v2633_v33, %v5787_v32  ;;  %v5835_v62 = vmul.f32 %v2634_v11, %v5787_v32  ;;  %v2637_v15 = vld [vmem:[%s2924_s21 + $0x18a] sm:$0x3f]  ;;  %v2638_v33 = vld [vmem:[%s2924_s21 + $0x192] sm:$0xff] }
 0x178   : > { %v5823_v47 = vmul.f32 %v2631_v2, %v5787_v32  ;;  %v2635_v14 = vld [vmem:[%s2924_s21 + $0x17a] sm:$0x3f]  ;;  %v2636_v2 = vld [vmem:[%s2924_s21 + $0x182] sm:$0xff]  ;;  %v5847_v4 = vmul.f32 %v2637_v15, %v5787_v32  ;;  %v5851_v20 = vmul.f32 %v2638_v33, %v5787_v32  ;;  %v1443_v33 = vadd.f32 %v5693_v23, %v5497_v5  ;;  %v2642_v7 = vld [vmem:[%s2924_s21 + $0x11] sm:$0xff] }
 0x179   : > { %v5839_v21 = vmul.f32 %v2635_v14, %v5787_v32  ;;  %v5843_v17 = vmul.f32 %v2636_v2, %v5787_v32  ;;  %v2639_v11 = vld [vmem:[%s2924_s21 + $0x19a] sm:$0x3f]  ;;  %v2640_v14 = vld [vmem:[%s2924_s21 + $0x1a2] sm:$0xff]  ;;  %v5863_v2 = vmul.f32 %v2641_v18, %v5787_v32  ;;  %v5888_v5 = vmul.f32 0.0, %v7979_v37 }
 0x17a   : > { %v5855_v57 = vmul.f32 %v2639_v11, %v5787_v32  ;;  %v5859_v10 = vmul.f32 %v2640_v14, %v5787_v32  ;;  %v7998_v15 = vld [vmem:[#allocation129_spill] sm:$0xff]  ;;  %v8000_v11 = vld [vmem:[#allocation163_spill] sm:$0xff]  ;;  %v2643_v9 = vld [vmem:[%s2924_s21 + $0x19] sm:$0x3f]  ;;  %v1445_v23 = vadd.f32 %v5701_v27, %v5505_v26 }
 0x17b   : > { %7997 = vst [vmem:[#allocation14_spill] sm:$0xff] %v5863_v2  ;;  %v5867_v49 = vmul.f32 %v5787_v32, %v7998_v15  ;;  %v1503_v40 = vmul.f32 %v2642_v7, %v8000_v11  ;;  %v1504_v14 = vmul.f32 %v2643_v9, %v8000_v11  ;;  %v8001_v38 = vld [vmem:[#allocation130_spill] sm:$0xff]  ;;  %v8005_v15 = vld [vmem:[#allocation67_spill] sm:$0xff]  ;;  %8007 = vst [vmem:[#allocation101_spill] sm:$0xff] %v5888_v5 }
 0x17c   : > { %7996 = vst [vmem:[#allocation94_spill] sm:$0xff] %v5859_v10  ;;  %v5877_v10 = vmul.f32 %v5787_v32, %v8001_v38  ;;  %v8003_v18 = vld [vmem:[#allocation134_spill] sm:$0xff]  ;;  %v2644_v7 = vld [vmem:[%s2924_s21 + $0xf0] sm:$0xff]  ;;  %v1444_v38 = vadd.f32 %v5697_v24, %v5501_v0  ;;  %v1447_v0 = vadd.f32 %v5709_v46, %v5513_v51  ;;  %v2647_v26 = vld [vmem:[%s2924_s21 + $0x39] sm:$0x3f]  ;;  %v5923_v51 = vadd.f32 %v5713_v42, %v5517_v3 }
 0x17d   : > { %7999 = vst [vmem:[#allocation95_spill] sm:$0xff] %v5867_v49  ;;  %v5881_v2 = vmul.f32 %v7979_v37, %v8003_v18  ;;  %v5885_v49 = vmul.f32 %v7979_v37, %v8005_v15  ;;  %v5892_v9 = vmul.f32 %v2644_v7, %v7979_v37  ;;  %v2645_v18 = vld [vmem:[%s2924_s21 + $0x21] sm:$0xff]  ;;  %v2646_v15 = vld [vmem:[%s2924_s21 + $0x29] sm:$0x3f]  ;;  %v8009_v5 = vld [vmem:[#allocation135_spill] sm:$0xff]  ;;  %v1508_v24 = vmul.f32 %v2647_v26, %v8000_v11 }
 0x17e   : > { %8002 = vst [vmem:[#allocation108_spill] sm:$0xff] %v5877_v10  ;;  %v5904_v10 = vmul.f32 %v8009_v5, %v7979_v37  ;;  %v8011_v7 = vld [vmem:[#allocation68_spill] sm:$0xff]  ;;  %v1556_v27 = vadd.f32 %v1503_v40, %v5784_v29  ;;  %8013 = vst [vmem:[#allocation47_spill] sm:$0xff] %v5923_v51  ;;  %v1449_v40 = vadd.f32 %v5717_v36, %v5521_v35  ;;  %v2652_v26 = vld [vmem:[%s2924_s21 + $0x49] sm:$0x3f] }
 0x17f   : > { %8004 = vst [vmem:[#allocation100_spill] sm:$0xff] %v5881_v2  ;;  %8006 = vst [vmem:[#allocation104_spill] sm:$0xff] %v5885_v49  ;;  %v1505_v2 = vmul.f32 %v2645_v18, %v8000_v11  ;;  %v1506_v49 = vmul.f32 %v2646_v15, %v8000_v11  ;;  %v1557_v18 = vadd.f32 %v1504_v14, %v1443_v33  ;;  %v2648_v15 = vld [vmem:[%s2924_s21 + $0x12] sm:$0xff]  ;;  %v2651_v33 = vld [vmem:[%s2924_s21 + $0x41] sm:$0xff] }
 0x180   : > { %8008 = vst [vmem:[#allocation102_spill] sm:$0xff] %v5892_v9  ;;  %8010 = vst [vmem:[#allocation45_spill] sm:$0xff] %v5904_v10  ;;  %v5908_v9 = vmul.f32 %v8011_v7, %v7979_v37  ;;  %v1617_v5 = vmul.f32 %v2648_v15, %v5787_v32  ;;  %v2649_v10 = vld [vmem:[%s2924_s21 + $0x1a] sm:$0x3f]  ;;  %v1446_v7 = vadd.f32 %v5705_v28, %v5509_v58  ;;  %v2650_v46 = vld [vmem:[%s2924_s21 + $0x31] sm:$0xff] }
 0x181   : > { %v1618_v55 = vmul.f32 %v2649_v10, %v5787_v32  ;;  %v1507_v29 = vmul.f32 %v2650_v46, %v8000_v11  ;;  %v1509_v14 = vmul.f32 %v2651_v33, %v8000_v11  ;;  %v1510_v10 = vmul.f32 %v2652_v26, %v8000_v11  ;;  %v2653_v28 = vld [vmem:[%s2924_s21 + $0x22] sm:$0xff]  ;;  %v2654_v3 = vld [vmem:[%s2924_s21 + $0x2a] sm:$0x3f]  ;;  %v2655_v51 = vld [vmem:[%s2924_s21 + $0x3a] sm:$0x3f] }
 0x182   : > { %8012 = vst [vmem:[#allocation46_spill] sm:$0xff] %v5908_v9  ;;  %v1558_v15 = vadd.f32 %v1505_v2, %v1444_v38  ;;  %v1559_v9 = vadd.f32 %v1506_v49, %v1445_v23  ;;  %v1561_v58 = vadd.f32 %v1508_v24, %v1447_v0  ;;  %v1619_v37 = vmul.f32 %v2653_v28, %v5787_v32  ;;  %v8038_v23 = vld [vmem:[#allocation81_spill] sm:$0xff]  ;;  %v2661_v28 = vld [vmem:[%s2924_s21 + $0x4a] sm:$0x3f] }
 0x183   : > { %v1620_v42 = vmul.f32 %v2654_v3, %v5787_v32  ;;  %v1622_v35 = vmul.f32 %v2655_v51, %v5787_v32  ;;  %v5939_v36 = vadd.f32 %v1617_v5, %v1556_v27  ;;  %v5941_v46 = vadd.f32 %v1618_v55, %v1557_v18  ;;  %v8039_v27 = vld [vmem:[#allocation16_spill] sm:$0xff]  ;;  %v8040_v18 = vld [vmem:[#allocation105_spill] sm:$0xff] }
 0x184   : > { %v5945_v33 = vadd.f32 %v5791_v34, %v5589_v25  ;;  %v5949_v49 = vadd.f32 %v5795_v12, %v5593_v45  ;;  %v5953_v2 = vadd.f32 %v5799_v30, %v5597_v22  ;;  %v5957_v38 = vadd.f32 %v5803_v31, %v5601_v53  ;;  %v2656_v31 = vld [vmem:[%s2924_s21 + $0x32] sm:$0xff] }
 0x185   : > { %8014 = vst [vmem:[#allocation48_spill] sm:$0xff] %v5939_v36  ;;  %8015 = vst [vmem:[#allocation49_spill] sm:$0xff] %v5941_v46  ;;  %v5961_v55 = vadd.f32 %v5807_v56, %v5605_v48  ;;  %v5965_v25 = vadd.f32 %v5811_v50, %v5609_v52  ;;  %v5969_v45 = vadd.f32 %v5815_v19, %v5613_v8  ;;  %v2657_v19 = vld [vmem:[%s2924_s21 + $0x108] sm:$0x3f]  ;;  %v1727_v24 = vsel %vm1726_vm0, %v5941_v46, 0.0  ;;  %v2659_v5 = vld [vmem:[%s2924_s21 + $0x51] sm:$0xff] }
 0x186   : > { %v5973_v22 = vadd.f32 %v5819_v41, %v5617_v6  ;;  %v5977_v53 = vadd.f32 %v5823_v47, %v5621_v1  ;;  %v5981_v48 = vadd.f32 %v5827_v39, %v5625_v61  ;;  %v5985_v52 = vadd.f32 %v5831_v43, %v5629_v13  ;;  %v8036_v41 = vld [vmem:[#allocation64_spill] sm:$0xff]  ;;  %v2658_v39 = vld [vmem:[%s2924_s21 + $0x110] sm:$0xff] }
 0x187   : > { %v5989_v8 = vadd.f32 %v5835_v62, %v5633_v63  ;;  %v5993_v6 = vadd.f32 %v5839_v21, %v5636_v54  ;;  %v5997_v1 = vadd.f32 %v5843_v17, %v5639_v44  ;;  %v6001_v61 = vadd.f32 %v5847_v4, %v5642_v59  ;;  %v8022_v62 = vld [vmem:[#allocation151_spill] sm:$0xff]  ;;  %v8023_v21 = vld [vmem:[#allocation94_spill] sm:$0xff]  ;;  %v8026_v44 = vld [vmem:[#allocation152_spill] sm:$0xff] }
 0x188   : > { %8016 = vst [vmem:[#allocation50_spill] sm:$0xff] %v5977_v53  ;;  %v6005_v13 = vadd.f32 %v5851_v20, %v5645_v60  ;;  %v6009_v63 = vadd.f32 %v5855_v57, %v5648_v16  ;;  %v6013_v54 = vadd.f32 %v8023_v21, %v8022_v62  ;;  %v6015_v34 = vadd.f32 %v1620_v42, %v1559_v9  ;;  %v8027_v17 = vld [vmem:[#allocation14_spill] sm:$0xff]  ;;  %v8030_v59 = vld [vmem:[#allocation95_spill] sm:$0xff]  ;;  %v8033_v20 = vld [vmem:[#allocation108_spill] sm:$0xff] }
 0x189   : > { %8017 = vst [vmem:[#allocation79_spill] sm:$0xff] %v5989_v8  ;;  %8018 = vst [vmem:[#allocation52_spill] sm:$0xff] %v5997_v1  ;;  %v6019_v12 = vadd.f32 %v8027_v17, %v8026_v44  ;;  %v8029_v4 = vld [vmem:[#allocation70_spill] sm:$0xff]  ;;  %v8032_v60 = vld [vmem:[#allocation71_spill] sm:$0xff]  ;;  %v1560_v16 = vadd.f32 %v1507_v29, %v1446_v7  ;;  %v1621_v56 = vmul.f32 %v2656_v31, %v5787_v32 }
 0x18a   : > { %8019 = vst [vmem:[#allocation53_spill] sm:$0xff] %v6001_v61  ;;  %8020 = vst [vmem:[#allocation51_spill] sm:$0xff] %v6005_v13  ;;  %v6023_v30 = vadd.f32 %v8030_v59, %v8029_v4  ;;  %v6027_v57 = vadd.f32 %v8033_v20, %v8032_v60  ;;  %v6031_v50 = vadd.f32 %v1619_v37, %v1558_v15  ;;  %v8037_v9 = vld [vmem:[#allocation11_spill] sm:$0xff]  ;;  %v2660_v51 = vld [vmem:[%s2924_s21 + $0x59] sm:$0x3f]  ;;  %v1730_v62 = vsel %vm1726_vm0, %v6015_v34, 0.0 }
 0x18b   : > { %8021 = vst [vmem:[#allocation57_spill] sm:$0xff] %v6009_v63  ;;  %8024 = vst [vmem:[#allocation58_spill] sm:$0xff] %v6013_v54  ;;  %v6035_v47 = vmul.f32 %v2657_v19, %v8036_v41  ;;  %v6039_v43 = vmul.f32 %v2658_v39, %v8036_v41  ;;  %v1450_v0 = vadd.f32 %v8038_v23, %v8037_v9  ;;  %v8042_v21 = vld [vmem:[#allocation47_spill] sm:$0xff]  ;;  %v2662_v17 = vld [vmem:[%s2924_s21 + $0x42] sm:$0xff] }
 0x18c   : > { %8025 = vst [vmem:[#allocation59_spill] sm:$0xff] %v6015_v34  ;;  %8028 = vst [vmem:[#allocation60_spill] sm:$0xff] %v6019_v12  ;;  %v1451_v37 = vadd.f32 %v8040_v18, %v8039_v27  ;;  %v1511_v7 = vmul.f32 %v2659_v5, %v8000_v11  ;;  %v1512_v29 = vmul.f32 %v2660_v51, %v8000_v11  ;;  %v8046_v31 = vld [vmem:[#allocation18_spill] sm:$0xff]  ;;  %v8049_v41 = vld [vmem:[#allocation83_spill] sm:$0xff] }
 0x18d   : > { %8031 = vst [vmem:[#allocation61_spill] sm:$0xff] %v6023_v30  ;;  %8034 = vst [vmem:[#allocation62_spill] sm:$0xff] %v6027_v57  ;;  %v1728_v26 = vadd.f32 %v1727_v24, %v5939_v36  ;;  %v1563_v15 = vadd.f32 %v1510_v10, %v1449_v40  ;;  %v1624_v3 = vmul.f32 %v2661_v28, %v5787_v32  ;;  %v8044_v40 = vld [vmem:[#allocation17_spill] sm:$0xff]  ;;  %v8045_v10 = vld [vmem:[#allocation82_spill] sm:$0xff] }
 0x18e   : > { %8035 = vst [vmem:[#allocation63_spill] sm:$0xff] %v6031_v50  ;;  %v6054_v42 = vadd.f32 %v1622_v35, %v1561_v58  ;;  %v1562_v44 = vadd.f32 %v1509_v14, %v8042_v21  ;;  %v1623_v4 = vmul.f32 %v2662_v17, %v5787_v32  ;;  %v6061_v59 = vadd.f32 %v1621_v56, %v1560_v16  ;;  %v8047_v19 = vld [vmem:[#allocation106_spill] sm:$0xff]  ;;  %v8048_v35 = vld [vmem:[#allocation23_spill] sm:$0xff]  ;;  %v8050_v9 = vld [vmem:[#allocation137_spill] sm:$0xff] }
 0x18f   : > { %v1729_v60 = vadd.f32 %v1728_v26, %v6031_v50  ;;  %v1452_v20 = vadd.f32 %v8045_v10, %v8044_v40  ;;  %v1453_v58 = vadd.f32 %v8047_v19, %v8046_v31  ;;  %v1454_v39 = vadd.f32 %v8049_v41, %v8048_v35  ;;  %v8051_v14 = vld [vmem:[#allocation109_spill] sm:$0xff]  ;;  %v8052_v24 = vld [vmem:[#allocation138_spill] sm:$0xff]  ;;  %v8053_v27 = vld [vmem:[#allocation84_spill] sm:$0xff] }
 0x190   : > { %8041 = vst [vmem:[#allocation15_spill] sm:$0xff] %v6054_v42  ;;  %8043 = vst [vmem:[#allocation126_spill] sm:$0xff] %v6061_v59  ;;  %v1455_v23 = vadd.f32 %v8051_v14, %v8050_v9  ;;  %v6074_v18 = vadd.f32 %v8053_v27, %v8052_v24  ;;  %v2663_v16 = vld [vmem:[%s2924_s21 + $0x61] sm:$0xff]  ;;  %v2664_v5 = vld [vmem:[%s2924_s21 + $0x69] sm:$0x3f]  ;;  %v1565_v28 = vadd.f32 %v1512_v29, %v1451_v37  ;;  %v1733_v10 = vsel %vm1726_vm0, %v6054_v42, 0.0 }
 0x191   : > { %v1513_v56 = vmul.f32 %v2663_v16, %v8000_v11  ;;  %v1514_v51 = vmul.f32 %v2664_v5, %v8000_v11  ;;  %v1731_v26 = vadd.f32 %v1730_v62, %v1729_v60  ;;  %v2665_v21 = vld [vmem:[%s2924_s21 + $0x5a] sm:$0x3f]  ;;  %v6082_v40 = vadd.f32 %v1624_v3, %v1563_v15  ;;  %v2666_v19 = vld [vmem:[%s2924_s21 + $0x52] sm:$0xff]  ;;  %v8054_v60 = vld [vmem:[#allocation142_spill] sm:$0xff] }
 0x192   : > { %v1626_v17 = vmul.f32 %v2665_v21, %v5787_v32  ;;  %v1564_v31 = vadd.f32 %v1511_v7, %v1450_v0  ;;  %v1625_v35 = vmul.f32 %v2666_v19, %v5787_v32  ;;  %v6088_v41 = vadd.f32 %v1623_v4, %v1562_v44  ;;  %v8055_v37 = vld [vmem:[#allocation110_spill] sm:$0xff]  ;;  %v8056_v9 = vld [vmem:[#allocation143_spill] sm:$0xff]  ;;  %v8058_v3 = vld [vmem:[#allocation144_spill] sm:$0xff] }
 0x193   : > { %v1732_v62 = vadd.f32 %v1731_v26, %v6061_v59  ;;  %v1457_v29 = vadd.f32 %v8055_v37, %v8054_v60  ;;  %v8057_v14 = vld [vmem:[#allocation86_spill] sm:$0xff]  ;;  %v8059_v24 = vld [vmem:[#allocation111_spill] sm:$0xff]  ;;  %v2668_v19 = vld [vmem:[%s2924_s21 + $0x79] sm:$0x3f] }
 0x194   : > { %v6095_v15 = vadd.f32 %v8057_v14, %v8056_v9  ;;  %v6099_v27 = vadd.f32 %v8059_v24, %v8058_v3  ;;  %v8060_v0 = vld [vmem:[#allocation146_spill] sm:$0xff]  ;;  %v8061_v7 = vld [vmem:[#allocation87_spill] sm:$0xff]  ;;  %v1516_v60 = vmul.f32 %v2668_v19, %v8000_v11  ;;  %v1567_v9 = vadd.f32 %v1514_v51, %v1453_v58  ;;  %v8065_v58 = vld [vmem:[#allocation88_spill] sm:$0xff] }
 0x195   : > { %v6103_v16 = vadd.f32 %v8061_v7, %v8060_v0  ;;  %v8062_v44 = vld [vmem:[#allocation147_spill] sm:$0xff]  ;;  %v8063_v4 = vld [vmem:[#allocation42_spill] sm:$0xff]  ;;  %v1734_v37 = vadd.f32 %v1733_v10, %v1732_v62  ;;  %v6115_v24 = vadd.f32 %v1626_v17, %v1565_v28  ;;  %v1736_v0 = vsel %vm1726_vm0, %v6082_v40, 0.0  ;;  %v8064_v62 = vld [vmem:[#allocation5_spill] sm:$0xff] }
 0x196   : > { %v6107_v5 = vadd.f32 %v8063_v4, %v8062_v44  ;;  %v2667_v26 = vld [vmem:[%s2924_s21 + $0x71] sm:$0xff]  ;;  %v2669_v14 = vld [vmem:[%s2924_s21 + $0x6a] sm:$0x3f]  ;;  %v1566_v7 = vadd.f32 %v1513_v56, %v1452_v20  ;;  %v2670_v44 = vld [vmem:[%s2924_s21 + $0x62] sm:$0xff]  ;;  %v6126_v51 = vadd.f32 %v8065_v58, %v8064_v62 }
 0x197   : > { %v1515_v21 = vmul.f32 %v2667_v26, %v8000_v11  ;;  %v1628_v3 = vmul.f32 %v2669_v14, %v5787_v32  ;;  %v1627_v4 = vmul.f32 %v2670_v44, %v5787_v32  ;;  %v6121_v26 = vadd.f32 %v1625_v35, %v1564_v31  ;;  %v8066_v19 = vld [vmem:[#allocation6_spill] sm:$0xff]  ;;  %v8067_v14 = vld [vmem:[#allocation91_spill] sm:$0xff]  ;;  %v8068_v17 = vld [vmem:[#allocation148_spill] sm:$0xff] }
 0x198   : > { %v1735_v10 = vadd.f32 %v1734_v37, %v6088_v41  ;;  %v6130_v28 = vadd.f32 %v8067_v14, %v8066_v19  ;;  %v8069_v30 = vld [vmem:[#allocation93_spill] sm:$0xff]  ;;  %v8071_v57 = vld [vmem:[#allocation43_spill] sm:$0xff]  ;;  %v8073_v35 = vld [vmem:[#allocation100_spill] sm:$0xff]  ;;  %v1569_v14 = vadd.f32 %v1516_v60, %v1455_v23 }
 0x199   : > { %v6134_v20 = vadd.f32 %v8069_v30, %v8068_v17  ;;  %v8070_v56 = vld [vmem:[#allocation149_spill] sm:$0xff]  ;;  %v2672_v58 = vld [vmem:[%s2924_s21 + $0x89] sm:$0x3f]  ;;  %v2673_v30 = vld [vmem:[%s2924_s21 + $0x7a] sm:$0x3f]  ;;  %v6150_v13 = vadd.f32 %v1628_v3, %v1567_v9 }
 0x19a   : > { %v6138_v44 = vadd.f32 %v8071_v57, %v8070_v56  ;;  %v8072_v31 = vld [vmem:[#allocation153_spill] sm:$0xff]  ;;  %v1518_v12 = vmul.f32 %v2672_v58, %v8000_v11  ;;  %v1737_v19 = vadd.f32 %v1736_v0, %v1735_v10  ;;  %v1630_v17 = vmul.f32 %v2673_v30, %v5787_v32  ;;  %v8075_v23 = vld [vmem:[#allocation104_spill] sm:$0xff]  ;;  %v8080_v63 = vld [vmem:[#allocation102_spill] sm:$0xff] }
 0x19b   : > { %v6142_v37 = vadd.f32 %v8073_v35, %v8072_v31  ;;  %v2671_v54 = vld [vmem:[%s2924_s21 + $0x81] sm:$0xff]  ;;  %v1739_v57 = vsel %vm1726_vm0, %v6115_v24, 0.0  ;;  %v1568_v56 = vadd.f32 %v1515_v21, %v1454_v39  ;;  %v2674_v31 = vld [vmem:[%s2924_s21 + $0x72] sm:$0xff]  ;;  %v6156_v35 = vadd.f32 %v1627_v4, %v1566_v7  ;;  %v2677_v61 = vld [vmem:[%s2924_s21 + $0x8a] sm:$0x3f] }
 0x19c   : > { %v1517_v62 = vmul.f32 %v2671_v54, %v8000_v11  ;;  %v1629_v54 = vmul.f32 %v2674_v31, %v5787_v32  ;;  %v1738_v58 = vadd.f32 %v1737_v19, %v6121_v26  ;;  %v8074_v0 = vld [vmem:[#allocation69_spill] sm:$0xff]  ;;  %v8076_v10 = vld [vmem:[#allocation72_spill] sm:$0xff]  ;;  %v1571_v1 = vadd.f32 %v1518_v12, %v1457_v29  ;;  %v8082_v12 = vld [vmem:[#allocation78_spill] sm:$0xff] }
 0x19d   : > { %v6161_v60 = vadd.f32 %v8075_v23, %v8074_v0  ;;  %v8077_v9 = vld [vmem:[#allocation101_spill] sm:$0xff]  ;;  %v2675_v7 = vld [vmem:[%s2924_s21 + $0x91] sm:$0xff]  ;;  %v2676_v19 = vld [vmem:[%s2924_s21 + $0x99] sm:$0x3f] }
 0x19e   : > { %v6165_v3 = vadd.f32 %v8077_v9, %v8076_v10  ;;  %v8078_v30 = vld [vmem:[#allocation73_spill] sm:$0xff]  ;;  %v1519_v4 = vmul.f32 %v2675_v7, %v8000_v11  ;;  %v1520_v0 = vmul.f32 %v2676_v19, %v8000_v11  ;;  %v1570_v23 = vadd.f32 %v1517_v62, %v6074_v18 }
 0x19f   : > { %v6169_v39 = vadd.f32 %v8077_v9, %v8078_v30  ;;  %v8079_v21 = vld [vmem:[#allocation77_spill] sm:$0xff]  ;;  %v1740_v10 = vadd.f32 %v1739_v57, %v1738_v58  ;;  %v1632_v30 = vmul.f32 %v2677_v61, %v5787_v32  ;;  %v6182_v9 = vadd.f32 %v1630_v17, %v1569_v14  ;;  %v2680_v17 = vld [vmem:[%s2924_s21 + $0xa9] sm:$0x3f] }
 0x1a0   : > { %v6173_v31 = vadd.f32 %v8080_v63, %v8079_v21  ;;  %v1742_v63 = vsel %vm1726_vm0, %v6150_v13, 0.0  ;;  %v2678_v21 = vld [vmem:[%s2924_s21 + $0x82] sm:$0xff]  ;;  %v6188_v8 = vadd.f32 %v1629_v54, %v1568_v56  ;;  %v1817_v18 = vmul.f32 %v5941_v46, %v5941_v46 }
 0x1a1   : > { %8081 = vst [vmem:[#allocation96_spill] sm:$0xff] %v6182_v9  ;;  %v1631_v7 = vmul.f32 %v2678_v21, %v5787_v32  ;;  %v1741_v19 = vadd.f32 %v1740_v10, %v6156_v35  ;;  %v8083_v29 = vld [vmem:[#allocation45_spill] sm:$0xff]  ;;  %v1522_v57 = vmul.f32 %v2680_v17, %v8000_v11  ;;  %v1816_v56 = vmul.f32 %v5939_v36, %v5939_v36  ;;  %v2685_v36 = vld [vmem:[%s2924_s21 + $0xaa] sm:$0x3f] }
 0x1a2   : > { %v6195_v61 = vadd.f32 %v8083_v29, %v8082_v12  ;;  %v2679_v62 = vld [vmem:[%s2924_s21 + $0xa1] sm:$0xff]  ;;  %v1572_v54 = vadd.f32 %v1519_v4, %v6095_v15  ;;  %v1573_v58 = vadd.f32 %v1520_v0, %v6099_v27  ;;  %v1819_v21 = vmul.f32 %v6015_v34, %v6015_v34  ;;  %v2681_v12 = vld [vmem:[%s2924_s21 + $0x9a] sm:$0x3f]  ;;  %v2682_v15 = vld [vmem:[%s2924_s21 + $0x92] sm:$0xff] }
 0x1a3   : > { %v1521_v14 = vmul.f32 %v2679_v62, %v8000_v11  ;;  %v1743_v10 = vadd.f32 %v1742_v63, %v1741_v19  ;;  %v1634_v29 = vmul.f32 %v2681_v12, %v5787_v32  ;;  %v6209_v62 = vadd.f32 %v1632_v30, %v1571_v1  ;;  %v2683_v19 = vld [vmem:[%s2924_s21 + $0xb1] sm:$0xff]  ;;  %v2684_v30 = vld [vmem:[%s2924_s21 + $0xb9] sm:$0x3f] }
 0x1a4   : > { %v1745_v17 = vsel %vm1726_vm0, %v6182_v9, 0.0  ;;  %v1818_v46 = vmul.f32 %v6031_v50, %v6031_v50  ;;  %v1633_v4 = vmul.f32 %v2682_v15, %v5787_v32  ;;  %v6217_v27 = vadd.f32 %v1631_v7, %v1570_v23 }
 0x1a5   : > { %8084 = vst [vmem:[#allocation20_spill] sm:$0xff] %v6209_v62  ;;  %v1744_v0 = vadd.f32 %v1743_v10, %v6188_v8  ;;  %v1872_v63 = vsel %vm1726_vm0, %v1817_v18, 0.0  ;;  %v1523_v1 = vmul.f32 %v2683_v19, %v8000_v11  ;;  %v1524_v12 = vmul.f32 %v2684_v30, %v8000_v11 }
 0x1a6   : > { %8085 = vst [vmem:[#allocation98_spill] sm:$0xff] %v6217_v27  ;;  %v1575_v34 = vadd.f32 %v1522_v57, %v6107_v5  ;;  %v1873_v50 = vadd.f32 %v1872_v63, %v1816_v56  ;;  %v1636_v23 = vmul.f32 %v2685_v36, %v5787_v32  ;;  %v1821_v10 = vmul.f32 %v6054_v42, %v6054_v42  ;;  %v2686_v63 = vld [vmem:[%s2924_s21 + $0xa2] sm:$0xff] }
 0x1a7   : > { %v1746_v7 = vadd.f32 %v1745_v17, %v1744_v0  ;;  %v1875_v18 = vsel %vm1726_vm0, %v1819_v21, 0.0  ;;  %v6231_v15 = vadd.f32 %v1634_v29, %v1573_v58  ;;  %v1748_v19 = vsel %vm1726_vm0, %v6209_v62, 0.0  ;;  %v2687_v21 = vld [vmem:[%s2924_s21 + $0xc1] sm:$0xff]  ;;  %v2688_v29 = vld [vmem:[%s2924_s21 + $0xc9] sm:$0x3f] }
 0x1a8   : > { %v1820_v5 = vmul.f32 %v6061_v59, %v6061_v59  ;;  %v1874_v57 = vadd.f32 %v1873_v50, %v1818_v46  ;;  %v1574_v56 = vadd.f32 %v1521_v14, %v6103_v16  ;;  %v1635_v36 = vmul.f32 %v2686_v63, %v5787_v32  ;;  %v2689_v46 = vld [vmem:[%s2924_s21 + $0xba] sm:$0x3f] }
 0x1a9   : > { %v6240_v17 = vadd.f32 %v1633_v4, %v1572_v54  ;;  %v1747_v0 = vadd.f32 %v1746_v7, %v6217_v27  ;;  %v1525_v58 = vmul.f32 %v2687_v21, %v8000_v11  ;;  %v1526_v30 = vmul.f32 %v2688_v29, %v8000_v11 }
 0x1aa   : > { %v1577_v42 = vadd.f32 %v1524_v12, %v6130_v28  ;;  %v1876_v59 = vadd.f32 %v1875_v18, %v1874_v57  ;;  %v1638_v50 = vmul.f32 %v2689_v46, %v5787_v32  ;;  %v1823_v14 = vmul.f32 %v6082_v40, %v6082_v40  ;;  %v2690_v18 = vld [vmem:[%s2924_s21 + $0xb2] sm:$0xff] }
 0x1ab   : > { %v1749_v16 = vadd.f32 %v1748_v19, %v1747_v0  ;;  %v1878_v54 = vsel %vm1726_vm0, %v1821_v10, 0.0  ;;  %v6253_v4 = vadd.f32 %v1636_v23, %v1575_v34  ;;  %v1751_v7 = vsel %vm1726_vm0, %v6231_v15, 0.0  ;;  %v8086_v10 = vld [vmem:[#allocation44_spill] sm:$0xff] }
 0x1ac   : > { %v1822_v63 = vmul.f32 %v6088_v41, %v6088_v41  ;;  %v1877_v28 = vadd.f32 %v1876_v59, %v1820_v5  ;;  %v1576_v12 = vadd.f32 %v1523_v1, %v6126_v51  ;;  %v1637_v19 = vmul.f32 %v2690_v18, %v5787_v32  ;;  %v8087_v23 = vld [vmem:[#allocation92_spill] sm:$0xff]  ;;  %v2691_v59 = vld [vmem:[%s2924_s21 + $0xca] sm:$0x3f] }
 0x1ad   : > { %v6262_v57 = vadd.f32 %v1635_v36, %v1574_v56  ;;  %v1750_v0 = vadd.f32 %v1749_v16, %v6240_v17  ;;  %v1527_v34 = vmul.f32 %v8000_v11, %v8086_v10  ;;  %v1528_v21 = vmul.f32 %v8000_v11, %v8087_v23 }
 0x1ae   : > { %v1579_v29 = vadd.f32 %v1526_v30, %v6138_v44  ;;  %v1879_v46 = vadd.f32 %v1878_v54, %v1877_v28  ;;  %v1640_v51 = vmul.f32 %v2691_v59, %v5787_v32  ;;  %v1825_v5 = vmul.f32 %v6115_v24, %v6115_v24  ;;  %v2692_v30 = vld [vmem:[%s2924_s21 + $0xc2] sm:$0xff] }
 0x1af   : > { %v1752_v1 = vadd.f32 %v1751_v7, %v1750_v0  ;;  %v1881_v56 = vsel %vm1726_vm0, %v1823_v14, 0.0  ;;  %v6275_v36 = vadd.f32 %v1638_v50, %v1577_v42  ;;  %v1754_v16 = vsel %vm1726_vm0, %v6253_v4, 0.0  ;;  %v8088_v0 = vld [vmem:[#allocation65_spill] sm:$0xff]  ;;  %v8089_v14 = vld [vmem:[#allocation46_spill] sm:$0xff] }
 0x1b0   : > { %v1824_v18 = vmul.f32 %v6121_v26, %v6121_v26  ;;  %v1880_v10 = vadd.f32 %v1879_v46, %v1822_v63  ;;  %v1578_v44 = vadd.f32 %v1525_v58, %v6134_v20  ;;  %v1639_v54 = vmul.f32 %v2692_v30, %v5787_v32  ;;  %v8090_v63 = vld [vmem:[#allocation123_spill] sm:$0xff] }
 0x1b1   : > { %v6284_v7 = vadd.f32 %v1637_v19, %v1576_v12  ;;  %v1753_v28 = vadd.f32 %v1752_v1, %v6262_v57  ;;  %v6289_v42 = vadd.f32 %v8089_v14, %v8088_v0  ;;  %v6292_v50 = vmul.f32 0.0, %v8000_v11 }
 0x1b2   : > { %v1581_v23 = vadd.f32 %v1528_v21, %v6161_v60  ;;  %v1882_v59 = vadd.f32 %v1881_v56, %v1880_v10  ;;  %v1642_v20 = vmul.f32 %v5787_v32, %v8090_v63  ;;  %v1827_v12 = vmul.f32 %v6150_v13, %v6150_v13  ;;  %v8091_v21 = vld [vmem:[#allocation122_spill] sm:$0xff] }
 0x1b3   : > { %v1755_v58 = vadd.f32 %v1754_v16, %v1753_v28  ;;  %v1884_v19 = vsel %vm1726_vm0, %v1825_v5, 0.0  ;;  %v6300_v46 = vadd.f32 %v1640_v51, %v1579_v29  ;;  %v1757_v1 = vsel %vm1726_vm0, %v6275_v36, 0.0  ;;  %v8092_v5 = vld [vmem:[#allocation80_spill] sm:$0xff] }
 0x1b4   : > { %v1826_v30 = vmul.f32 %v6156_v35, %v6156_v35  ;;  %v1883_v0 = vadd.f32 %v1882_v59, %v1824_v18  ;;  %v1580_v60 = vadd.f32 %v1527_v34, %v6142_v37  ;;  %v1641_v56 = vmul.f32 %v5787_v32, %v8091_v21  ;;  %v8093_v51 = vld [vmem:[#allocation136_spill] sm:$0xff]  ;;  %v2694_v21 = vld [vmem:[%s2924_s21 + $0x109] sm:$0x3f] }
 0x1b5   : > { %v6309_v16 = vadd.f32 %v1639_v54, %v1578_v44  ;;  %v1756_v10 = vadd.f32 %v1755_v58, %v6284_v7  ;;  %v1473_v29 = vadd.f32 %v6035_v47, %v8092_v5  ;;  %v1531_v28 = vmul.f32 %v8093_v51, %v8000_v11  ;;  %v2693_v58 = vld [vmem:[%s2924_s21 + $0xf1] sm:$0xff]  ;;  %v8095_v51 = vld [vmem:[#allocation9_spill] sm:$0xff] }
 0x1b6   : > { %v1583_v14 = vadd.f32 %v6292_v50, %v6169_v39  ;;  %v1885_v18 = vadd.f32 %v1884_v19, %v1883_v0  ;;  %v6319_v37 = vmul.f32 0.0, %v5787_v32  ;;  %v1829_v44 = vmul.f32 %v6182_v9, %v6182_v9 }
 0x1b7   : > { %v1758_v34 = vadd.f32 %v1757_v1, %v1756_v10  ;;  %v1887_v54 = vsel %vm1726_vm0, %v1827_v12, 0.0  ;;  %v6324_v59 = vadd.f32 %v1642_v20, %v1581_v23  ;;  %v1760_v47 = vsel %vm1726_vm0, %v6300_v46, 0.0  ;;  %v8094_v23 = vld [vmem:[#allocation141_spill] sm:$0xff] }
 0x1b8   : > { %v1828_v63 = vmul.f32 %v6188_v8, %v6188_v8  ;;  %v1886_v39 = vadd.f32 %v1885_v18, %v1826_v30  ;;  %v1530_v19 = vmul.f32 %v2693_v58, %v8000_v11  ;;  %v1582_v1 = vadd.f32 %v6292_v50, %v6165_v3 }
 0x1b9   : > { %v6334_v0 = vadd.f32 %v1641_v56, %v1580_v60  ;;  %v1759_v12 = vadd.f32 %v1758_v34, %v6309_v16  ;;  %v1532_v20 = vmul.f32 %v8094_v23, %v8000_v11  ;;  %v1533_v10 = vmul.f32 %v2694_v21, %v8000_v11  ;;  %v8096_v23 = vld [vmem:[#allocation66_spill] sm:$0xff]  ;;  %v2696_v21 = vld [vmem:[%s2924_s21 + $0x111] sm:$0xff] }
 0x1ba   : > { %v1585_v5 = vadd.f32 %v1531_v28, %v6195_v61  ;;  %v1888_v30 = vadd.f32 %v1887_v54, %v1886_v39  ;;  %v1645_v18 = vmul.f32 %v8095_v51, %v5787_v32  ;;  %v1831_v3 = vmul.f32 %v6209_v62, %v6209_v62  ;;  %v2695_v39 = vld [vmem:[%s2924_s21 + $0xf2] sm:$0xff] }
 0x1bb   : > { %v1761_v58 = vadd.f32 %v1760_v47, %v1759_v12  ;;  %v1890_v60 = vsel %vm1726_vm0, %v1829_v44, 0.0  ;;  %v6348_v56 = vadd.f32 %v6319_v37, %v1583_v14  ;;  %v1763_v34 = vsel %vm1726_vm0, %v6324_v59, 0.0 }
 0x1bc   : > { %v1830_v61 = vmul.f32 %v6217_v27, %v6217_v27  ;;  %v1889_v28 = vadd.f32 %v1888_v30, %v1828_v63  ;;  %v1584_v54 = vadd.f32 %v1530_v19, %v6173_v31  ;;  %v1644_v47 = vmul.f32 %v2695_v39, %v5787_v32  ;;  %v2697_v27 = vld [vmem:[%s2924_s21 + $0x10a] sm:$0x3f] }
 0x1bd   : > { %v6358_v12 = vadd.f32 %v6319_v37, %v1582_v1  ;;  %v1762_v44 = vadd.f32 %v1761_v58, %v6334_v0  ;;  %v1474_v14 = vadd.f32 %v6039_v43, %v8096_v23  ;;  %v1534_v51 = vmul.f32 %v2696_v21, %v8000_v11 }
 0x1be   : > { %v1587_v62 = vadd.f32 %v1533_v10, %v1473_v29  ;;  %v1891_v9 = vadd.f32 %v1890_v60, %v1889_v28  ;;  %v1647_v63 = vmul.f32 %v2697_v27, %v5787_v32  ;;  %v1833_v19 = vmul.f32 %v6231_v15, %v6231_v15  ;;  %v8097_v27 = vld [vmem:[#allocation10_spill] sm:$0xff] }
 0x1bf   : > { %v1764_v31 = vadd.f32 %v1763_v34, %v1762_v44  ;;  %v1893_v1 = vsel %vm1726_vm0, %v1831_v3, 0.0  ;;  %v6370_v30 = vadd.f32 %v1645_v18, %v1585_v5  ;;  %v1766_v58 = vsel %vm1726_vm0, %v6348_v56, 0.0 }
 0x1c0   : > { %v1832_v11 = vmul.f32 %v6240_v17, %v6240_v17  ;;  %v1892_v43 = vadd.f32 %v1891_v9, %v1830_v61  ;;  %v1586_v29 = vadd.f32 %v1532_v20, %v6289_v42  ;;  %v1646_v10 = vmul.f32 %v8097_v27, %v5787_v32 }
 0x1c1   : > { %v6379_v60 = vadd.f32 %v1644_v47, %v1584_v54  ;;  %v1765_v34 = vadd.f32 %v1764_v31, %v6358_v12  ;;  %v1835_v18 = vmul.f32 %v6253_v4, %v6253_v4  ;;  %v1896_v28 = vsel %vm1726_vm0, %v1833_v19, 0.0  ;;  %v2698_v54 = vld [vmem:[%s2924_s21 + $0x112] sm:$0xff] }
 0x1c2   : > { %v1894_v3 = vadd.f32 %v1893_v1, %v1892_v43  ;;  %v6385_v39 = vadd.f32 %v1647_v63, %v1587_v62  ;;  %v1769_v9 = vsel %vm1726_vm0, %v6370_v30, 0.0  ;;  %v1834_v42 = vmul.f32 %v6262_v57, %v6262_v57 }
 0x1c3   : > { %v1767_v5 = vadd.f32 %v1766_v58, %v1765_v34  ;;  %v1588_v61 = vadd.f32 %v1534_v51, %v1474_v14  ;;  %v1648_v47 = vmul.f32 %v2698_v54, %v5787_v32  ;;  %v6393_v44 = vadd.f32 %v1646_v10, %v1586_v29 }
 0x1c4   : > { %v1895_v20 = vadd.f32 %v1894_v3, %v1832_v11  ;;  %v1837_v62 = vmul.f32 %v6275_v36, %v6275_v36  ;;  %v1899_v63 = vsel %vm1726_vm0, %v1835_v18, 0.0  ;;  %v1772_v19 = vsel %vm1726_vm0, %v6385_v39, 0.0 }
 0x1c5   : > { %v1768_v23 = vadd.f32 %v1767_v5, %v6379_v60  ;;  %v1836_v14 = vmul.f32 %v6284_v7, %v6284_v7  ;;  %v6403_v1 = vadd.f32 %v1648_v47, %v1588_v61  ;;  %v1839_v43 = vmul.f32 %v6300_v46, %v6300_v46 }
 0x1c6   : > { %v1897_v21 = vadd.f32 %v1896_v28, %v1895_v20  ;;  %v1902_v29 = vsel %vm1726_vm0, %v1837_v62, 0.0  ;;  %v1775_v27 = vsel %vm1726_vm0, %v5945_v33, 0.0  ;;  %v1838_v10 = vmul.f32 %v6309_v16, %v6309_v16 }
 0x1c7   : > { %v1770_v31 = vadd.f32 %v1769_v9, %v1768_v23  ;;  %v1841_v28 = vmul.f32 %v6324_v59, %v6324_v59  ;;  %v1905_v9 = vsel %vm1726_vm0, %v1839_v43, 0.0  ;;  %v1840_v20 = vmul.f32 %v6334_v0, %v6334_v0 }
 0x1c8   : > { %v1898_v51 = vadd.f32 %v1897_v21, %v1834_v42  ;;  %v1778_v42 = vsel %vm1726_vm0, %v5953_v2, 0.0  ;;  %v1843_v21 = vmul.f32 %v6348_v56, %v6348_v56  ;;  %v1781_v62 = vsel %vm1726_vm0, %v5961_v55, 0.0 }
 0x1c9   : > { %v1771_v32 = vadd.f32 %v1770_v31, %v6393_v44  ;;  %v1908_v31 = vsel %vm1726_vm0, %v1841_v28, 0.0  ;;  %v1784_v43 = vsel %vm1726_vm0, %v5969_v45, 0.0  ;;  %v1787_v28 = vsel %vm1726_vm0, %v5977_v53, 0.0 }
 0x1ca   : > { %v1900_v58 = vadd.f32 %v1899_v63, %v1898_v51  ;;  %v1842_v63 = vmul.f32 %v6358_v12, %v6358_v12 }
 0x1cb   : > { %v1773_v11 = vadd.f32 %v1772_v19, %v1771_v32 }
 0x1cc   : > { %v1901_v34 = vadd.f32 %v1900_v58, %v1836_v14  ;;  %v1845_v58 = vmul.f32 %v6370_v30, %v6370_v30 }
 0x1cd   : > { %v1774_v3 = vadd.f32 %v1773_v11, %v6403_v1  ;;  %v1911_v11 = vsel %vm1726_vm0, %v1843_v21, 0.0  ;;  %v1790_v21 = vsel %vm1726_vm0, %v5985_v52, 0.0 }
 0x1ce   : > { %v1903_v5 = vadd.f32 %v1902_v29, %v1901_v34  ;;  %v1844_v29 = vmul.f32 %v6379_v60, %v6379_v60 }
 0x1cf   : > { %v1776_v18 = vadd.f32 %v1775_v27, %v1774_v3 }
 0x1d0   : > { %v1904_v61 = vadd.f32 %v1903_v5, %v1838_v10  ;;  %v1847_v5 = vmul.f32 %v6385_v39, %v6385_v39 }
 0x1d1   : > { %v1777_v54 = vadd.f32 %v1776_v18, %v5949_v49  ;;  %v1914_v18 = vsel %vm1726_vm0, %v1845_v58, 0.0  ;;  %v1793_v58 = vsel %vm1726_vm0, %v5993_v6, 0.0 }
 0x1d2   : > { %v1906_v47 = vadd.f32 %v1905_v9, %v1904_v61  ;;  %v1846_v9 = vmul.f32 %v6393_v44, %v6393_v44 }
 0x1d3   : > { %v1779_v23 = vadd.f32 %v1778_v42, %v1777_v54 }
 0x1d4   : > { %v1907_v19 = vadd.f32 %v1906_v47, %v1840_v20  ;;  %v1849_v47 = vmul.f32 %v5945_v33, %v5945_v33 }
 0x1d5   : > { %v1780_v14 = vadd.f32 %v1779_v23, %v5957_v38  ;;  %v1917_v23 = vsel %vm1726_vm0, %v1847_v5, 0.0 }
 0x1d6   : > { %v1909_v51 = vadd.f32 %v1908_v31, %v1907_v19  ;;  %v1848_v31 = vmul.f32 %v6403_v1, %v6403_v1 }
 0x1d7   : > { %v1782_v32 = vadd.f32 %v1781_v62, %v1780_v14 }
 0x1d8   : > { %v1910_v27 = vadd.f32 %v1909_v51, %v1842_v63  ;;  %v1851_v51 = vmul.f32 %v5953_v2, %v5953_v2 }
 0x1d9   : > { %v1783_v10 = vadd.f32 %v1782_v32, %v5965_v25  ;;  %v1920_v32 = vsel %vm1726_vm0, %v1849_v47, 0.0 }
 0x1da   : > { %v1912_v34 = vadd.f32 %v1911_v11, %v1910_v27  ;;  %v1850_v11 = vmul.f32 %v5949_v49, %v5949_v49  ;;  %v1923_v5 = vsel %vm1726_vm0, %v1851_v51, 0.0 }
 0x1db   : > { %v1785_v3 = vadd.f32 %v1784_v43, %v1783_v10 }
 0x1dc   : > { %v1913_v42 = vadd.f32 %v1912_v34, %v1844_v29  ;;  %v8098_v29 = vld [vmem:[#allocation79_spill] sm:$0xff] }
 0x1dd   : > { %v1786_v20 = vadd.f32 %v1785_v3, %v5973_v22  ;;  %v1853_v3 = vmul.f32 %v5961_v55, %v5961_v55 }
 0x1de   : > { %v1915_v61 = vadd.f32 %v1914_v18, %v1913_v42  ;;  %v8099_v18 = vld [vmem:[#allocation53_spill] sm:$0xff] }
 0x1df   : > { %v1788_v54 = vadd.f32 %v1787_v28, %v1786_v20  ;;  %v1796_v28 = vsel %vm1726_vm0, %v8099_v18, 0.0  ;;  %v8100_v20 = vld [vmem:[#allocation52_spill] sm:$0xff] }
 0x1e0   : > { %v1916_v62 = vadd.f32 %v1915_v61, %v1846_v9  ;;  %v1852_v9 = vmul.f32 %v5957_v38, %v5957_v38 }
 0x1e1   : > { %v1789_v63 = vadd.f32 %v1788_v54, %v5981_v48 }
 0x1e2   : > { %v1918_v19 = vadd.f32 %v1917_v23, %v1916_v62  ;;  %v1855_v23 = vmul.f32 %v5969_v45, %v5969_v45 }
 0x1e3   : > { %v1791_v14 = vadd.f32 %v1790_v21, %v1789_v63  ;;  %v1926_v21 = vsel %vm1726_vm0, %v1853_v3, 0.0  ;;  %v1854_v63 = vmul.f32 %v5965_v25, %v5965_v25  ;;  %v1857_v3 = vmul.f32 %v5977_v53, %v5977_v53 }
 0x1e4   : > { %v1919_v43 = vadd.f32 %v1918_v19, %v1848_v31  ;;  %v8101_v31 = vld [vmem:[#allocation57_spill] sm:$0xff]  ;;  %v1858_v53 = vmul.f32 %v5981_v48, %v5981_v48 }
 0x1e5   : > { %v1792_v27 = vadd.f32 %v1791_v14, %v8098_v29  ;;  %v1799_v62 = vsel %vm1726_vm0, %v8101_v31, 0.0  ;;  %v8102_v14 = vld [vmem:[#allocation51_spill] sm:$0xff] }
 0x1e6   : > { %v1921_v10 = vadd.f32 %v1920_v32, %v1919_v43  ;;  %v8103_v32 = vld [vmem:[#allocation54_spill] sm:$0xff] }
 0x1e7   : > { %v1794_v34 = vadd.f32 %v1793_v58, %v1792_v27  ;;  %v8104_v58 = vld [vmem:[#allocation101_spill] sm:$0xff]  ;;  %v8105_v27 = vld [vmem:[#allocation55_spill] sm:$0xff] }
 0x1e8   : > { %v1922_v42 = vadd.f32 %v1921_v10, %v1850_v11  ;;  %v1496_v11 = vadd.f32 %v8104_v58, %v8103_v32  ;;  %v1497_v10 = vadd.f32 %v8104_v58, %v8105_v27  ;;  %v8108_v58 = vld [vmem:[#allocation62_spill] sm:$0xff] }
 0x1e9   : > { %v1795_v61 = vadd.f32 %v1794_v34, %v8100_v20  ;;  %v1805_v27 = vsel %vm1726_vm0, %v8108_v58, 0.0 }
 0x1ea   : > { %v1924_v54 = vadd.f32 %v1923_v5, %v1922_v42  ;;  %v1929_v5 = vsel %vm1726_vm0, %v1855_v23, 0.0  ;;  %v1611_v32 = vadd.f32 %v6292_v50, %v1497_v10  ;;  %v1932_v23 = vsel %vm1726_vm0, %v1857_v3, 0.0 }
 0x1eb   : > { %v1797_v47 = vadd.f32 %v1796_v28, %v1795_v61  ;;  %v8106_v28 = vld [vmem:[#allocation60_spill] sm:$0xff]  ;;  %v1861_v3 = vmul.f32 %v5993_v6, %v5993_v6 }
 0x1ec   : > { %v1925_v19 = vadd.f32 %v1924_v54, %v1852_v9  ;;  %v1802_v42 = vsel %vm1726_vm0, %v8106_v28, 0.0  ;;  %v1856_v9 = vmul.f32 %v5973_v22, %v5973_v22  ;;  %v8107_v54 = vld [vmem:[#allocation58_spill] sm:$0xff] }
 0x1ed   : > { %v1798_v51 = vadd.f32 %v1797_v47, %v8102_v14 }
 0x1ee   : > { %v1927_v43 = vadd.f32 %v1926_v21, %v1925_v19  ;;  %v1610_v21 = vadd.f32 %v6292_v50, %v1496_v11  ;;  %v6504_v50 = vadd.f32 %v6319_v37, %v1611_v32  ;;  %v1938_v32 = vsel %vm1726_vm0, %v1861_v3, 0.0 }
 0x1ef   : > { %v1800_v34 = vadd.f32 %v1799_v62, %v1798_v51  ;;  %v1859_v51 = vmul.f32 %v5985_v52, %v5985_v52  ;;  %v1867_v3 = vmul.f32 %v8106_v28, %v8106_v28 }
 0x1f0   : > { %v1928_v61 = vadd.f32 %v1927_v43, %v1854_v63  ;;  %v8109_v43 = vld [vmem:[#allocation61_spill] sm:$0xff]  ;;  %v6501_v11 = vadd.f32 %v6319_v37, %v1610_v21  ;;  %8111 = vst [vmem:[#allocation113_spill] sm:$0xff] %v6504_v50  ;;  %v1808_v21 = vsel %vm1726_vm0, %v6504_v50, 0.0  ;;  %v1863_v37 = vmul.f32 %v8099_v18, %v8099_v18 }
 0x1f1   : > { %v1801_v47 = vadd.f32 %v1800_v34, %v8107_v54 }
 0x1f2   : > { %v1930_v19 = vadd.f32 %v1929_v5, %v1928_v61  ;;  %8110 = vst [vmem:[#allocation21_spill] sm:$0xff] %v6501_v11  ;;  %v1860_v61 = vmul.f32 %v8098_v29, %v8098_v29 }
 0x1f3   : > { %v1803_v62 = vadd.f32 %v1802_v42, %v1801_v47  ;;  %v1935_v42 = vsel %vm1726_vm0, %v1859_v51, 0.0 }
 0x1f4   : > { %v1931_v63 = vadd.f32 %v1930_v19, %v1856_v9 }
 0x1f5   : > { %v1804_v34 = vadd.f32 %v1803_v62, %v8109_v43  ;;  %v1862_v62 = vmul.f32 %v8100_v20, %v8100_v20 }
 0x1f6   : > { %v1933_v5 = vadd.f32 %v1932_v23, %v1931_v63  ;;  %v1941_v63 = vsel %vm1726_vm0, %v1863_v37, 0.0  ;;  %v1869_v37 = vmul.f32 %v8108_v58, %v8108_v58 }
 0x1f7   : > { %v1806_v10 = vadd.f32 %v1805_v27, %v1804_v34  ;;  %v1864_v34 = vmul.f32 %v8102_v14, %v8102_v14 }
 0x1f8   : > { %v1934_v47 = vadd.f32 %v1933_v5, %v1858_v53  ;;  %v1865_v53 = vmul.f32 %v8101_v31, %v8101_v31 }
 0x1f9   : > { %v1807_v9 = vadd.f32 %v1806_v10, %v6501_v11 }
 0x1fa   : > { %v1936_v19 = vadd.f32 %v1935_v42, %v1934_v47  ;;  %v1944_v47 = vsel %vm1726_vm0, %v1865_v53, 0.0  ;;  %v1871_v53 = vmul.f32 %v6504_v50, %v6504_v50 }
 0x1fb   : > { %v1809_v51 = vadd.f32 %v1808_v21, %v1807_v9 }
 0x1fc   : > { %v1937_v23 = vadd.f32 %v1936_v19, %v1860_v61  ;;  %v1866_v61 = vmul.f32 %v8107_v54, %v8107_v54 }
 0x1fd   : > { %v1810_v10 = vrot.slane %v1809_v51, 4 }
 0x1fe   : > { %v1939_v27 = vadd.f32 %v1938_v32, %v1937_v23  ;;  %v1947_v32 = vsel %vm1726_vm0, %v1867_v3, 0.0  ;;  %v1953_v3 = vsel %vm1726_vm0, %v1871_v53, 0.0  ;;  %v1966_v53 = vld [vmem:[%s528_s26] sm:$0x1] }
 0x1ff   : > { %v1811_v19 = vadd.f32 %v1810_v10, %v1809_v51  ;;  %v1870_v51 = vmul.f32 %v6501_v11, %v6501_v11 }
 0x200   : > { %v1940_v5 = vadd.f32 %v1939_v27, %v1862_v62  ;;  %v1868_v62 = vmul.f32 %v8109_v43, %v8109_v43 }
 0x201   : > { %v1812_v27 = vrot.slane %v1811_v19, 2 }
 0x202   : > { %v1942_v42 = vadd.f32 %v1941_v63, %v1940_v5  ;;  %v1950_v5 = vsel %vm1726_vm0, %v1869_v37, 0.0 }
 0x203   : > { %v1813_v10 = vadd.f32 %v1812_v27, %v1811_v19  ;;  %v1974_v27 = vlaneseq }
 0x204   : > { %v1943_v9 = vadd.f32 %v1942_v42, %v1864_v34 }
 0x206   : > { %v1945_v21 = vadd.f32 %v1944_v47, %v1943_v9  ;;  %v1814_v9 = vrot.slane %v1813_v10, 1 }
 0x208   : > { %v1946_v23 = vadd.f32 %v1945_v21, %v1866_v61 }
 0x20a   : > { %v1948_v63 = vadd.f32 %v1947_v32, %v1946_v23  ;;  %v1815_v32 = vadd.f32 %v1814_v9, %v1813_v10 }
 0x20c   : > { %v1949_v34 = vadd.f32 %v1948_v63, %v1868_v62  ;;  %v1962_v43 = vmul.f32 0.0025510204, %v1815_v32  ;;  %v1975_v63 = vshrl.u32 %v1974_v27, 7  ;;  %v8116_v32 = vld [vmem:[#allocation126_spill] sm:$0xff] }
 0x20e   : > { %v1951_v42 = vadd.f32 %v1950_v5, %v1949_v34  ;;  %v1964_v54 = vmul.f32 %v1962_v43, %v1962_v43  ;;  %v8112_v34 = vld [vmem:[#allocation48_spill] sm:$0xff] }
 0x210   : > { %v1952_v47 = vadd.f32 %v1951_v42, %v1870_v51  ;;  %v8113_v42 = vld [vmem:[#allocation49_spill] sm:$0xff] }
 0x212   : > { %v1954_v61 = vadd.f32 %v1953_v3, %v1952_v47  ;;  %v8114_v47 = vld [vmem:[#allocation63_spill] sm:$0xff] }
 0x214   : > { %v1955_v21 = vrot.slane %v1954_v61, 4 }
 0x216   : > { %v1956_v23 = vadd.f32 %v1955_v21, %v1954_v61  ;;  %v8115_v61 = vld [vmem:[#allocation59_spill] sm:$0xff] }
 0x218   : > { %v1957_v58 = vrot.slane %v1956_v23, 2 }
 0x21a   : > { %v1958_v50 = vadd.f32 %v1957_v58, %v1956_v23  ;;  %v1976_v58 = vsub.s32 0, %v1975_v63 }
 0x21c   : > { %v1959_v37 = vrot.slane %v1958_v50, 1 }
 0x21e   : > { %v1960_v28 = vadd.f32 %v1959_v37, %v1958_v50  ;;  %v8117_v37 = vld [vmem:[#allocation15_spill] sm:$0xff] }
 0x220   : > { %v1963_v11 = vmul.f32 0.0025510204, %v1960_v28  ;;  %v1970_v28 = vld [vmem:[%s531_s29] sm:$0x1] }
 0x222   : > { %v1965_v62 = vsub.f32 %v1963_v11, %v1964_v54 }
 0x224   : > { %v1967_v19 = vadd.f32 0.001, %v1965_v62 }
 0x226   : > { %2553 = vrsqrt.f32 %v1967_v19 }
 0x230   : > { %v2554_v50 = vpop.eup %2553 }
 0x231   : > { %v1969_v5 = vmul.f32 %v2554_v50, %v1966_v53 }
 0x233   : > { %v1971_v54 = vmul.f32 %v1969_v5, %v1962_v43  ;;  %v6548_v11 = vrot.slane %v1969_v5, %v1976_v58 }
 0x235   : > { %v1972_v51 = vsub.f32 %v1970_v28, %v1971_v54  ;;  %v1979_v10 = vmul.f32 %v6548_v11, %v8112_v34  ;;  %v1980_v3 = vmul.f32 %v6548_v11, %v8113_v42  ;;  %v1981_v9 = vmul.f32 %v6548_v11, %v8114_v47 }
 0x236   : > { %v1982_v21 = vmul.f32 %v6548_v11, %v8115_v61  ;;  %v1983_v23 = vmul.f32 %v6548_v11, %v8116_v32  ;;  %v1984_v43 = vmul.f32 %v6548_v11, %v8117_v37  ;;  %v1985_v62 = vmul.f32 %v6548_v11, %v6088_v41  ;;  %v8119_v61 = vld [vmem:[#allocation98_spill] sm:$0xff]  ;;  %v8120_v32 = vld [vmem:[#allocation20_spill] sm:$0xff] }
 0x237   : > { %v6564_v19 = vrot.slane %v1972_v51, %v1976_v58  ;;  %v1986_v27 = vmul.f32 %v6548_v11, %v6082_v40  ;;  %v1987_v63 = vmul.f32 %v6548_v11, %v6121_v26  ;;  %v1988_v53 = vmul.f32 %v6548_v11, %v6115_v24  ;;  %v8118_v58 = vld [vmem:[#allocation96_spill] sm:$0xff] }
 0x238   : > { %v1989_v50 = vmul.f32 %v6548_v11, %v6156_v35  ;;  %v1990_v5 = vmul.f32 %v6548_v11, %v6150_v13  ;;  %v1991_v41 = vmul.f32 %v6548_v11, %v6188_v8  ;;  %v1992_v28 = vmul.f32 %v6548_v11, %v8118_v58 }
 0x239   : > { %v2041_v40 = vadd.f32 %v6564_v19, %v1979_v10  ;;  %v2042_v54 = vadd.f32 %v6564_v19, %v1980_v3  ;;  %v2043_v26 = vadd.f32 %v6564_v19, %v1981_v9  ;;  %v2044_v24 = vadd.f32 %v6564_v19, %v1982_v21 }
 0x23a   : > { %v2045_v51 = vadd.f32 %v6564_v19, %v1983_v23  ;;  %v2046_v35 = vadd.f32 %v6564_v19, %v1984_v43  ;;  %v2047_v13 = vadd.f32 %v6564_v19, %v1985_v62  ;;  %v2048_v34 = vadd.f32 %v6564_v19, %v1986_v27 }
 0x23b   : > { %2097 = vst [vmem:[%s6589_s30] sm:$0xff] %v2041_v40  ;;  %2098 = vst [vmem:[%s6589_s30 + $0x8] sm:$0x3f] %v2042_v54  ;;  %v2049_v8 = vadd.f32 %v6564_v19, %v1987_v63  ;;  %v2050_v10 = vadd.f32 %v6564_v19, %v1988_v53  ;;  %v2051_v42 = vadd.f32 %v6564_v19, %v1989_v50 }
 0x23c   : > { %2099 = vst [vmem:[%s6589_s30 + $0x10] sm:$0xff] %v2043_v26  ;;  %2100 = vst [vmem:[%s6589_s30 + $0x18] sm:$0x3f] %v2044_v24  ;;  %v2052_v3 = vadd.f32 %v6564_v19, %v1990_v5  ;;  %v2053_v47 = vadd.f32 %v6564_v19, %v1991_v41  ;;  %v2054_v9 = vadd.f32 %v6564_v19, %v1992_v28 }
 0x23d   : > { %2101 = vst [vmem:[%s6589_s30 + $0x20] sm:$0xff] %v2045_v51  ;;  %2102 = vst [vmem:[%s6589_s30 + $0x28] sm:$0x3f] %v2046_v35  ;;  %v1993_v21 = vmul.f32 %v6548_v11, %v8119_v61  ;;  %v1994_v23 = vmul.f32 %v6548_v11, %v8120_v32  ;;  %v1995_v37 = vmul.f32 %v6548_v11, %v6240_v17  ;;  %v8121_v32 = vld [vmem:[#allocation50_spill] sm:$0xff] }
 0x23e   : > { %2103 = vst [vmem:[%s6589_s30 + $0x30] sm:$0xff] %v2047_v13  ;;  %2104 = vst [vmem:[%s6589_s30 + $0x38] sm:$0x3f] %v2048_v34  ;;  %v1996_v43 = vmul.f32 %v6548_v11, %v6231_v15  ;;  %v1997_v62 = vmul.f32 %v6548_v11, %v6262_v57  ;;  %v1998_v27 = vmul.f32 %v6548_v11, %v6253_v4 }
 0x23f   : > { %2105 = vst [vmem:[%s6589_s30 + $0x40] sm:$0xff] %v2049_v8  ;;  %2106 = vst [vmem:[%s6589_s30 + $0x48] sm:$0x3f] %v2050_v10  ;;  %v2055_v63 = vadd.f32 %v6564_v19, %v1993_v21  ;;  %v2056_v53 = vadd.f32 %v6564_v19, %v1994_v23  ;;  %v1999_v17 = vmul.f32 %v6548_v11, %v6284_v7 }
 0x240   : > { %2107 = vst [vmem:[%s6589_s30 + $0x50] sm:$0xff] %v2051_v42  ;;  %2108 = vst [vmem:[%s6589_s30 + $0x58] sm:$0x3f] %v2052_v3  ;;  %v2000_v15 = vmul.f32 %v6548_v11, %v6275_v36  ;;  %v2057_v57 = vadd.f32 %v6564_v19, %v1995_v37  ;;  %v2058_v4 = vadd.f32 %v6564_v19, %v1996_v43 }
 0x241   : > { %2109 = vst [vmem:[%s6589_s30 + $0x60] sm:$0xff] %v2053_v47  ;;  %2110 = vst [vmem:[%s6589_s30 + $0x68] sm:$0x3f] %v2054_v9  ;;  %v2059_v50 = vadd.f32 %v6564_v19, %v1997_v62  ;;  %v2060_v5 = vadd.f32 %v6564_v19, %v1998_v27  ;;  %v2061_v41 = vadd.f32 %v6564_v19, %v1999_v17 }
 0x242   : > { %2111 = vst [vmem:[%s6589_s30 + $0x70] sm:$0xff] %v2055_v63  ;;  %2112 = vst [vmem:[%s6589_s30 + $0x78] sm:$0x3f] %v2056_v53  ;;  %v2062_v58 = vadd.f32 %v6564_v19, %v2000_v15  ;;  %v2001_v7 = vmul.f32 %v6548_v11, %v6309_v16  ;;  %v2002_v36 = vmul.f32 %v6548_v11, %v6300_v46 }
 0x243   : > { %2113 = vst [vmem:[%s6589_s30 + $0x80] sm:$0xff] %v2057_v57  ;;  %2114 = vst [vmem:[%s6589_s30 + $0x88] sm:$0x3f] %v2058_v4  ;;  %v2003_v28 = vmul.f32 %v6548_v11, %v6334_v0  ;;  %v2004_v40 = vmul.f32 %v6548_v11, %v6324_v59  ;;  %v2005_v54 = vmul.f32 %v6548_v11, %v6358_v12  ;;  %v8122_v4 = vld [vmem:[#allocation58_spill] sm:$0xff] }
 0x244   : > { %2115 = vst [vmem:[%s6589_s30 + $0x90] sm:$0xff] %v2059_v50  ;;  %2116 = vst [vmem:[%s6589_s30 + $0x98] sm:$0x3f] %v2060_v5  ;;  %v2006_v16 = vmul.f32 %v6548_v11, %v6348_v56  ;;  %v2063_v46 = vadd.f32 %v6564_v19, %v2001_v7  ;;  %v2064_v26 = vadd.f32 %v6564_v19, %v2002_v36  ;;  %v8123_v5 = vld [vmem:[#allocation60_spill] sm:$0xff] }
 0x245   : > { %2117 = vst [vmem:[%s6589_s30 + $0xa0] sm:$0xff] %v2061_v41  ;;  %2118 = vst [vmem:[%s6589_s30 + $0xa8] sm:$0x3f] %v2062_v58  ;;  %v2007_v0 = vmul.f32 %v6548_v11, %v6379_v60  ;;  %v2008_v59 = vmul.f32 %v6548_v11, %v6370_v30  ;;  %v2065_v12 = vadd.f32 %v6564_v19, %v2003_v28  ;;  %v8124_v58 = vld [vmem:[#allocation61_spill] sm:$0xff] }
 0x246   : > { %v2066_v56 = vadd.f32 %v6564_v19, %v2004_v40  ;;  %v2067_v24 = vadd.f32 %v6564_v19, %v2005_v54  ;;  %v2068_v51 = vadd.f32 %v6564_v19, %v2006_v16  ;;  %2119 = vst [vmem:[%s6589_s30 + $0xb0] sm:$0xff] %v2063_v46  ;;  %2120 = vst [vmem:[%s6589_s30 + $0xb8] sm:$0x3f] %v2064_v26  ;;  %v8126_v26 = vld [vmem:[#allocation21_spill] sm:$0xff] }
 0x247   : > { %v2069_v35 = vadd.f32 %v6564_v19, %v2007_v0  ;;  %v2070_v13 = vadd.f32 %v6564_v19, %v2008_v59  ;;  %v2009_v60 = vmul.f32 %v6548_v11, %v6393_v44  ;;  %v2010_v30 = vmul.f32 %v6548_v11, %v6385_v39  ;;  %2121 = vst [vmem:[%s6589_s30 + $0xc0] sm:$0xff] %v2065_v12  ;;  %v8127_v59 = vld [vmem:[#allocation113_spill] sm:$0xff] }
 0x248   : > { %2122 = vst [vmem:[%s6589_s30 + $0xc8] sm:$0x3f] %v2066_v56  ;;  %2123 = vst [vmem:[%s6589_s30 + $0xd0] sm:$0xff] %v2067_v24  ;;  %v2011_v34 = vmul.f32 %v6548_v11, %v6403_v1  ;;  %v2012_v8 = vmul.f32 %v6548_v11, %v5945_v33  ;;  %v2013_v10 = vmul.f32 %v6548_v11, %v5949_v49 }
 0x249   : > { %2124 = vst [vmem:[%s6589_s30 + $0xd8] sm:$0x3f] %v2068_v51  ;;  %v2014_v44 = vmul.f32 %v6548_v11, %v5953_v2  ;;  %2125 = vst [vmem:[%s6589_s30 + $0xe0] sm:$0xff] %v2069_v35  ;;  %v2071_v39 = vadd.f32 %v6564_v19, %v2009_v60  ;;  %v2072_v42 = vadd.f32 %v6564_v19, %v2010_v30  ;;  %v2301_v51 = vld [vmem:[%s6589_s30 + $0x8] sm:$0xff] (%p2783_p5)  ;;  %v2303_v35 = vld [vmem:[%s6589_s30 + $0x10] sm:$0xff] (%p2783_p5) }
 0x24a   : > { %2126 = vst [vmem:[%s6589_s30 + $0xe8] sm:$0x3f] %v2070_v13  ;;  %v2015_v1 = vmul.f32 %v6548_v11, %v5957_v38  ;;  %v2016_v33 = vmul.f32 %v6548_v11, %v5961_v55  ;;  %v2073_v49 = vadd.f32 %v6564_v19, %v2011_v34  ;;  %v2074_v2 = vadd.f32 %v6564_v19, %v2012_v8  ;;  %v2307_v13 = vld [vmem:[%s6589_s30 + $0x20] sm:$0xff] (%p2783_p5)  ;;  %v2309_v60 = vld [vmem:[%s6589_s30 + $0x28] sm:$0xff] (%p2783_p5)  ;;  %v2311_v30 = vld [vmem:[%s6589_s30 + $0x30] sm:$0xff] (%p2783_p5) }
 0x24b   : > { %v2075_v3 = vadd.f32 %v6564_v19, %v2013_v10  ;;  %v2076_v47 = vadd.f32 %v6564_v19, %v2014_v44  ;;  %2127 = vst [vmem:[%s6589_s30 + $0xf0] sm:$0xff] %v2071_v39  ;;  %2128 = vst [vmem:[%s6589_s30 + $0xf8] sm:$0x3f] %v2072_v42  ;;  %v2017_v38 = vmul.f32 %v6548_v11, %v5965_v25  ;;  %v2313_v34 = vld [vmem:[%s6589_s30 + $0x38] sm:$0xff] (%p2783_p5)  ;;  %v2315_v8 = vld [vmem:[%s6589_s30 + $0x40] sm:$0xff] (%p2783_p5) }
 0x24c   : > { %v2077_v9 = vadd.f32 %v6564_v19, %v2015_v1  ;;  %v2078_v61 = vadd.f32 %v6564_v19, %v2016_v33  ;;  %v2018_v55 = vmul.f32 %v6548_v11, %v5969_v45  ;;  %2129 = vst [vmem:[%s6589_s30 + $0x100] sm:$0xff] %v2073_v49  ;;  %2130 = vst [vmem:[%s6589_s30 + $0x108] sm:$0x3f] %v2074_v2  ;;  %v2317_v10 = vld [vmem:[%s6589_s30 + $0x48] sm:$0xff] (%p2783_p5)  ;;  %v2319_v44 = vld [vmem:[%s6589_s30 + $0x50] sm:$0xff] (%p2783_p5) }
 0x24d   : > { %2131 = vst [vmem:[%s6589_s30 + $0x110] sm:$0xff] %v2075_v3  ;;  %2132 = vst [vmem:[%s6589_s30 + $0x118] sm:$0x3f] %v2076_v47  ;;  %v2019_v21 = vmul.f32 %v6548_v11, %v5973_v22  ;;  %v2020_v23 = vmul.f32 %v6548_v11, %v8121_v32  ;;  %v2021_v37 = vmul.f32 %v6548_v11, %v5981_v48  ;;  %v2321_v39 = vld [vmem:[%s6589_s30 + $0x58] sm:$0xff] (%p2783_p5)  ;;  %v2323_v42 = vld [vmem:[%s6589_s30 + $0x60] sm:$0xff] (%p2783_p5) }
 0x24e   : > { %v2022_v25 = vmul.f32 %v6548_v11, %v5985_v52  ;;  %2133 = vst [vmem:[%s6589_s30 + $0x120] sm:$0xff] %v2077_v9  ;;  %2134 = vst [vmem:[%s6589_s30 + $0x128] sm:$0x3f] %v2078_v61  ;;  %v2079_v45 = vadd.f32 %v6564_v19, %v2017_v38  ;;  %v2080_v43 = vadd.f32 %v6564_v19, %v2018_v55  ;;  %v2325_v1 = vld [vmem:[%s6589_s30 + $0x68] sm:$0xff] (%p2783_p5)  ;;  %v2327_v33 = vld [vmem:[%s6589_s30 + $0x70] sm:$0xff] (%p2783_p5) }
 0x24f   : > { %v2023_v22 = vmul.f32 %v6548_v11, %v8098_v29  ;;  %v2024_v62 = vmul.f32 %v6548_v11, %v5993_v6  ;;  %v2081_v48 = vadd.f32 %v6564_v19, %v2019_v21  ;;  %v2082_v52 = vadd.f32 %v6564_v19, %v2020_v23  ;;  %2302 = vst [vmem:[%s6788_s8 + $0x10] sm:$0xff] (%p2783_p5), %v2301_v51  ;;  %v2329_v49 = vld [vmem:[%s6589_s30 + $0x78] sm:$0xff] (%p2783_p5)  ;;  %v2331_v2 = vld [vmem:[%s6589_s30 + $0x80] sm:$0xff] (%p2783_p5)  ;;  %v2333_v3 = vld [vmem:[%s6589_s30 + $0x88] sm:$0xff] (%p2783_p5) }
 0x250   : > { %v2083_v27 = vadd.f32 %v6564_v19, %v2021_v37  ;;  %v2084_v63 = vadd.f32 %v6564_v19, %v2022_v25  ;;  %2135 = vst [vmem:[%s6589_s30 + $0x130] sm:$0xff] %v2079_v45  ;;  %2136 = vst [vmem:[%s6589_s30 + $0x138] sm:$0x3f] %v2080_v43  ;;  %v2025_v29 = vmul.f32 %v6548_v11, %v8100_v20  ;;  %v2335_v47 = vld [vmem:[%s6589_s30 + $0x90] sm:$0xff] (%p2783_p5)  ;;  %v2337_v9 = vld [vmem:[%s6589_s30 + $0x98] sm:$0xff] (%p2783_p5) }
 0x251   : > { %v2085_v53 = vadd.f32 %v6564_v19, %v2023_v22  ;;  %v2086_v17 = vadd.f32 %v6564_v19, %v2024_v62  ;;  %v2026_v6 = vmul.f32 %v6548_v11, %v8099_v18  ;;  %2137 = vst [vmem:[%s6589_s30 + $0x140] sm:$0xff] %v2081_v48  ;;  %2138 = vst [vmem:[%s6589_s30 + $0x148] sm:$0x3f] %v2082_v52  ;;  %v2339_v61 = vld [vmem:[%s6589_s30 + $0xa0] sm:$0xff] (%p2783_p5)  ;;  %v2341_v38 = vld [vmem:[%s6589_s30 + $0xa8] sm:$0xff] (%p2783_p5) }
 0x252   : > { %2139 = vst [vmem:[%s6589_s30 + $0x150] sm:$0xff] %v2083_v27  ;;  %2140 = vst [vmem:[%s6589_s30 + $0x158] sm:$0x3f] %v2084_v63  ;;  %v2027_v15 = vmul.f32 %v6548_v11, %v8102_v14  ;;  %v2028_v57 = vmul.f32 %v6548_v11, %v8101_v31  ;;  %v2029_v50 = vmul.f32 %v6548_v11, %v8122_v4  ;;  %v8125_v31 = vld [vmem:[#allocation62_spill] sm:$0xff]  ;;  %v2343_v55 = vld [vmem:[%s6589_s30 + $0xb0] sm:$0xff] (%p2783_p5) }
 0x253   : > { %v2030_v20 = vmul.f32 %v6548_v11, %v8123_v5  ;;  %2141 = vst [vmem:[%s6589_s30 + $0x160] sm:$0xff] %v2085_v53  ;;  %2142 = vst [vmem:[%s6589_s30 + $0x168] sm:$0x3f] %v2086_v17  ;;  %v2087_v18 = vadd.f32 %v6564_v19, %v2025_v29  ;;  %v2088_v41 = vadd.f32 %v6564_v19, %v2026_v6  ;;  %v2345_v21 = vld [vmem:[%s6589_s30 + $0xb8] sm:$0xff] (%p2783_p5)  ;;  %v2347_v32 = vld [vmem:[%s6589_s30 + $0xc0] sm:$0xff] (%p2783_p5) }
 0x254   : > { %v2031_v14 = vmul.f32 %v6548_v11, %v8124_v58  ;;  %v2032_v7 = vmul.f32 %v6548_v11, %v8125_v31  ;;  %v2089_v36 = vadd.f32 %v6564_v19, %v2027_v15  ;;  %v2090_v28 = vadd.f32 %v6564_v19, %v2028_v57  ;;  %2159 = sbr.rel (!%p2783_p5) target bundleno = 629 (0x275), region = 116  ;;  %2304 = vst [vmem:[%s6788_s8 + $0x20] sm:$0xff] (%p2783_p5), %v2303_v35  ;;  %v2349_v23 = vld [vmem:[%s6589_s30 + $0xc8] sm:$0xff] (%p2783_p5)  ;;  %v2351_v37 = vld [vmem:[%s6589_s30 + $0xd0] sm:$0xff] (%p2783_p5)  ;;  %v2353_v25 = vld [vmem:[%s6589_s30 + $0xd8] sm:$0xff] (%p2783_p5) }
 0x255   : > { %v2091_v40 = vadd.f32 %v6564_v19, %v2029_v50  ;;  %v2092_v54 = vadd.f32 %v6564_v19, %v2030_v20  ;;  %2143 = vst [vmem:[%s6589_s30 + $0x170] sm:$0xff] %v2087_v18  ;;  %2144 = vst [vmem:[%s6589_s30 + $0x178] sm:$0x3f] %v2088_v41  ;;  %v2033_v0 = vmul.f32 %v6548_v11, %v8126_v26  ;;  %v2355_v45 = vld [vmem:[%s6589_s30 + $0xe0] sm:$0xff] (%p2783_p5)  ;;  %v2357_v43 = vld [vmem:[%s6589_s30 + $0xe8] sm:$0xff] (%p2783_p5) }
 0x256   : > { %v2093_v16 = vadd.f32 %v6564_v19, %v2031_v14  ;;  %v2094_v46 = vadd.f32 %v6564_v19, %v2032_v7  ;;  %v2034_v12 = vmul.f32 %v6548_v11, %v8127_v59  ;;  %2145 = vst [vmem:[%s6589_s30 + $0x180] sm:$0xff] %v2089_v36  ;;  %2146 = vst [vmem:[%s6589_s30 + $0x188] sm:$0x3f] %v2090_v28  ;;  %v2299_v11 = vld [vmem:[%s6589_s30] sm:$0xff] (%p2783_p5)  ;;  %v2359_v22 = vld [vmem:[%s6589_s30 + $0xf0] sm:$0xff] (%p2783_p5) }
 0x257   : > { %2147 = vst [vmem:[%s6589_s30 + $0x190] sm:$0xff] %v2091_v40  ;;  %2148 = vst [vmem:[%s6589_s30 + $0x198] sm:$0x3f] %v2092_v54  ;;  %v2095_v56 = vadd.f32 %v6564_v19, %v2033_v0  ;;  %v2361_v62 = vld [vmem:[%s6589_s30 + $0xf8] sm:$0xff] (%p2783_p5)  ;;  %v2363_v48 = vld [vmem:[%s6589_s30 + $0x100] sm:$0xff] (%p2783_p5) }
 0x258   : > { %2149 = vst [vmem:[%s6589_s30 + $0x1a0] sm:$0xff] %v2093_v16  ;;  %2150 = vst [vmem:[%s6589_s30 + $0x1a8] sm:$0x3f] %v2094_v46  ;;  %v2096_v24 = vadd.f32 %v6564_v19, %v2034_v12  ;;  %v2305_v19 = vld [vmem:[%s6589_s30 + $0x18] sm:$0xff] (%p2783_p5)  ;;  %v2365_v52 = vld [vmem:[%s6589_s30 + $0x108] sm:$0xff] (%p2783_p5) }
 0x259   : > { %2151 = vst [vmem:[%s6589_s30 + $0x1b0] sm:$0xff] %v2095_v56  ;;  %2300 = vst [vmem:[%s6788_s8] sm:$0xff] (%p2783_p5), %v2299_v11  ;;  %v2367_v27 = vld [vmem:[%s6589_s30 + $0x110] sm:$0xff] (%p2783_p5)  ;;  %v2369_v63 = vld [vmem:[%s6589_s30 + $0x118] sm:$0xff] (%p2783_p5) }
 0x25a   : > { %2152 = vst [vmem:[%s6589_s30 + $0x1b8] sm:$0x3f] %v2096_v24  ;;  %2306 = vst [vmem:[%s6788_s8 + $0x30] sm:$0xff] (%p2783_p5), %v2305_v19  ;;  %v2371_v53 = vld [vmem:[%s6589_s30 + $0x120] sm:$0xff] (%p2783_p5)  ;;  %v2373_v17 = vld [vmem:[%s6589_s30 + $0x128] sm:$0xff] (%p2783_p5) }
 0x25b   : > { %2308 = vst [vmem:[%s6788_s8 + $0x40] sm:$0xff] %v2307_v13  ;;  %2310 = vst [vmem:[%s6788_s8 + $0x50] sm:$0xff] %v2309_v60  ;;  %v2375_v29 = vld [vmem:[%s6589_s30 + $0x130] sm:$0xff]  ;;  %v2377_v6 = vld [vmem:[%s6589_s30 + $0x138] sm:$0xff] }
 0x25c   : > { %2312 = vst [vmem:[%s6788_s8 + $0x60] sm:$0xff] %v2311_v30  ;;  %2314 = vst [vmem:[%s6788_s8 + $0x70] sm:$0xff] %v2313_v34  ;;  %v2379_v15 = vld [vmem:[%s6589_s30 + $0x140] sm:$0xff]  ;;  %v2381_v57 = vld [vmem:[%s6589_s30 + $0x148] sm:$0xff] }
 0x25d   : > { %2316 = vst [vmem:[%s6788_s8 + $0x80] sm:$0xff] %v2315_v8  ;;  %2318 = vst [vmem:[%s6788_s8 + $0x90] sm:$0xff] %v2317_v10  ;;  %v2383_v4 = vld [vmem:[%s6589_s30 + $0x150] sm:$0xff]  ;;  %v2385_v50 = vld [vmem:[%s6589_s30 + $0x158] sm:$0xff] }
 0x25e   : > { %2320 = vst [vmem:[%s6788_s8 + $0xa0] sm:$0xff] %v2319_v44  ;;  %2322 = vst [vmem:[%s6788_s8 + $0xb0] sm:$0xff] %v2321_v39  ;;  %v2387_v5 = vld [vmem:[%s6589_s30 + $0x160] sm:$0xff]  ;;  %v2389_v20 = vld [vmem:[%s6589_s30 + $0x168] sm:$0xff] }
 0x25f   : > { %2324 = vst [vmem:[%s6788_s8 + $0xc0] sm:$0xff] %v2323_v42  ;;  %2326 = vst [vmem:[%s6788_s8 + $0xd0] sm:$0xff] %v2325_v1  ;;  %v2391_v18 = vld [vmem:[%s6589_s30 + $0x170] sm:$0xff]  ;;  %v2393_v41 = vld [vmem:[%s6589_s30 + $0x178] sm:$0xff] }
 0x260   : > { %2328 = vst [vmem:[%s6788_s8 + $0xe0] sm:$0xff] %v2327_v33  ;;  %2330 = vst [vmem:[%s6788_s8 + $0xf0] sm:$0xff] %v2329_v49  ;;  %v2395_v58 = vld [vmem:[%s6589_s30 + $0x180] sm:$0xff]  ;;  %v2397_v14 = vld [vmem:[%s6589_s30 + $0x188] sm:$0xff] }
 0x261   : > { %2332 = vst [vmem:[%s6788_s8 + $0x100] sm:$0xff] %v2331_v2  ;;  %2334 = vst [vmem:[%s6788_s8 + $0x110] sm:$0xff] %v2333_v3  ;;  %v2399_v31 = vld [vmem:[%s6589_s30 + $0x190] sm:$0xff]  ;;  %v2401_v7 = vld [vmem:[%s6589_s30 + $0x198] sm:$0xff] }
 0x262   : > { %2336 = vst [vmem:[%s6788_s8 + $0x120] sm:$0xff] %v2335_v47  ;;  %2338 = vst [vmem:[%s6788_s8 + $0x130] sm:$0xff] %v2337_v9  ;;  %v2403_v36 = vld [vmem:[%s6589_s30 + $0x1a0] sm:$0xff]  ;;  %v2405_v28 = vld [vmem:[%s6589_s30 + $0x1a8] sm:$0xff] }
 0x263   : > { %2340 = vst [vmem:[%s6788_s8 + $0x140] sm:$0xff] %v2339_v61  ;;  %2342 = vst [vmem:[%s6788_s8 + $0x150] sm:$0xff] %v2341_v38  ;;  %v2407_v40 = vld [vmem:[%s6589_s30 + $0x1b0] sm:$0xff]  ;;  %v2409_v54 = vld [vmem:[%s6589_s30 + $0x1b8] sm:$0xff] }
 0x264   : > { %2344 = vst [vmem:[%s6788_s8 + $0x160] sm:$0xff] %v2343_v55  ;;  %2346 = vst [vmem:[%s6788_s8 + $0x170] sm:$0xff] %v2345_v21 }
 0x265   : > { %2348 = vst [vmem:[%s6788_s8 + $0x180] sm:$0xff] %v2347_v32  ;;  %2350 = vst [vmem:[%s6788_s8 + $0x190] sm:$0xff] %v2349_v23 }
 0x266   : > { %2352 = vst [vmem:[%s6788_s8 + $0x1a0] sm:$0xff] %v2351_v37  ;;  %2354 = vst [vmem:[%s6788_s8 + $0x1b0] sm:$0xff] %v2353_v25 }
 0x267   : > { %2356 = vst [vmem:[%s6788_s8 + $0x1c0] sm:$0xff] %v2355_v45  ;;  %2358 = vst [vmem:[%s6788_s8 + $0x1d0] sm:$0xff] %v2357_v43 }
 0x268   : > { %2360 = vst [vmem:[%s6788_s8 + $0x1e0] sm:$0xff] %v2359_v22  ;;  %2362 = vst [vmem:[%s6788_s8 + $0x1f0] sm:$0xff] %v2361_v62 }
 0x269   : > { %2364 = vst [vmem:[%s6788_s8 + $0x200] sm:$0xff] %v2363_v48  ;;  %2366 = vst [vmem:[%s6788_s8 + $0x210] sm:$0xff] %v2365_v52 }
 0x26a   : > { %2368 = vst [vmem:[%s6788_s8 + $0x220] sm:$0xff] %v2367_v27  ;;  %2370 = vst [vmem:[%s6788_s8 + $0x230] sm:$0xff] %v2369_v63 }
 0x26b   : > { %2372 = vst [vmem:[%s6788_s8 + $0x240] sm:$0xff] %v2371_v53  ;;  %2374 = vst [vmem:[%s6788_s8 + $0x250] sm:$0xff] %v2373_v17 }
 0x26c   : > { %2376 = vst [vmem:[%s6788_s8 + $0x260] sm:$0xff] %v2375_v29  ;;  %2378 = vst [vmem:[%s6788_s8 + $0x270] sm:$0xff] %v2377_v6 }
 0x26d   : > { %2380 = vst [vmem:[%s6788_s8 + $0x280] sm:$0xff] %v2379_v15  ;;  %2382 = vst [vmem:[%s6788_s8 + $0x290] sm:$0xff] %v2381_v57 }
 0x26e   : > { %2384 = vst [vmem:[%s6788_s8 + $0x2a0] sm:$0xff] %v2383_v4  ;;  %2386 = vst [vmem:[%s6788_s8 + $0x2b0] sm:$0xff] %v2385_v50 }
 0x26f   : > { %2388 = vst [vmem:[%s6788_s8 + $0x2c0] sm:$0xff] %v2387_v5  ;;  %2390 = vst [vmem:[%s6788_s8 + $0x2d0] sm:$0xff] %v2389_v20 }
 0x270   : > { %2392 = vst [vmem:[%s6788_s8 + $0x2e0] sm:$0xff] %v2391_v18  ;;  %2394 = vst [vmem:[%s6788_s8 + $0x2f0] sm:$0xff] %v2393_v41 }
 0x271   : > { %2396 = vst [vmem:[%s6788_s8 + $0x300] sm:$0xff] %v2395_v58  ;;  %2398 = vst [vmem:[%s6788_s8 + $0x310] sm:$0xff] %v2397_v14 }
 0x272   : > { %2400 = vst [vmem:[%s6788_s8 + $0x320] sm:$0xff] %v2399_v31  ;;  %2402 = vst [vmem:[%s6788_s8 + $0x330] sm:$0xff] %v2401_v7 }
 0x273   : > { %2404 = vst [vmem:[%s6788_s8 + $0x340] sm:$0xff] %v2403_v36  ;;  %2406 = vst [vmem:[%s6788_s8 + $0x350] sm:$0xff] %v2405_v28 }
 0x274   : > { %2408 = vst [vmem:[%s6788_s8 + $0x360] sm:$0xff] %v2407_v40  ;;  %2410 = vst [vmem:[%s6788_s8 + $0x370] sm:$0xff] %v2409_v54 }
 0x275 PF: > { %p11_p11 = scmp.ge.s32.totalorder %s2767_s19, 4   ;;  %s8128_s15 = smov %s2717_s16 }
 0x276   : > { %s8129_s16 = smov %s2777_s22  ;;  %s8130_s17 = smov %s2767_s19 }
 0x277   :  { %13 = sbr.rel (!%p11_p11) target bundleno = 2 (0x2), region = 199 }

</bundles_post_ra>
